<compile_context>
chip_gen: v7x
topology: tpu7x:2x2x1
jax: 0.10.0
libtpu: 0.0.40
codegen_flags: <defaults>
</compile_context>

<pallas_src>
import jax
import jax.numpy as jnp
import numpy as np
from jax import lax
from jax.experimental import pallas as pl
from jax.experimental.pallas import tpu as pltpu

NUM_CLASSES = 10
EPS = 1e-5
KP = 16            # per-spatial-row class-block width in the folded classifier weight
OUT_LANES = 128    # lane-dense (padded) classifier width
NEG_PAD = -1e9     # bias of padded classifier lanes (drops out of the softmax)


# --------------------------- in-kernel helpers -----------------------------

def _bn_apply(h, proj_ref, gamma, beta):
    """Training-mode BatchNorm on an L-layout (rows, Wo*C) tensor.

    Per-channel batch statistics via a host-built channel-pooling projector:
    E[x] and E[x^2] are projected independently (two parallel M=1 matmuls, no
    serialized mu -> center -> var chain); var = E[x^2] - E[x]^2 (biased)."""
    m1 = jnp.dot(jnp.mean(h, axis=0, keepdims=True), proj_ref[...],
                 preferred_element_type=jnp.float32)
    m2 = jnp.dot(jnp.mean(h * h, axis=0, keepdims=True), proj_ref[...],
                 preferred_element_type=jnp.float32)
    var = m2 - m1 * m1
    scale = gamma * lax.rsqrt(var + EPS)          # rsqrt -> EUP slot
    return (h - m1) * scale + beta


def _residual_block(xm, g_ref, rhs1_ref, w23_ref, proj1_ref, proj2_ref,
                    gb_ref, rows, Wo, C1, C2):
    """One ResidualBlock in L-layout: xm (B*H, H*C0) -> (B*Wo, Wo*C2)."""
    N1, N2 = Wo * C1, Wo * C2
    # conv_1 (3x3, stride 2, pad 1): three host-built one-hot row gathers (dy)
    # times the kron-folded column/channel weights rhs1[dy], accumulated on MXU.
    # TODO(synk): on v6e+ the three dy contractions could be fused into a single
    # K=3*H*C0 matmul via a lane concat of the gathered rows; kept split to stay
    # on the well-trodden lowering path.
    acc = None
    xg_c = None
    for dy in range(3):
        t = jnp.dot(g_ref[dy], xm, preferred_element_type=jnp.float32)  # (B*Wo, H*C0)
        if dy == 1:
            xg_c = t               # rows h = 2*ho: also the shortcut conv's input
        term = jnp.dot(t, rhs1_ref[dy], preferred_element_type=jnp.float32)
        acc = term if acc is None else acc + term                       # (B*Wo, Wo*C1)
    r0, r1, r2 = rows
    h1 = _bn_apply(acc, proj1_ref,
                   gb_ref[r0:r0 + 1, :N1], gb_ref[r0 + 1:r0 + 2, :N1])
    h1 = jnp.maximum(h1, 0.0)
    # conv_2 (1x1, s1) and shortcut conv (1x1, s2): weights stacked row-wise in
    # w23 (kron-folded so N = Wo*C2 lanes).  Conv biases dropped: cancelled
    # exactly by the training-mode BatchNorm that follows.
    h2 = jnp.dot(h1, w23_ref[:N1, :], preferred_element_type=jnp.float32)
    sc = jnp.dot(xg_c, w23_ref[N1:, :], preferred_element_type=jnp.float32)
    y2 = _bn_apply(h2, proj2_ref,
                   gb_ref[r1:r1 + 1, :N2], gb_ref[r1 + 1:r1 + 2, :N2])
    ys = _bn_apply(sc, proj2_ref,
                   gb_ref[r2:r2 + 1, :N2], gb_ref[r2 + 1:r2 + 2, :N2])
    return jnp.maximum(y2 + ys, 0.0)                                    # (B*Wo, Wo*C2)


def _fused_kernel(xm_ref, g_b1, rhs1_b1, w23_b1, proj1_b1, proj2_b1,
                  g_b2, rhs1_b2, w23_b2, proj1_b2, proj2_b2,
                  gb_ref, wl_ref, mask_ref, csum_ref, rsum_ref, bl_ref,
                  logits_ref, probas_ref):
    xm = xm_ref[...]                                                    # (B*28, 28)
    out1 = _residual_block(xm, g_b1, rhs1_b1, w23_b1, proj1_b1, proj2_b1,
                           gb_ref, (0, 2, 4), 14, 4, 8)                 # (B*14, 112)
    out2 = _residual_block(out1, g_b2, rhs1_b2, w23_b2, proj1_b2, proj2_b2,
                           gb_ref, (6, 8, 10), 7, 16, 32)               # (B*7, 224)
    # Classifier: one wide matmul, then a masked diagonal-block reduction with
    # two host-built constant matmuls.  All operands / outputs are lane-dense
    # (classifier padded to 128 lanes).
    t = jnp.dot(out2, wl_ref[...], preferred_element_type=jnp.float32)  # (B*7, 7*KP)
    v = jnp.dot(t * mask_ref[...], csum_ref[...],
                preferred_element_type=jnp.float32)                     # (B*7, 128)
    logits = jnp.dot(rsum_ref[...], v,
                     preferred_element_type=jnp.float32) + bl_ref[...]  # (B, 128)
    logits_ref[...] = logits
    m = jnp.max(logits, axis=1, keepdims=True)
    e = jnp.exp(logits - m)        # padded lanes hold -1e9 bias -> exp == 0
    probas_ref[...] = e / jnp.sum(e, axis=1, keepdims=True)   # exact divide


# ------------------------------ JAX wrapper ---------------------------------

def convnet_forward(x_nchw, consts):
    B = x_nchw.shape[0]
    # NCHW -> NHWC -> L-layout (B*H, W*C): the only runtime host-side data prep.
    xm = jnp.transpose(x_nchw, (0, 2, 3, 1)).reshape(B * 28, 28 * 1)
    logits_pad, probas_pad = pl.pallas_call(
        _fused_kernel,
        out_shape=(jax.ShapeDtypeStruct((B, OUT_LANES), jnp.float32),
                   jax.ShapeDtypeStruct((B, OUT_LANES), jnp.float32)),
        compiler_params=pltpu.CompilerParams(vmem_limit_bytes=32 * 1024 * 1024),
    )(xm,
      consts['g_b1'], consts['rhs1_b1'], consts['w23_b1'],
      consts['proj1_b1'], consts['proj2_b1'],
      consts['g_b2'], consts['rhs1_b2'], consts['w23_b2'],
      consts['proj1_b2'], consts['proj2_b2'],
      consts['gb'], consts['wl_flat'], consts['mask'], consts['csum'],
      consts['rsum'], consts['bl_pad'])
    return logits_pad[:, :NUM_CLASSES], probas_pad[:, :NUM_CLASSES]


# ---------------------- one-time host-side constant folding -----------------

def _col_select(W, Wo, dx):
    """Rw[wo, w] = 1 iff w == 2*wo - 1 + dx (zero row when in the padding)."""
    rw = np.zeros((Wo, W), np.float32)
    for wo in range(Wo):
        w = 2 * wo - 1 + dx
        if 0 <= w < W:
            rw[wo, w] = 1.0
    return rw


def _build_row_gathers(B, H):
    """(3, B*Ho, B*H) one-hot matrices: output row (b, ho) <- input row
    (b, 2*ho - 1 + dy); rows whose source lies in the zero padding are zero."""
    Ho = H // 2
    g = np.zeros((3, B * Ho, B * H), np.float32)
    for dy in range(3):
        for b in range(B):
            for ho in range(Ho):
                h = 2 * ho - 1 + dy
                if 0 <= h < H:
                    g[dy, b * Ho + ho, b * H + h] = 1.0
    return jnp.asarray(g)


def _build_channel_pool(Wo, C):
    """(Wo*C, Wo*C) projector: right-multiplying a (1, Wo*C) row of per-column
    statistics averages over the Wo spatial columns of each channel and
    broadcasts the per-channel value back to every column of that channel."""
    n = Wo * C
    i = np.arange(n)[:, None]
    j = np.arange(n)[None, :]
    return jnp.asarray(np.where((i % C) == (j % C), 1.0 / Wo, 0.0).astype(np.float32))


def _fold_block_weights(p, H, C0, C1, C2):
    """Fold the w-selection / channel contraction of all three convs of a block
    into L-layout matmul weights.  One-time, at init, on the host."""
    W, Wo = H, H // 2
    w1 = np.asarray(p['w1'])                          # (3, 3, C0, C1) HWIO
    w2 = np.asarray(p['w2']).reshape(C1, C2)
    ws = np.asarray(p['ws']).reshape(C0, C2)
    rhs1 = np.stack([
        sum(np.kron(_col_select(W, Wo, dx).T, w1[dy, dx]) for dx in range(3))
        for dy in range(3)], axis=0)                                  # (3, W*C0, Wo*C1)
    m2 = np.kron(np.eye(Wo, dtype=np.float32), w2)                    # (Wo*C1, Wo*C2)
    ms = np.kron(_col_select(W, Wo, 1).T, ws)                         # (W*C0,  Wo*C2)
    w23 = np.concatenate([m2, ms], axis=0)                            # (Wo*C1+W*C0, Wo*C2)
    return (jnp.asarray(rhs1.astype(np.float32)),
            jnp.asarray(w23.astype(np.float32)))


def _pack_bn_params(p1, p2):
    """Pack all 12 per-channel BN gamma/beta vectors (tiled to the L-layout lane
    order) into a single (12, 224) operand."""
    width = 7 * 32
    gb = np.zeros((12, width), np.float32)

    def put(row, gamma, beta, Wo):
        g = np.tile(np.asarray(gamma).reshape(-1), Wo)
        b = np.tile(np.asarray(beta).reshape(-1), Wo)
        gb[row, :g.size] = g
        gb[row + 1, :b.size] = b

    put(0, p1['g1'], p1['be1'], 14)
    put(2, p1['g2'], p1['be2'], 14)
    put(4, p1['gs'], p1['bes'], 14)
    put(6, p2['g1'], p2['be1'], 7)
    put(8, p2['g2'], p2['be2'], 7)
    put(10, p2['gs'], p2['bes'], 7)
    return jnp.asarray(gb)


def _fold_classifier(w_lin, b_lin, B):
    """PyTorch flattens the (B, 32, 7, 7) NCHW tensor as (c, h, w); the kernel's
    L-layout feature order is (h, (w, c)).  Build, once at init:
      wl_flat (224, 7*KP): column block h holds the weights for spatial row h,
      mask    (B*7, 7*KP): keeps only the diagonal (row h picks column block h),
      csum    (7*KP, 128): sums the 7 column blocks into 128 padded class lanes,
      rsum    (B, B*7):    sums the 7 spatial rows of each batch element,
      bl_pad  (1, 128):    bias, padded lanes get -1e9 so softmax ignores them."""
    K = NUM_CLASSES
    w = np.asarray(w_lin).reshape(32, 7, 7, K)                    # (c, h, w, k)
    wl = np.transpose(w, (1, 2, 0, 3)).reshape(7, 7 * 32, K)      # (h, (w,c), k)
    wl_flat = np.zeros((7 * 32, 7 * KP), np.float32)
    mask = np.zeros((B * 7, 7 * KP), np.float32)
    csum = np.zeros((7 * KP, OUT_LANES), np.float32)
    rsum = np.zeros((B, B * 7), np.float32)
    for h in range(7):
        wl_flat[:, h * KP:h * KP + K] = wl[h]
        csum[h * KP:(h + 1) * KP, :KP] = np.eye(KP, dtype=np.float32)
        for b in range(B):
            mask[b * 7 + h, h * KP:(h + 1) * KP] = 1.0
            rsum[b, b * 7 + h] = 1.0
    bl_pad = np.full((1, OUT_LANES), NEG_PAD, np.float32)
    bl_pad[0, :K] = np.asarray(b_lin).reshape(-1)
    return (jnp.asarray(wl_flat), jnp.asarray(mask), jnp.asarray(csum),
            jnp.asarray(rsum), jnp.asarray(bl_pad))


def prepare_consts(p1, p2, w_lin, b_lin, B):
    rhs1_b1, w23_b1 = _fold_block_weights(p1, 28, 1, 4, 8)
    rhs1_b2, w23_b2 = _fold_block_weights(p2, 14, 8, 16, 32)
    wl_flat, mask, csum, rsum, bl_pad = _fold_classifier(w_lin, b_lin, B)
    return dict(
        g_b1=_build_row_gathers(B, 28), rhs1_b1=rhs1_b1, w23_b1=w23_b1,
        proj1_b1=_build_channel_pool(14, 4), proj2_b1=_build_channel_pool(14, 8),
        g_b2=_build_row_gathers(B, 14), rhs1_b2=rhs1_b2, w23_b2=w23_b2,
        proj1_b2=_build_channel_pool(7, 16), proj2_b2=_build_channel_pool(7, 32),
        gb=_pack_bn_params(p1, p2),
        wl_flat=wl_flat, mask=mask, csum=csum, rsum=rsum, bl_pad=bl_pad)


# ------------------------------ parameter init ------------------------------

def _init_block(key, channels):
    c0, c1, c2 = channels
    ks = jax.random.split(key, 12)
    w1 = jax.random.normal(ks[0], (3, 3, c0, c1), jnp.float32) / np.sqrt(9 * c0)
    b1 = jax.random.normal(ks[1], (c1,), jnp.float32) * 0.1
    w2 = jax.random.normal(ks[2], (1, 1, c1, c2), jnp.float32) / np.sqrt(c1)
    b2 = jax.random.normal(ks[3], (c2,), jnp.float32) * 0.1
    ws = jax.random.normal(ks[4], (1, 1, c0, c2), jnp.float32) / np.sqrt(c0)
    bs = jax.random.normal(ks[5], (c2,), jnp.float32) * 0.1
    # Non-default BN affine params so the gamma/beta plumbing is actually tested.
    return dict(
        w1=w1, b1=b1, w2=w2, b2=b2, ws=ws, bs=bs,
        g1=1.0 + 0.1 * jax.random.normal(ks[6], (c1,), jnp.float32),
        be1=0.1 * jax.random.normal(ks[7], (c1,), jnp.float32),
        g2=1.0 + 0.1 * jax.random.normal(ks[8], (c2,), jnp.float32),
        be2=0.1 * jax.random.normal(ks[9], (c2,), jnp.float32),
        gs=1.0 + 0.1 * jax.random.normal(ks[10], (c2,), jnp.float32),
        bes=0.1 * jax.random.normal(ks[11], (c2,), jnp.float32))


# ----------------------- pure-JAX reference (check) --------------------------

def _conv_ref(x, w_hwio, b, stride, pad):
    y = lax.conv_general_dilated(x, w_hwio, (stride, stride),
                                 [(pad, pad), (pad, pad)],
                                 dimension_numbers=('NHWC', 'HWIO', 'NHWC'))
    return y + b.reshape(1, 1, 1, -1)


def _bn_ref(x, g, be):
    mu = jnp.mean(x, axis=(0, 1, 2), keepdims=True)
    var = jnp.mean((x - mu) ** 2, axis=(0, 1, 2), keepdims=True)
    return (x - mu) / jnp.sqrt(var + EPS) * g.reshape(1, 1, 1, -1) + be.reshape(1, 1, 1, -1)


def _block_ref(x, p):
    # Reference keeps the conv biases; training-mode BN cancels them exactly,
    # which is why the Pallas kernel drops them.
    h = jax.nn.relu(_bn_ref(_conv_ref(x, p['w1'], p['b1'], 2, 1), p['g1'], p['be1']))
    h = _bn_ref(_conv_ref(h, p['w2'], p['b2'], 1, 0), p['g2'], p['be2'])
    s = _bn_ref(_conv_ref(x, p['ws'], p['bs'], 2, 0), p['gs'], p['bes'])
    return jax.nn.relu(h + s)


# ----------------------------------- main ------------------------------------

if __name__ == "__main__":
    key = jax.random.PRNGKey(0)
    kx, kb1, kb2, kwl, kbl = jax.random.split(key, 5)

    B = 2
    # Same shape the PyTorch module expects (MNIST-like): NCHW (2, 1, 28, 28)
    x_nchw = jax.random.normal(kx, (B, 1, 28, 28), jnp.float32)

    p1 = _init_block(kb1, (1, 4, 8))
    p2 = _init_block(kb2, (8, 16, 32))
    w_lin = jax.random.normal(kwl, (7 * 7 * 32, NUM_CLASSES), jnp.float32) / np.sqrt(7 * 7 * 32)
    b_lin = jax.random.normal(kbl, (1, NUM_CLASSES), jnp.float32) * 0.1

    consts = prepare_consts(p1, p2, w_lin, b_lin, B)

    fwd = jax.jit(convnet_forward)
    logits, probas = fwd(x_nchw, consts)
    jax.block_until_ready((logits, probas))

    # Pure-JAX reference of the PyTorch module.
    x = jnp.transpose(x_nchw, (0, 2, 3, 1))
    r1 = _block_ref(x, p1)
    r2 = _block_ref(r1, p2)
    feat = jnp.transpose(r2, (0, 3, 1, 2)).reshape(B, -1)
    logits_r = feat @ w_lin + b_lin
    probas_r = jax.nn.softmax(logits_r, axis=1)

    assert np.allclose(np.asarray(logits), np.asarray(logits_r), atol=2e-3, rtol=2e-3), \
        "logits mismatch vs reference"
    assert np.allclose(np.asarray(probas), np.asarray(probas_r), atol=2e-3), \
        "probas mismatch vs reference"

    print("KERNEL_OK")
</pallas_src>

<mosaic_0001>
module attributes {stable_mosaic.version = 11 : i64} {
  func.func @_fused_kernel(%arg0: memref<56x28xf32, #tpu.memory_space<vmem>>, %arg1: memref<3x28x56xf32, #tpu.memory_space<vmem>>, %arg2: memref<3x28x56xf32, #tpu.memory_space<vmem>>, %arg3: memref<84x112xf32, #tpu.memory_space<vmem>>, %arg4: memref<56x56xf32, #tpu.memory_space<vmem>>, %arg5: memref<112x112xf32, #tpu.memory_space<vmem>>, %arg6: memref<3x14x28xf32, #tpu.memory_space<vmem>>, %arg7: memref<3x112x112xf32, #tpu.memory_space<vmem>>, %arg8: memref<224x224xf32, #tpu.memory_space<vmem>>, %arg9: memref<112x112xf32, #tpu.memory_space<vmem>>, %arg10: memref<224x224xf32, #tpu.memory_space<vmem>>, %arg11: memref<12x224xf32, #tpu.memory_space<vmem>>, %arg12: memref<224x112xf32, #tpu.memory_space<vmem>>, %arg13: memref<14x112xf32, #tpu.memory_space<vmem>>, %arg14: memref<112x128xf32, #tpu.memory_space<vmem>>, %arg15: memref<2x14xf32, #tpu.memory_space<vmem>>, %arg16: memref<1x128xf32, #tpu.memory_space<vmem>>, %arg17: memref<2x128xf32, #tpu.memory_space<vmem>>, %arg18: memref<2x128xf32, #tpu.memory_space<vmem>>) attributes {dimension_semantics = [], scalar_prefetch = 0 : i64, scratch_operands = 0 : i64, tpu.core_type = #tpu.core_type<tc>} {
    %c0 = arith.constant 0 : index
    %c0_0 = arith.constant 0 : index
    %0 = vector.load %arg0[%c0, %c0_0] : memref<56x28xf32, #tpu.memory_space<vmem>>, vector<56x28xf32>
    %c0_1 = arith.constant 0 : index
    %c0_2 = arith.constant 0 : index
    %c0_3 = arith.constant 0 : index
    %1 = vector.load %arg1[%c0_1, %c0_2, %c0_3] : memref<3x28x56xf32, #tpu.memory_space<vmem>>, vector<1x28x56xf32>
    %2 = vector.shape_cast %1 : vector<1x28x56xf32> to vector<28x56xf32>
    %cst = arith.constant dense<0.000000e+00> : vector<28x28xf32>
    %3 = tpu.matmul %2, %0, %cst {dimension_numbers = #tpu.dot_dimension_numbers<[1], [0], [0], [1], [0, 0, 1, 1], [], []>} : vector<28x56xf32>, vector<56x28xf32>, vector<28x28xf32> -> vector<28x28xf32>
    %c0_4 = arith.constant 0 : index
    %c0_5 = arith.constant 0 : index
    %c0_6 = arith.constant 0 : index
    %4 = vector.load %arg2[%c0_4, %c0_5, %c0_6] : memref<3x28x56xf32, #tpu.memory_space<vmem>>, vector<1x28x56xf32>
    %5 = vector.shape_cast %4 : vector<1x28x56xf32> to vector<28x56xf32>
    %cst_7 = arith.constant dense<0.000000e+00> : vector<28x56xf32>
    %6 = tpu.matmul %3, %5, %cst_7 {dimension_numbers = #tpu.dot_dimension_numbers<[1], [0], [0], [1], [0, 0, 1, 1], [], []>} : vector<28x28xf32>, vector<28x56xf32>, vector<28x56xf32> -> vector<28x56xf32>
    %c1 = arith.constant 1 : index
    %c0_8 = arith.constant 0 : index
    %c0_9 = arith.constant 0 : index
    %7 = vector.load %arg1[%c1, %c0_8, %c0_9] : memref<3x28x56xf32, #tpu.memory_space<vmem>>, vector<1x28x56xf32>
    %8 = vector.shape_cast %7 : vector<1x28x56xf32> to vector<28x56xf32>
    %cst_10 = arith.constant dense<0.000000e+00> : vector<28x28xf32>
    %9 = tpu.matmul %8, %0, %cst_10 {dimension_numbers = #tpu.dot_dimension_numbers<[1], [0], [0], [1], [0, 0, 1, 1], [], []>} : vector<28x56xf32>, vector<56x28xf32>, vector<28x28xf32> -> vector<28x28xf32>
    %c1_11 = arith.constant 1 : index
    %c0_12 = arith.constant 0 : index
    %c0_13 = arith.constant 0 : index
    %10 = vector.load %arg2[%c1_11, %c0_12, %c0_13] : memref<3x28x56xf32, #tpu.memory_space<vmem>>, vector<1x28x56xf32>
    %11 = vector.shape_cast %10 : vector<1x28x56xf32> to vector<28x56xf32>
    %cst_14 = arith.constant dense<0.000000e+00> : vector<28x56xf32>
    %12 = tpu.matmul %9, %11, %cst_14 {dimension_numbers = #tpu.dot_dimension_numbers<[1], [0], [0], [1], [0, 0, 1, 1], [], []>} : vector<28x28xf32>, vector<28x56xf32>, vector<28x56xf32> -> vector<28x56xf32>
    %13 = arith.addf %6, %12 : vector<28x56xf32>
    %c2 = arith.constant 2 : index
    %c0_15 = arith.constant 0 : index
    %c0_16 = arith.constant 0 : index
    %14 = vector.load %arg1[%c2, %c0_15, %c0_16] : memref<3x28x56xf32, #tpu.memory_space<vmem>>, vector<1x28x56xf32>
    %15 = vector.shape_cast %14 : vector<1x28x56xf32> to vector<28x56xf32>
    %cst_17 = arith.constant dense<0.000000e+00> : vector<28x28xf32>
    %16 = tpu.matmul %15, %0, %cst_17 {dimension_numbers = #tpu.dot_dimension_numbers<[1], [0], [0], [1], [0, 0, 1, 1], [], []>} : vector<28x56xf32>, vector<56x28xf32>, vector<28x28xf32> -> vector<28x28xf32>
    %c2_18 = arith.constant 2 : index
    %c0_19 = arith.constant 0 : index
    %c0_20 = arith.constant 0 : index
    %17 = vector.load %arg2[%c2_18, %c0_19, %c0_20] : memref<3x28x56xf32, #tpu.memory_space<vmem>>, vector<1x28x56xf32>
    %18 = vector.shape_cast %17 : vector<1x28x56xf32> to vector<28x56xf32>
    %cst_21 = arith.constant dense<0.000000e+00> : vector<28x56xf32>
    %19 = tpu.matmul %16, %18, %cst_21 {dimension_numbers = #tpu.dot_dimension_numbers<[1], [0], [0], [1], [0, 0, 1, 1], [], []>} : vector<28x28xf32>, vector<28x56xf32>, vector<28x56xf32> -> vector<28x56xf32>
    %20 = arith.addf %13, %19 : vector<28x56xf32>
    %c0_22 = arith.constant 0 : index
    %c0_23 = arith.constant 0 : index
    %21 = vector.load %arg11[%c0_22, %c0_23] : memref<12x224xf32, #tpu.memory_space<vmem>>, vector<1x56xf32>
    %c1_24 = arith.constant 1 : index
    %c0_25 = arith.constant 0 : index
    %22 = vector.load %arg11[%c1_24, %c0_25] : memref<12x224xf32, #tpu.memory_space<vmem>>, vector<1x56xf32>
    %cst_26 = arith.constant dense<0.000000e+00> : vector<56xf32>
    %23 = vector.multi_reduction <add>, %20, %cst_26 [0] : vector<28x56xf32> to vector<56xf32>
    %24 = vector.shape_cast %23 : vector<56xf32> to vector<1x56xf32>
    %cst_27 = arith.constant 2.800000e+01 : f32
    %25 = vector.broadcast %cst_27 : f32 to vector<1x56xf32>
    %26 = arith.divf %24, %25 : vector<1x56xf32>
    %c0_28 = arith.constant 0 : index
    %c0_29 = arith.constant 0 : index
    %27 = vector.load %arg4[%c0_28, %c0_29] : memref<56x56xf32, #tpu.memory_space<vmem>>, vector<56x56xf32>
    %cst_30 = arith.constant dense<0.000000e+00> : vector<1x56xf32>
    %28 = tpu.matmul %26, %27, %cst_30 {dimension_numbers = #tpu.dot_dimension_numbers<[1], [0], [0], [1], [0, 0, 1, 1], [], []>} : vector<1x56xf32>, vector<56x56xf32>, vector<1x56xf32> -> vector<1x56xf32>
    %29 = arith.mulf %20, %20 : vector<28x56xf32>
    %cst_31 = arith.constant dense<0.000000e+00> : vector<56xf32>
    %30 = vector.multi_reduction <add>, %29, %cst_31 [0] : vector<28x56xf32> to vector<56xf32>
    %31 = vector.shape_cast %30 : vector<56xf32> to vector<1x56xf32>
    %cst_32 = arith.constant 2.800000e+01 : f32
    %32 = vector.broadcast %cst_32 : f32 to vector<1x56xf32>
    %33 = arith.divf %31, %32 : vector<1x56xf32>
    %c0_33 = arith.constant 0 : index
    %c0_34 = arith.constant 0 : index
    %34 = vector.load %arg4[%c0_33, %c0_34] : memref<56x56xf32, #tpu.memory_space<vmem>>, vector<56x56xf32>
    %cst_35 = arith.constant dense<0.000000e+00> : vector<1x56xf32>
    %35 = tpu.matmul %33, %34, %cst_35 {dimension_numbers = #tpu.dot_dimension_numbers<[1], [0], [0], [1], [0, 0, 1, 1], [], []>} : vector<1x56xf32>, vector<56x56xf32>, vector<1x56xf32> -> vector<1x56xf32>
    %36 = arith.mulf %28, %28 : vector<1x56xf32>
    %37 = arith.subf %35, %36 : vector<1x56xf32>
    %cst_36 = arith.constant 9.99999974E-6 : f32
    %38 = vector.broadcast %cst_36 : f32 to vector<1x56xf32>
    %39 = arith.addf %37, %38 : vector<1x56xf32>
    %40 = math.rsqrt %39 : vector<1x56xf32>
    %41 = arith.mulf %21, %40 : vector<1x56xf32>
    %42 = vector.broadcast %28 : vector<1x56xf32> to vector<28x56xf32>
    %43 = arith.subf %20, %42 : vector<28x56xf32>
    %44 = vector.broadcast %41 : vector<1x56xf32> to vector<28x56xf32>
    %45 = arith.mulf %43, %44 : vector<28x56xf32>
    %46 = vector.broadcast %22 : vector<1x56xf32> to vector<28x56xf32>
    %47 = arith.addf %45, %46 : vector<28x56xf32>
    %cst_37 = arith.constant 0.000000e+00 : f32
    %48 = vector.broadcast %cst_37 : f32 to vector<28x56xf32>
    %49 = arith.maximumf %47, %48 : vector<28x56xf32>
    %c0_38 = arith.constant 0 : index
    %c0_39 = arith.constant 0 : index
    %50 = vector.load %arg3[%c0_38, %c0_39] : memref<84x112xf32, #tpu.memory_space<vmem>>, vector<56x112xf32>
    %cst_40 = arith.constant dense<0.000000e+00> : vector<28x112xf32>
    %51 = tpu.matmul %49, %50, %cst_40 {dimension_numbers = #tpu.dot_dimension_numbers<[1], [0], [0], [1], [0, 0, 1, 1], [], []>} : vector<28x56xf32>, vector<56x112xf32>, vector<28x112xf32> -> vector<28x112xf32>
    %c56 = arith.constant 56 : index
    %c0_41 = arith.constant 0 : index
    %52 = vector.load %arg3[%c56, %c0_41] : memref<84x112xf32, #tpu.memory_space<vmem>>, vector<28x112xf32>
    %cst_42 = arith.constant dense<0.000000e+00> : vector<28x112xf32>
    %53 = tpu.matmul %9, %52, %cst_42 {dimension_numbers = #tpu.dot_dimension_numbers<[1], [0], [0], [1], [0, 0, 1, 1], [], []>} : vector<28x28xf32>, vector<28x112xf32>, vector<28x112xf32> -> vector<28x112xf32>
    %c2_43 = arith.constant 2 : index
    %c0_44 = arith.constant 0 : index
    %54 = vector.load %arg11[%c2_43, %c0_44] : memref<12x224xf32, #tpu.memory_space<vmem>>, vector<1x112xf32>
    %c3 = arith.constant 3 : index
    %c0_45 = arith.constant 0 : index
    %55 = vector.load %arg11[%c3, %c0_45] : memref<12x224xf32, #tpu.memory_space<vmem>>, vector<1x112xf32>
    %cst_46 = arith.constant dense<0.000000e+00> : vector<112xf32>
    %56 = vector.multi_reduction <add>, %51, %cst_46 [0] : vector<28x112xf32> to vector<112xf32>
    %57 = vector.shape_cast %56 : vector<112xf32> to vector<1x112xf32>
    %cst_47 = arith.constant 2.800000e+01 : f32
    %58 = vector.broadcast %cst_47 : f32 to vector<1x112xf32>
    %59 = arith.divf %57, %58 : vector<1x112xf32>
    %c0_48 = arith.constant 0 : index
    %c0_49 = arith.constant 0 : index
    %60 = vector.load %arg5[%c0_48, %c0_49] : memref<112x112xf32, #tpu.memory_space<vmem>>, vector<112x112xf32>
    %cst_50 = arith.constant dense<0.000000e+00> : vector<1x112xf32>
    %61 = tpu.matmul %59, %60, %cst_50 {dimension_numbers = #tpu.dot_dimension_numbers<[1], [0], [0], [1], [0, 0, 1, 1], [], []>} : vector<1x112xf32>, vector<112x112xf32>, vector<1x112xf32> -> vector<1x112xf32>
    %62 = arith.mulf %51, %51 : vector<28x112xf32>
    %cst_51 = arith.constant dense<0.000000e+00> : vector<112xf32>
    %63 = vector.multi_reduction <add>, %62, %cst_51 [0] : vector<28x112xf32> to vector<112xf32>
    %64 = vector.shape_cast %63 : vector<112xf32> to vector<1x112xf32>
    %cst_52 = arith.constant 2.800000e+01 : f32
    %65 = vector.broadcast %cst_52 : f32 to vector<1x112xf32>
    %66 = arith.divf %64, %65 : vector<1x112xf32>
    %c0_53 = arith.constant 0 : index
    %c0_54 = arith.constant 0 : index
    %67 = vector.load %arg5[%c0_53, %c0_54] : memref<112x112xf32, #tpu.memory_space<vmem>>, vector<112x112xf32>
    %cst_55 = arith.constant dense<0.000000e+00> : vector<1x112xf32>
    %68 = tpu.matmul %66, %67, %cst_55 {dimension_numbers = #tpu.dot_dimension_numbers<[1], [0], [0], [1], [0, 0, 1, 1], [], []>} : vector<1x112xf32>, vector<112x112xf32>, vector<1x112xf32> -> vector<1x112xf32>
    %69 = arith.mulf %61, %61 : vector<1x112xf32>
    %70 = arith.subf %68, %69 : vector<1x112xf32>
    %cst_56 = arith.constant 9.99999974E-6 : f32
    %71 = vector.broadcast %cst_56 : f32 to vector<1x112xf32>
    %72 = arith.addf %70, %71 : vector<1x112xf32>
    %73 = math.rsqrt %72 : vector<1x112xf32>
    %74 = arith.mulf %54, %73 : vector<1x112xf32>
    %75 = vector.broadcast %61 : vector<1x112xf32> to vector<28x112xf32>
    %76 = arith.subf %51, %75 : vector<28x112xf32>
    %77 = vector.broadcast %74 : vector<1x112xf32> to vector<28x112xf32>
    %78 = arith.mulf %76, %77 : vector<28x112xf32>
    %79 = vector.broadcast %55 : vector<1x112xf32> to vector<28x112xf32>
    %80 = arith.addf %78, %79 : vector<28x112xf32>
    %c4 = arith.constant 4 : index
    %c0_57 = arith.constant 0 : index
    %81 = vector.load %arg11[%c4, %c0_57] : memref<12x224xf32, #tpu.memory_space<vmem>>, vector<1x112xf32>
    %c5 = arith.constant 5 : index
    %c0_58 = arith.constant 0 : index
    %82 = vector.load %arg11[%c5, %c0_58] : memref<12x224xf32, #tpu.memory_space<vmem>>, vector<1x112xf32>
    %cst_59 = arith.constant dense<0.000000e+00> : vector<112xf32>
    %83 = vector.multi_reduction <add>, %53, %cst_59 [0] : vector<28x112xf32> to vector<112xf32>
    %84 = vector.shape_cast %83 : vector<112xf32> to vector<1x112xf32>
    %cst_60 = arith.constant 2.800000e+01 : f32
    %85 = vector.broadcast %cst_60 : f32 to vector<1x112xf32>
    %86 = arith.divf %84, %85 : vector<1x112xf32>
    %c0_61 = arith.constant 0 : index
    %c0_62 = arith.constant 0 : index
    %87 = vector.load %arg5[%c0_61, %c0_62] : memref<112x112xf32, #tpu.memory_space<vmem>>, vector<112x112xf32>
    %cst_63 = arith.constant dense<0.000000e+00> : vector<1x112xf32>
    %88 = tpu.matmul %86, %87, %cst_63 {dimension_numbers = #tpu.dot_dimension_numbers<[1], [0], [0], [1], [0, 0, 1, 1], [], []>} : vector<1x112xf32>, vector<112x112xf32>, vector<1x112xf32> -> vector<1x112xf32>
    %89 = arith.mulf %53, %53 : vector<28x112xf32>
    %cst_64 = arith.constant dense<0.000000e+00> : vector<112xf32>
    %90 = vector.multi_reduction <add>, %89, %cst_64 [0] : vector<28x112xf32> to vector<112xf32>
    %91 = vector.shape_cast %90 : vector<112xf32> to vector<1x112xf32>
    %cst_65 = arith.constant 2.800000e+01 : f32
    %92 = vector.broadcast %cst_65 : f32 to vector<1x112xf32>
    %93 = arith.divf %91, %92 : vector<1x112xf32>
    %c0_66 = arith.constant 0 : index
    %c0_67 = arith.constant 0 : index
    %94 = vector.load %arg5[%c0_66, %c0_67] : memref<112x112xf32, #tpu.memory_space<vmem>>, vector<112x112xf32>
    %cst_68 = arith.constant dense<0.000000e+00> : vector<1x112xf32>
    %95 = tpu.matmul %93, %94, %cst_68 {dimension_numbers = #tpu.dot_dimension_numbers<[1], [0], [0], [1], [0, 0, 1, 1], [], []>} : vector<1x112xf32>, vector<112x112xf32>, vector<1x112xf32> -> vector<1x112xf32>
    %96 = arith.mulf %88, %88 : vector<1x112xf32>
    %97 = arith.subf %95, %96 : vector<1x112xf32>
    %cst_69 = arith.constant 9.99999974E-6 : f32
    %98 = vector.broadcast %cst_69 : f32 to vector<1x112xf32>
    %99 = arith.addf %97, %98 : vector<1x112xf32>
    %100 = math.rsqrt %99 : vector<1x112xf32>
    %101 = arith.mulf %81, %100 : vector<1x112xf32>
    %102 = vector.broadcast %88 : vector<1x112xf32> to vector<28x112xf32>
    %103 = arith.subf %53, %102 : vector<28x112xf32>
    %104 = vector.broadcast %101 : vector<1x112xf32> to vector<28x112xf32>
    %105 = arith.mulf %103, %104 : vector<28x112xf32>
    %106 = vector.broadcast %82 : vector<1x112xf32> to vector<28x112xf32>
    %107 = arith.addf %105, %106 : vector<28x112xf32>
    %108 = arith.addf %80, %107 : vector<28x112xf32>
    %cst_70 = arith.constant 0.000000e+00 : f32
    %109 = vector.broadcast %cst_70 : f32 to vector<28x112xf32>
    %110 = arith.maximumf %108, %109 : vector<28x112xf32>
    %c0_71 = arith.constant 0 : index
    %c0_72 = arith.constant 0 : index
    %c0_73 = arith.constant 0 : index
    %111 = vector.load %arg6[%c0_71, %c0_72, %c0_73] : memref<3x14x28xf32, #tpu.memory_space<vmem>>, vector<1x14x28xf32>
    %112 = vector.shape_cast %111 : vector<1x14x28xf32> to vector<14x28xf32>
    %cst_74 = arith.constant dense<0.000000e+00> : vector<14x112xf32>
    %113 = tpu.matmul %112, %110, %cst_74 {dimension_numbers = #tpu.dot_dimension_numbers<[1], [0], [0], [1], [0, 0, 1, 1], [], []>} : vector<14x28xf32>, vector<28x112xf32>, vector<14x112xf32> -> vector<14x112xf32>
    %c0_75 = arith.constant 0 : index
    %c0_76 = arith.constant 0 : index
    %c0_77 = arith.constant 0 : index
    %114 = vector.load %arg7[%c0_75, %c0_76, %c0_77] : memref<3x112x112xf32, #tpu.memory_space<vmem>>, vector<1x112x112xf32>
    %115 = vector.shape_cast %114 : vector<1x112x112xf32> to vector<112x112xf32>
    %cst_78 = arith.constant dense<0.000000e+00> : vector<14x112xf32>
    %116 = tpu.matmul %113, %115, %cst_78 {dimension_numbers = #tpu.dot_dimension_numbers<[1], [0], [0], [1], [0, 0, 1, 1], [], []>} : vector<14x112xf32>, vector<112x112xf32>, vector<14x112xf32> -> vector<14x112xf32>
    %c1_79 = arith.constant 1 : index
    %c0_80 = arith.constant 0 : index
    %c0_81 = arith.constant 0 : index
    %117 = vector.load %arg6[%c1_79, %c0_80, %c0_81] : memref<3x14x28xf32, #tpu.memory_space<vmem>>, vector<1x14x28xf32>
    %118 = vector.shape_cast %117 : vector<1x14x28xf32> to vector<14x28xf32>
    %cst_82 = arith.constant dense<0.000000e+00> : vector<14x112xf32>
    %119 = tpu.matmul %118, %110, %cst_82 {dimension_numbers = #tpu.dot_dimension_numbers<[1], [0], [0], [1], [0, 0, 1, 1], [], []>} : vector<14x28xf32>, vector<28x112xf32>, vector<14x112xf32> -> vector<14x112xf32>
    %c1_83 = arith.constant 1 : index
    %c0_84 = arith.constant 0 : index
    %c0_85 = arith.constant 0 : index
    %120 = vector.load %arg7[%c1_83, %c0_84, %c0_85] : memref<3x112x112xf32, #tpu.memory_space<vmem>>, vector<1x112x112xf32>
    %121 = vector.shape_cast %120 : vector<1x112x112xf32> to vector<112x112xf32>
    %cst_86 = arith.constant dense<0.000000e+00> : vector<14x112xf32>
    %122 = tpu.matmul %119, %121, %cst_86 {dimension_numbers = #tpu.dot_dimension_numbers<[1], [0], [0], [1], [0, 0, 1, 1], [], []>} : vector<14x112xf32>, vector<112x112xf32>, vector<14x112xf32> -> vector<14x112xf32>
    %123 = arith.addf %116, %122 : vector<14x112xf32>
    %c2_87 = arith.constant 2 : index
    %c0_88 = arith.constant 0 : index
    %c0_89 = arith.constant 0 : index
    %124 = vector.load %arg6[%c2_87, %c0_88, %c0_89] : memref<3x14x28xf32, #tpu.memory_space<vmem>>, vector<1x14x28xf32>
    %125 = vector.shape_cast %124 : vector<1x14x28xf32> to vector<14x28xf32>
    %cst_90 = arith.constant dense<0.000000e+00> : vector<14x112xf32>
    %126 = tpu.matmul %125, %110, %cst_90 {dimension_numbers = #tpu.dot_dimension_numbers<[1], [0], [0], [1], [0, 0, 1, 1], [], []>} : vector<14x28xf32>, vector<28x112xf32>, vector<14x112xf32> -> vector<14x112xf32>
    %c2_91 = arith.constant 2 : index
    %c0_92 = arith.constant 0 : index
    %c0_93 = arith.constant 0 : index
    %127 = vector.load %arg7[%c2_91, %c0_92, %c0_93] : memref<3x112x112xf32, #tpu.memory_space<vmem>>, vector<1x112x112xf32>
    %128 = vector.shape_cast %127 : vector<1x112x112xf32> to vector<112x112xf32>
    %cst_94 = arith.constant dense<0.000000e+00> : vector<14x112xf32>
    %129 = tpu.matmul %126, %128, %cst_94 {dimension_numbers = #tpu.dot_dimension_numbers<[1], [0], [0], [1], [0, 0, 1, 1], [], []>} : vector<14x112xf32>, vector<112x112xf32>, vector<14x112xf32> -> vector<14x112xf32>
    %130 = arith.addf %123, %129 : vector<14x112xf32>
    %c6 = arith.constant 6 : index
    %c0_95 = arith.constant 0 : index
    %131 = vector.load %arg11[%c6, %c0_95] : memref<12x224xf32, #tpu.memory_space<vmem>>, vector<1x112xf32>
    %c7 = arith.constant 7 : index
    %c0_96 = arith.constant 0 : index
    %132 = vector.load %arg11[%c7, %c0_96] : memref<12x224xf32, #tpu.memory_space<vmem>>, vector<1x112xf32>
    %cst_97 = arith.constant dense<0.000000e+00> : vector<112xf32>
    %133 = vector.multi_reduction <add>, %130, %cst_97 [0] : vector<14x112xf32> to vector<112xf32>
    %134 = vector.shape_cast %133 : vector<112xf32> to vector<1x112xf32>
    %cst_98 = arith.constant 1.400000e+01 : f32
    %135 = vector.broadcast %cst_98 : f32 to vector<1x112xf32>
    %136 = arith.divf %134, %135 : vector<1x112xf32>
    %c0_99 = arith.constant 0 : index
    %c0_100 = arith.constant 0 : index
    %137 = vector.load %arg9[%c0_99, %c0_100] : memref<112x112xf32, #tpu.memory_space<vmem>>, vector<112x112xf32>
    %cst_101 = arith.constant dense<0.000000e+00> : vector<1x112xf32>
    %138 = tpu.matmul %136, %137, %cst_101 {dimension_numbers = #tpu.dot_dimension_numbers<[1], [0], [0], [1], [0, 0, 1, 1], [], []>} : vector<1x112xf32>, vector<112x112xf32>, vector<1x112xf32> -> vector<1x112xf32>
    %139 = arith.mulf %130, %130 : vector<14x112xf32>
    %cst_102 = arith.constant dense<0.000000e+00> : vector<112xf32>
    %140 = vector.multi_reduction <add>, %139, %cst_102 [0] : vector<14x112xf32> to vector<112xf32>
    %141 = vector.shape_cast %140 : vector<112xf32> to vector<1x112xf32>
    %cst_103 = arith.constant 1.400000e+01 : f32
    %142 = vector.broadcast %cst_103 : f32 to vector<1x112xf32>
    %143 = arith.divf %141, %142 : vector<1x112xf32>
    %c0_104 = arith.constant 0 : index
    %c0_105 = arith.constant 0 : index
    %144 = vector.load %arg9[%c0_104, %c0_105] : memref<112x112xf32, #tpu.memory_space<vmem>>, vector<112x112xf32>
    %cst_106 = arith.constant dense<0.000000e+00> : vector<1x112xf32>
    %145 = tpu.matmul %143, %144, %cst_106 {dimension_numbers = #tpu.dot_dimension_numbers<[1], [0], [0], [1], [0, 0, 1, 1], [], []>} : vector<1x112xf32>, vector<112x112xf32>, vector<1x112xf32> -> vector<1x112xf32>
    %146 = arith.mulf %138, %138 : vector<1x112xf32>
    %147 = arith.subf %145, %146 : vector<1x112xf32>
    %cst_107 = arith.constant 9.99999974E-6 : f32
    %148 = vector.broadcast %cst_107 : f32 to vector<1x112xf32>
    %149 = arith.addf %147, %148 : vector<1x112xf32>
    %150 = math.rsqrt %149 : vector<1x112xf32>
    %151 = arith.mulf %131, %150 : vector<1x112xf32>
    %152 = vector.broadcast %138 : vector<1x112xf32> to vector<14x112xf32>
    %153 = arith.subf %130, %152 : vector<14x112xf32>
    %154 = vector.broadcast %151 : vector<1x112xf32> to vector<14x112xf32>
    %155 = arith.mulf %153, %154 : vector<14x112xf32>
    %156 = vector.broadcast %132 : vector<1x112xf32> to vector<14x112xf32>
    %157 = arith.addf %155, %156 : vector<14x112xf32>
    %cst_108 = arith.constant 0.000000e+00 : f32
    %158 = vector.broadcast %cst_108 : f32 to vector<14x112xf32>
    %159 = arith.maximumf %157, %158 : vector<14x112xf32>
    %c0_109 = arith.constant 0 : index
    %c0_110 = arith.constant 0 : index
    %160 = vector.load %arg8[%c0_109, %c0_110] : memref<224x224xf32, #tpu.memory_space<vmem>>, vector<112x224xf32>
    %cst_111 = arith.constant dense<0.000000e+00> : vector<14x224xf32>
    %161 = tpu.matmul %159, %160, %cst_111 {dimension_numbers = #tpu.dot_dimension_numbers<[1], [0], [0], [1], [0, 0, 1, 1], [], []>} : vector<14x112xf32>, vector<112x224xf32>, vector<14x224xf32> -> vector<14x224xf32>
    %c112 = arith.constant 112 : index
    %c0_112 = arith.constant 0 : index
    %162 = vector.load %arg8[%c112, %c0_112] : memref<224x224xf32, #tpu.memory_space<vmem>>, vector<112x224xf32>
    %cst_113 = arith.constant dense<0.000000e+00> : vector<14x224xf32>
    %163 = tpu.matmul %119, %162, %cst_113 {dimension_numbers = #tpu.dot_dimension_numbers<[1], [0], [0], [1], [0, 0, 1, 1], [], []>} : vector<14x112xf32>, vector<112x224xf32>, vector<14x224xf32> -> vector<14x224xf32>
    %c8 = arith.constant 8 : index
    %c0_114 = arith.constant 0 : index
    %164 = vector.load %arg11[%c8, %c0_114] : memref<12x224xf32, #tpu.memory_space<vmem>>, vector<1x224xf32>
    %c9 = arith.constant 9 : index
    %c0_115 = arith.constant 0 : index
    %165 = vector.load %arg11[%c9, %c0_115] : memref<12x224xf32, #tpu.memory_space<vmem>>, vector<1x224xf32>
    %cst_116 = arith.constant dense<0.000000e+00> : vector<224xf32>
    %166 = vector.multi_reduction <add>, %161, %cst_116 [0] : vector<14x224xf32> to vector<224xf32>
    %167 = vector.shape_cast %166 : vector<224xf32> to vector<1x224xf32>
    %cst_117 = arith.constant 1.400000e+01 : f32
    %168 = vector.broadcast %cst_117 : f32 to vector<1x224xf32>
    %169 = arith.divf %167, %168 : vector<1x224xf32>
    %c0_118 = arith.constant 0 : index
    %c0_119 = arith.constant 0 : index
    %170 = vector.load %arg10[%c0_118, %c0_119] : memref<224x224xf32, #tpu.memory_space<vmem>>, vector<224x224xf32>
    %cst_120 = arith.constant dense<0.000000e+00> : vector<1x224xf32>
    %171 = tpu.matmul %169, %170, %cst_120 {dimension_numbers = #tpu.dot_dimension_numbers<[1], [0], [0], [1], [0, 0, 1, 1], [], []>} : vector<1x224xf32>, vector<224x224xf32>, vector<1x224xf32> -> vector<1x224xf32>
    %172 = arith.mulf %161, %161 : vector<14x224xf32>
    %cst_121 = arith.constant dense<0.000000e+00> : vector<224xf32>
    %173 = vector.multi_reduction <add>, %172, %cst_121 [0] : vector<14x224xf32> to vector<224xf32>
    %174 = vector.shape_cast %173 : vector<224xf32> to vector<1x224xf32>
    %cst_122 = arith.constant 1.400000e+01 : f32
    %175 = vector.broadcast %cst_122 : f32 to vector<1x224xf32>
    %176 = arith.divf %174, %175 : vector<1x224xf32>
    %c0_123 = arith.constant 0 : index
    %c0_124 = arith.constant 0 : index
    %177 = vector.load %arg10[%c0_123, %c0_124] : memref<224x224xf32, #tpu.memory_space<vmem>>, vector<224x224xf32>
    %cst_125 = arith.constant dense<0.000000e+00> : vector<1x224xf32>
    %178 = tpu.matmul %176, %177, %cst_125 {dimension_numbers = #tpu.dot_dimension_numbers<[1], [0], [0], [1], [0, 0, 1, 1], [], []>} : vector<1x224xf32>, vector<224x224xf32>, vector<1x224xf32> -> vector<1x224xf32>
    %179 = arith.mulf %171, %171 : vector<1x224xf32>
    %180 = arith.subf %178, %179 : vector<1x224xf32>
    %cst_126 = arith.constant 9.99999974E-6 : f32
    %181 = vector.broadcast %cst_126 : f32 to vector<1x224xf32>
    %182 = arith.addf %180, %181 : vector<1x224xf32>
    %183 = math.rsqrt %182 : vector<1x224xf32>
    %184 = arith.mulf %164, %183 : vector<1x224xf32>
    %185 = vector.broadcast %171 : vector<1x224xf32> to vector<14x224xf32>
    %186 = arith.subf %161, %185 : vector<14x224xf32>
    %187 = vector.broadcast %184 : vector<1x224xf32> to vector<14x224xf32>
    %188 = arith.mulf %186, %187 : vector<14x224xf32>
    %189 = vector.broadcast %165 : vector<1x224xf32> to vector<14x224xf32>
    %190 = arith.addf %188, %189 : vector<14x224xf32>
    %c10 = arith.constant 10 : index
    %c0_127 = arith.constant 0 : index
    %191 = vector.load %arg11[%c10, %c0_127] : memref<12x224xf32, #tpu.memory_space<vmem>>, vector<1x224xf32>
    %c11 = arith.constant 11 : index
    %c0_128 = arith.constant 0 : index
    %192 = vector.load %arg11[%c11, %c0_128] : memref<12x224xf32, #tpu.memory_space<vmem>>, vector<1x224xf32>
    %cst_129 = arith.constant dense<0.000000e+00> : vector<224xf32>
    %193 = vector.multi_reduction <add>, %163, %cst_129 [0] : vector<14x224xf32> to vector<224xf32>
    %194 = vector.shape_cast %193 : vector<224xf32> to vector<1x224xf32>
    %cst_130 = arith.constant 1.400000e+01 : f32
    %195 = vector.broadcast %cst_130 : f32 to vector<1x224xf32>
    %196 = arith.divf %194, %195 : vector<1x224xf32>
    %c0_131 = arith.constant 0 : index
    %c0_132 = arith.constant 0 : index
    %197 = vector.load %arg10[%c0_131, %c0_132] : memref<224x224xf32, #tpu.memory_space<vmem>>, vector<224x224xf32>
    %cst_133 = arith.constant dense<0.000000e+00> : vector<1x224xf32>
    %198 = tpu.matmul %196, %197, %cst_133 {dimension_numbers = #tpu.dot_dimension_numbers<[1], [0], [0], [1], [0, 0, 1, 1], [], []>} : vector<1x224xf32>, vector<224x224xf32>, vector<1x224xf32> -> vector<1x224xf32>
    %199 = arith.mulf %163, %163 : vector<14x224xf32>
    %cst_134 = arith.constant dense<0.000000e+00> : vector<224xf32>
    %200 = vector.multi_reduction <add>, %199, %cst_134 [0] : vector<14x224xf32> to vector<224xf32>
    %201 = vector.shape_cast %200 : vector<224xf32> to vector<1x224xf32>
    %cst_135 = arith.constant 1.400000e+01 : f32
    %202 = vector.broadcast %cst_135 : f32 to vector<1x224xf32>
    %203 = arith.divf %201, %202 : vector<1x224xf32>
    %c0_136 = arith.constant 0 : index
    %c0_137 = arith.constant 0 : index
    %204 = vector.load %arg10[%c0_136, %c0_137] : memref<224x224xf32, #tpu.memory_space<vmem>>, vector<224x224xf32>
    %cst_138 = arith.constant dense<0.000000e+00> : vector<1x224xf32>
    %205 = tpu.matmul %203, %204, %cst_138 {dimension_numbers = #tpu.dot_dimension_numbers<[1], [0], [0], [1], [0, 0, 1, 1], [], []>} : vector<1x224xf32>, vector<224x224xf32>, vector<1x224xf32> -> vector<1x224xf32>
    %206 = arith.mulf %198, %198 : vector<1x224xf32>
    %207 = arith.subf %205, %206 : vector<1x224xf32>
    %cst_139 = arith.constant 9.99999974E-6 : f32
    %208 = vector.broadcast %cst_139 : f32 to vector<1x224xf32>
    %209 = arith.addf %207, %208 : vector<1x224xf32>
    %210 = math.rsqrt %209 : vector<1x224xf32>
    %211 = arith.mulf %191, %210 : vector<1x224xf32>
    %212 = vector.broadcast %198 : vector<1x224xf32> to vector<14x224xf32>
    %213 = arith.subf %163, %212 : vector<14x224xf32>
    %214 = vector.broadcast %211 : vector<1x224xf32> to vector<14x224xf32>
    %215 = arith.mulf %213, %214 : vector<14x224xf32>
    %216 = vector.broadcast %192 : vector<1x224xf32> to vector<14x224xf32>
    %217 = arith.addf %215, %216 : vector<14x224xf32>
    %218 = arith.addf %190, %217 : vector<14x224xf32>
    %cst_140 = arith.constant 0.000000e+00 : f32
    %219 = vector.broadcast %cst_140 : f32 to vector<14x224xf32>
    %220 = arith.maximumf %218, %219 : vector<14x224xf32>
    %c0_141 = arith.constant 0 : index
    %c0_142 = arith.constant 0 : index
    %221 = vector.load %arg12[%c0_141, %c0_142] : memref<224x112xf32, #tpu.memory_space<vmem>>, vector<224x112xf32>
    %cst_143 = arith.constant dense<0.000000e+00> : vector<14x112xf32>
    %222 = tpu.matmul %220, %221, %cst_143 {dimension_numbers = #tpu.dot_dimension_numbers<[1], [0], [0], [1], [0, 0, 1, 1], [], []>} : vector<14x224xf32>, vector<224x112xf32>, vector<14x112xf32> -> vector<14x112xf32>
    %c0_144 = arith.constant 0 : index
    %c0_145 = arith.constant 0 : index
    %223 = vector.load %arg13[%c0_144, %c0_145] : memref<14x112xf32, #tpu.memory_space<vmem>>, vector<14x112xf32>
    %224 = arith.mulf %222, %223 : vector<14x112xf32>
    %c0_146 = arith.constant 0 : index
    %c0_147 = arith.constant 0 : index
    %225 = vector.load %arg14[%c0_146, %c0_147] : memref<112x128xf32, #tpu.memory_space<vmem>>, vector<112x128xf32>
    %cst_148 = arith.constant dense<0.000000e+00> : vector<14x128xf32>
    %226 = tpu.matmul %224, %225, %cst_148 {dimension_numbers = #tpu.dot_dimension_numbers<[1], [0], [0], [1], [0, 0, 1, 1], [], []>} : vector<14x112xf32>, vector<112x128xf32>, vector<14x128xf32> -> vector<14x128xf32>
    %c0_149 = arith.constant 0 : index
    %c0_150 = arith.constant 0 : index
    %227 = vector.load %arg15[%c0_149, %c0_150] : memref<2x14xf32, #tpu.memory_space<vmem>>, vector<2x14xf32>
    %cst_151 = arith.constant dense<0.000000e+00> : vector<2x128xf32>
    %228 = tpu.matmul %227, %226, %cst_151 {dimension_numbers = #tpu.dot_dimension_numbers<[1], [0], [0], [1], [0, 0, 1, 1], [], []>} : vector<2x14xf32>, vector<14x128xf32>, vector<2x128xf32> -> vector<2x128xf32>
    %c0_152 = arith.constant 0 : index
    %c0_153 = arith.constant 0 : index
    %229 = vector.load %arg16[%c0_152, %c0_153] : memref<1x128xf32, #tpu.memory_space<vmem>>, vector<1x128xf32>
    %230 = vector.broadcast %229 : vector<1x128xf32> to vector<2x128xf32>
    %231 = arith.addf %228, %230 : vector<2x128xf32>
    %c0_154 = arith.constant 0 : index
    %c0_155 = arith.constant 0 : index
    %232 = vector.load %arg17[%c0_154, %c0_155] : memref<2x128xf32, #tpu.memory_space<vmem>>, vector<2x128xf32>
    tpu.vector_store %arg17[%c0_154, %c0_155], %231 {strides = array<i32>} : memref<2x128xf32, #tpu.memory_space<vmem>>, vector<2x128xf32>,
    %cst_156 = arith.constant dense<0xFF800000> : vector<2xf32>
    %233 = vector.multi_reduction <maximumf>, %231, %cst_156 [1] : vector<2x128xf32> to vector<2xf32>
    %234 = vector.shape_cast %233 : vector<2xf32> to vector<2x1xf32>
    %235 = vector.broadcast %234 : vector<2x1xf32> to vector<2x128xf32>
    %236 = arith.subf %231, %235 : vector<2x128xf32>
    %237 = math.exp %236 : vector<2x128xf32>
    %cst_157 = arith.constant dense<0.000000e+00> : vector<2xf32>
    %238 = vector.multi_reduction <add>, %237, %cst_157 [1] : vector<2x128xf32> to vector<2xf32>
    %239 = vector.shape_cast %238 : vector<2xf32> to vector<2x1xf32>
    %240 = vector.broadcast %239 : vector<2x1xf32> to vector<2x128xf32>
    %241 = arith.divf %237, %240 : vector<2x128xf32>
    %c0_158 = arith.constant 0 : index
    %c0_159 = arith.constant 0 : index
    %242 = vector.load %arg18[%c0_158, %c0_159] : memref<2x128xf32, #tpu.memory_space<vmem>>, vector<2x128xf32>
    tpu.vector_store %arg18[%c0_158, %c0_159], %241 {strides = array<i32>} : memref<2x128xf32, #tpu.memory_space<vmem>>, vector<2x128xf32>,
    return
  }
}

</mosaic_0001>

<bundles_post_ra>
// kernel: convnet_forward.1
= control target key start
LH: loop header
LB: loop body
LE: loop exit
PB: predicated region body
PF: predicated region fallthrough
CT: control target
= control target key end

     0   :  { %s6677_s0 = inlined_call_operand.hbm [shape: f32[56,28], index: 0, kind: input, shape index: {}]   ;;  %s6678_s1 = inlined_call_operand.hbm [shape: f32[3,28,56], index: 1, kind: input, shape index: {}]   ;;  %s6679_s2 = inlined_call_operand.hbm [shape: f32[3,28,56], index: 2, kind: input, shape index: {}]   ;;  %s6680_s3 = inlined_call_operand.hbm [shape: f32[84,112], index: 3, kind: input, shape index: {}]   ;;  %s6681_s4 = inlined_call_operand.hbm [shape: f32[56,56], index: 4, kind: input, shape index: {}]   ;;  %s6682_s5 = inlined_call_operand.hbm [shape: f32[112,112], index: 5, kind: input, shape index: {}]   ;;  %s6683_s6 = inlined_call_operand.hbm [shape: f32[3,14,28], index: 6, kind: input, shape index: {}]   ;;  %s6684_s7 = inlined_call_operand.hbm [shape: f32[3,112,112], index: 7, kind: input, shape index: {}]   ;;  %s6685_s8 = inlined_call_operand.hbm [shape: f32[224,224], index: 8, kind: input, shape index: {}]   ;;  %s6686_s9 = inlined_call_operand.hbm [shape: f32[112,112], index: 9, kind: input, shape index: {}]   ;;  %s6687_s10 = inlined_call_operand.hbm [shape: f32[224,224], index: 10, kind: input, shape index: {}]   ;;  %s6688_s11 = inlined_call_operand.hbm [shape: f32[12,224], index: 11, kind: input, shape index: {}]   ;;  %s6689_s12 = inlined_call_operand.hbm [shape: f32[224,112], index: 12, kind: input, shape index: {}]   ;;  %s6690_s13 = inlined_call_operand.vmem [shape: f32[14,112], index: 13, kind: input, shape index: {}]   ;;  %s6691_s14 = inlined_call_operand.hbm [shape: f32[112,128], index: 14, kind: input, shape index: {}]   ;;  %s6692_s15 = inlined_call_operand.vmem [shape: f32[2,14], index: 15, kind: input, shape index: {}]   ;;  %s6693_s16 = inlined_call_operand.vmem [shape: f32[1,128], index: 16, kind: input, shape index: {}]   ;;  %s6694_s17 = inlined_call_operand.hbm [shape: f32[2,128], index: 17, kind: output, shape index: {0}]   ;;  %s6695_s18 = inlined_call_operand.hbm [shape: f32[2,128], index: 18, kind: output, shape index: {1}]  }
   0x1   :  { %6709 = sst [smem:[#allocation43_spill]] %s6677_s0 }
   0x2   :  { %6710 = sst [smem:[#allocation44_spill]] %s6678_s1 }
   0x3   :  { %6711 = sst [smem:[#allocation45_spill]] %s6679_s2 }
   0x4   :  { %6712 = sst [smem:[#allocation46_spill]] %s6695_s18 }
   0x5   :  { %24 = vsyncpa [#allocation3], 0 }
   0x6   :  { %25 = vsyncpa [#allocation6], 0 }
   0x7   :  { %26 = vsyncpa [#allocation9], 0 }
   0x8   :  { %27 = vsyncpa [#allocation12], 0 }
   0x9   :  { %28 = vsyncpa [#allocation15], 0 }
   0xa   :  { %29 = vsyncpa [#allocation18], 0 }
   0xb   :  { %30 = vsyncpa [#allocation21], 0 }
   0xc   :  { %31 = vsyncpa [#allocation24], 0 }
   0xd   :  { %32 = vsyncpa [#allocation4], 0 }
   0xe   :  { %33 = vsyncpa [#allocation27], 0  ;;  %s5623_s27 = smov [#allocation5]   ;;  %s5624_s29 = smov [#allocation8]  }
   0xf   :  { %s51_s28 = sshll.u32 %s5623_s27, 4  ;;  %s75_s30 = sshll.u32 %s5624_s29, 4  ;;  %s52_s28 = int_to_ptr.vmem [resolvable:$true] %s51_s28  ;;  %s5743_s30 = int_to_ptr.vmem [resolvable:$true] %s75_s30 }
  0x10   :  { %s6713_s1 = sld [smem:[#allocation44_spill]] }
  0x16   :  { %s5251_s20 = scalar_lea.hbm %s6713_s1, 1536 }
  0x17   :  { %p5252_p0 = scmp.ne.s32.totalorder %s6713_s1, %s5251_s20  ;;  %p5255_p1 = scmp.lt.u32.totalorder %s5251_s20, %s6713_s1 }
  0x19   :  { %p5257_p2 = pnand %p5255_p1, %p5252_p0 }
  0x1b   :  { %5260 = shalt.err (!%p5257_p2)
}
  0x1c   :  { %s5261_s24 = scalar_lea.vmem %s52_s28, 1536  ;;  %p5266_p4 = scmp.lt.s32.totalorder %s52_s28, %s52_s28 }
  0x1d   :  { %p5262_p3 = scmp.ne.s32.totalorder %s52_s28, %s5261_s24  ;;  %p5267_p5 = scmp.lt.s32.totalorder %s5261_s24, %s5261_s24 }
  0x1f   :  { %p5268_p6 = por %p5267_p5, %p5266_p4 }
  0x21   :  { %p5269_p7 = pnand %p5268_p6, %p5262_p3 }
  0x23   :  { %5272 = shalt.err (!%p5269_p7)
}
  0x24   :  { %s5625_s25 = smov 128   ;;  %s5626_s26 = smov 8  }
  0x25   :  { %57 = dma.hbm_to_vmem [thread:$0]  %s6713_s1, 1536, %s52_s28, [#allocation6], %s5625_s25, %s5625_s25, %s5626_s26  }
  0x26   :  { %s5273_s20 = scalar_lea.hbm %s6680_s3, 1408 }
  0x27   :  { %p5274_p8 = scmp.ne.s32.totalorder %s6680_s3, %s5273_s20  ;;  %p5277_p9 = scmp.lt.u32.totalorder %s5273_s20, %s6680_s3 }
  0x29   :  { %p5279_p10 = pnand %p5277_p9, %p5274_p8 }
  0x2b   :  { %5282 = shalt.err (!%p5279_p10)
}
  0x2c   :  { %s5283_s24 = scalar_lea.vmem %s5743_s30, 1408  ;;  %p5288_p12 = scmp.lt.s32.totalorder %s5743_s30, %s5743_s30 }
  0x2d   :  { %p5284_p11 = scmp.ne.s32.totalorder %s5743_s30, %s5283_s24  ;;  %p5289_p13 = scmp.lt.s32.totalorder %s5283_s24, %s5283_s24 }
  0x2f   :  { %p5290_p0 = por %p5289_p13, %p5288_p12 }
  0x31   :  { %p5291_p1 = pnand %p5290_p0, %p5284_p11 }
  0x33   :  { %5294 = shalt.err (!%p5291_p1)
}
  0x34   :  { %81 = dma.hbm_to_vmem [thread:$0]  %s6680_s3, 1408, %s5743_s30, [#allocation9], %s5625_s25, %s5625_s25, %s5626_s26  }
  0x35   :  { %s5627_s27 = smov [#allocation11]   ;;  %s5628_s0 = smov [#allocation14]  }
  0x36   :  { %s99_s29 = sshll.u32 %s5627_s27, 4  ;;  %s123_s19 = sshll.u32 %s5628_s0, 4  ;;  %s100_s29 = int_to_ptr.vmem [resolvable:$true] %s99_s29  ;;  %s5780_s19 = int_to_ptr.vmem [resolvable:$true] %s123_s19 }
  0x37   :  { %s5295_s22 = scalar_lea.hbm %s6682_s5, 1792 }
  0x38   :  { %p5296_p2 = scmp.ne.s32.totalorder %s6682_s5, %s5295_s22  ;;  %p5299_p3 = scmp.lt.u32.totalorder %s5295_s22, %s6682_s5 }
  0x3a   :  { %p5301_p4 = pnand %p5299_p3, %p5296_p2 }
  0x3c   :  { %5304 = shalt.err (!%p5301_p4)
}
  0x3d   :  { %s5305_s3 = scalar_lea.vmem %s100_s29, 1792  ;;  %p5310_p6 = scmp.lt.s32.totalorder %s100_s29, %s100_s29 }
  0x3e   :  { %p5306_p5 = scmp.ne.s32.totalorder %s100_s29, %s5305_s3  ;;  %p5311_p7 = scmp.lt.s32.totalorder %s5305_s3, %s5305_s3 }
  0x40   :  { %p5312_p8 = por %p5311_p7, %p5310_p6 }
  0x42   :  { %p5313_p9 = pnand %p5312_p8, %p5306_p5 }
  0x44   :  { %5316 = shalt.err (!%p5313_p9)
}
  0x45   :  { %105 = dma.hbm_to_vmem [thread:$0]  %s6682_s5, 1792, %s100_s29, [#allocation12], %s5625_s25, %s5625_s25, %s5626_s26  }
  0x46   :  { %s5317_s18 = scalar_lea.hbm %s6684_s7, 5376 }
  0x47   :  { %p5318_p10 = scmp.ne.s32.totalorder %s6684_s7, %s5317_s18  ;;  %p5321_p11 = scmp.lt.u32.totalorder %s5317_s18, %s6684_s7 }
  0x49   :  { %p5323_p12 = pnand %p5321_p11, %p5318_p10 }
  0x4b   :  { %5326 = shalt.err (!%p5323_p12)
}
  0x4c   :  { %s5327_s2 = scalar_lea.vmem %s5780_s19, 5376  ;;  %p5332_p0 = scmp.lt.s32.totalorder %s5780_s19, %s5780_s19 }
  0x4d   :  { %p5328_p13 = scmp.ne.s32.totalorder %s5780_s19, %s5327_s2  ;;  %p5333_p1 = scmp.lt.s32.totalorder %s5327_s2, %s5327_s2 }
  0x4f   :  { %p5334_p2 = por %p5333_p1, %p5332_p0 }
  0x51   :  { %p5335_p3 = pnand %p5334_p2, %p5328_p13 }
  0x53   :  { %5338 = shalt.err (!%p5335_p3)
}
  0x54   :  { %129 = dma.hbm_to_vmem [thread:$0]  %s6684_s7, 5376, %s5780_s19, [#allocation15], %s5625_s25, %s5625_s25, %s5626_s26  }
  0x55   :  { %s5629_s23 = smov [#allocation17]   ;;  %s5339_s28 = scalar_lea.hbm %s6686_s9, 1792 }
  0x56   :  { %s147_s24 = sshll.u32 %s5629_s23, 4  ;;  %p5340_p4 = scmp.ne.s32.totalorder %s6686_s9, %s5339_s28  ;;  %s148_s24 = int_to_ptr.vmem [resolvable:$true] %s147_s24 }
  0x57   :  { %p5343_p5 = scmp.lt.u32.totalorder %s5339_s28, %s6686_s9 }
  0x59   :  { %p5345_p6 = pnand %p5343_p5, %p5340_p4 }
  0x5b   :  { %5348 = shalt.err (!%p5345_p6)
}
  0x5c   :  { %s5349_s20 = scalar_lea.vmem %s148_s24, 1792  ;;  %p5354_p8 = scmp.lt.s32.totalorder %s148_s24, %s148_s24 }
  0x5d   :  { %p5350_p7 = scmp.ne.s32.totalorder %s148_s24, %s5349_s20  ;;  %p5355_p9 = scmp.lt.s32.totalorder %s5349_s20, %s5349_s20 }
  0x5f   :  { %p5356_p10 = por %p5355_p9, %p5354_p8 }
  0x61   :  { %p5357_p11 = pnand %p5356_p10, %p5350_p7 }
  0x63   :  { %5360 = shalt.err (!%p5357_p11)
}
  0x64   :  { %153 = dma.hbm_to_vmem [thread:$0]  %s6686_s9, 1792, %s148_s24, [#allocation18], %s5625_s25, %s5625_s25, %s5626_s26  }
  0x65   :  { %s5630_s21 = smov [#allocation20]   ;;  %s5631_s2 = smov [#allocation2]  }
  0x66   :  { %s171_s22 = sshll.u32 %s5630_s21, 4  ;;  %s39_s5 = sshll.u32 %s5631_s2, 4  ;;  %s172_s22 = int_to_ptr.vmem [resolvable:$true] %s171_s22  ;;  %s40_s5 = int_to_ptr.vmem [resolvable:$true] %s39_s5 }
  0x67   :  { %s5361_s3 = scalar_lea.hbm %s6688_s11, 512 }
  0x68   :  { %p5362_p12 = scmp.ne.s32.totalorder %s6688_s11, %s5361_s3  ;;  %p5365_p13 = scmp.lt.u32.totalorder %s5361_s3, %s6688_s11 }
  0x6a   :  { %p5367_p0 = pnand %p5365_p13, %p5362_p12 }
  0x6c   :  { %5370 = shalt.err (!%p5367_p0)
}
  0x6d   :  { %s5371_s9 = scalar_lea.vmem %s172_s22, 512  ;;  %p5376_p2 = scmp.lt.s32.totalorder %s172_s22, %s172_s22 }
  0x6e   :  { %p5372_p1 = scmp.ne.s32.totalorder %s172_s22, %s5371_s9  ;;  %p5377_p3 = scmp.lt.s32.totalorder %s5371_s9, %s5371_s9 }
  0x70   :  { %p5378_p4 = por %p5377_p3, %p5376_p2 }
  0x72   :  { %p5379_p5 = pnand %p5378_p4, %p5372_p1 }
  0x74   :  { %5382 = shalt.err (!%p5379_p5)
}
  0x75   :  { %s5632_s24 = smov 256   ;;  %s5633_s18 = smov 16  }
  0x76   :  { %177 = dma.hbm_to_vmem [thread:$0]  %s6688_s11, 512, %s172_s22, [#allocation21], %s5632_s24, %s5632_s24, %s5633_s18  }
  0x77   :  { %s6714_s21 = sld [smem:[#allocation43_spill]] }
  0x7d   :  { %s5383_s2 = scalar_lea.hbm %s6714_s21, 896 }
  0x7e   :  { %p5384_p6 = scmp.ne.s32.totalorder %s6714_s21, %s5383_s2  ;;  %p5387_p7 = scmp.lt.u32.totalorder %s5383_s2, %s6714_s21 }
  0x80   :  { %p5389_p8 = pnand %p5387_p7, %p5384_p6 }
  0x82   :  { %5392 = shalt.err (!%p5389_p8)
}
  0x83   :  { %s5393_s28 = scalar_lea.vmem %s40_s5, 896  ;;  %p5398_p10 = scmp.lt.s32.totalorder %s40_s5, %s40_s5 }
  0x84   :  { %p5394_p9 = scmp.ne.s32.totalorder %s40_s5, %s5393_s28  ;;  %p5399_p11 = scmp.lt.s32.totalorder %s5393_s28, %s5393_s28 }
  0x86   :  { %p5400_p12 = por %p5399_p11, %p5398_p10 }
  0x88   :  { %p5401_p13 = pnand %p5400_p12, %p5394_p9 }
  0x8a   :  { %5404 = shalt.err (!%p5401_p13)
}
  0x8b   :  { %45 = dma.hbm_to_vmem [thread:$0]  %s6714_s21, 896, %s40_s5, [#allocation3], %s5625_s25, %s5625_s25, %s5626_s26  }
  0x8c   :  { %s5634_s1 = smov [#allocation7]   ;;  %s5635_s9 = smov [#allocation10]  }
  0x8d   :  { %s63_s27 = sshll.u32 %s5634_s1, 4  ;;  %s87_s0 = sshll.u32 %s5635_s9, 4  ;;  %s64_s27 = int_to_ptr.vmem [resolvable:$true] %s63_s27  ;;  %s88_s0 = int_to_ptr.vmem [resolvable:$true] %s87_s0 }
  0x8e   :  { %s6715_s19 = sld [smem:[#allocation45_spill]] }
  0x94   :  { %s5405_s2 = scalar_lea.hbm %s6715_s19, 1536 }
  0x95   :  { %p5406_p0 = scmp.ne.s32.totalorder %s6715_s19, %s5405_s2  ;;  %p5409_p1 = scmp.lt.u32.totalorder %s5405_s2, %s6715_s19 }
  0x97   :  { %p5411_p2 = pnand %p5409_p1, %p5406_p0 }
  0x99   :  { %5414 = shalt.err (!%p5411_p2)
}
  0x9a   :  { %s5415_s5 = scalar_lea.vmem %s64_s27, 1536  ;;  %p5420_p4 = scmp.lt.s32.totalorder %s64_s27, %s64_s27 }
  0x9b   :  { %p5416_p3 = scmp.ne.s32.totalorder %s64_s27, %s5415_s5  ;;  %p5421_p5 = scmp.lt.s32.totalorder %s5415_s5, %s5415_s5 }
  0x9d   :  { %p5422_p6 = por %p5421_p5, %p5420_p4 }
  0x9f   :  { %p5423_p7 = pnand %p5422_p6, %p5416_p3 }
  0xa1   :  { %5426 = shalt.err (!%p5423_p7)
}
  0xa2   :  { %69 = dma.hbm_to_vmem [thread:$0]  %s6715_s19, 1536, %s64_s27, [#allocation6], %s5625_s25, %s5625_s25, %s5626_s26  }
  0xa3   :  { %s5427_s1 = scalar_lea.hbm %s6681_s4, 896 }
  0xa4   :  { %p5428_p8 = scmp.ne.s32.totalorder %s6681_s4, %s5427_s1  ;;  %p5431_p9 = scmp.lt.u32.totalorder %s5427_s1, %s6681_s4 }
  0xa6   :  { %p5433_p10 = pnand %p5431_p9, %p5428_p8 }
  0xa8   :  { %5436 = shalt.err (!%p5433_p10)
}
  0xa9   :  { %s5437_s29 = scalar_lea.vmem %s88_s0, 896  ;;  %p5442_p12 = scmp.lt.s32.totalorder %s88_s0, %s88_s0 }
  0xaa   :  { %p5438_p11 = scmp.ne.s32.totalorder %s88_s0, %s5437_s29  ;;  %p5443_p13 = scmp.lt.s32.totalorder %s5437_s29, %s5437_s29 }
  0xac   :  { %p5444_p0 = por %p5443_p13, %p5442_p12 }
  0xae   :  { %p5445_p1 = pnand %p5444_p0, %p5438_p11 }
  0xb0   :  { %5448 = shalt.err (!%p5445_p1)
}
  0xb1   :  { %93 = dma.hbm_to_vmem [thread:$0]  %s6681_s4, 896, %s88_s0, [#allocation9], %s5625_s25, %s5625_s25, %s5626_s26  }
  0xb2   :  { %s5636_s23 = smov [#allocation13]   ;;  %s5637_s30 = smov [#allocation16]  }
  0xb3   :  { %s111_s3 = sshll.u32 %s5636_s23, 4  ;;  %s135_s5 = sshll.u32 %s5637_s30, 4  ;;  %s112_s3 = int_to_ptr.vmem [resolvable:$true] %s111_s3  ;;  %s136_s5 = int_to_ptr.vmem [resolvable:$true] %s135_s5 }
  0xb4   :  { %s5449_s11 = scalar_lea.hbm %s6683_s6, 768 }
  0xb5   :  { %p5450_p2 = scmp.ne.s32.totalorder %s6683_s6, %s5449_s11  ;;  %p5453_p3 = scmp.lt.u32.totalorder %s5449_s11, %s6683_s6 }
  0xb7   :  { %p5455_p4 = pnand %p5453_p3, %p5450_p2 }
  0xb9   :  { %5458 = shalt.err (!%p5455_p4)
}
  0xba   :  { %s5459_s4 = scalar_lea.vmem %s112_s3, 768  ;;  %p5464_p6 = scmp.lt.s32.totalorder %s112_s3, %s112_s3 }
  0xbb   :  { %p5460_p5 = scmp.ne.s32.totalorder %s112_s3, %s5459_s4  ;;  %p5465_p7 = scmp.lt.s32.totalorder %s5459_s4, %s5459_s4 }
  0xbd   :  { %p5466_p8 = por %p5465_p7, %p5464_p6 }
  0xbf   :  { %p5467_p9 = pnand %p5466_p8, %p5460_p5 }
  0xc1   :  { %5470 = shalt.err (!%p5467_p9)
}
  0xc2   :  { %117 = dma.hbm_to_vmem [thread:$0]  %s6683_s6, 768, %s112_s3, [#allocation12], %s5625_s25, %s5625_s25, %s5626_s26  }
  0xc3   :  { %s5471_s27 = scalar_lea.hbm %s6685_s8, 7168 }
  0xc4   :  { %p5472_p10 = scmp.ne.s32.totalorder %s6685_s8, %s5471_s27  ;;  %p5475_p11 = scmp.lt.u32.totalorder %s5471_s27, %s6685_s8 }
  0xc6   :  { %p5477_p12 = pnand %p5475_p11, %p5472_p10 }
  0xc8   :  { %5480 = shalt.err (!%p5477_p12)
}
  0xc9   :  { %s5481_s28 = scalar_lea.vmem %s136_s5, 7168  ;;  %p5486_p0 = scmp.lt.s32.totalorder %s136_s5, %s136_s5 }
  0xca   :  { %p5482_p13 = scmp.ne.s32.totalorder %s136_s5, %s5481_s28  ;;  %p5487_p1 = scmp.lt.s32.totalorder %s5481_s28, %s5481_s28 }
  0xcc   :  { %p5488_p2 = por %p5487_p1, %p5486_p0 }
  0xce   :  { %p5489_p3 = pnand %p5488_p2, %p5482_p13 }
  0xd0   :  { %5492 = shalt.err (!%p5489_p3)
}
  0xd1   :  { %141 = dma.hbm_to_vmem [thread:$0]  %s6685_s8, 7168, %s136_s5, [#allocation15], %s5632_s24, %s5632_s24, %s5633_s18  }
  0xd2   :  { %s5638_s11 = smov [#allocation19]   ;;  %s5639_s1 = smov [#allocation22]  }
  0xd3   :  { %s159_s22 = sshll.u32 %s5638_s11, 4  ;;  %s183_s9 = sshll.u32 %s5639_s1, 4  ;;  %s160_s22 = int_to_ptr.vmem [resolvable:$true] %s159_s22  ;;  %s184_s9 = int_to_ptr.vmem [resolvable:$true] %s183_s9 }
  0xd4   :  { %s5493_s0 = scalar_lea.hbm %s6687_s10, 7168 }
  0xd5   :  { %p5494_p4 = scmp.ne.s32.totalorder %s6687_s10, %s5493_s0  ;;  %p5497_p5 = scmp.lt.u32.totalorder %s5493_s0, %s6687_s10 }
  0xd7   :  { %p5499_p6 = pnand %p5497_p5, %p5494_p4 }
  0xd9   :  { %5502 = shalt.err (!%p5499_p6)
}
  0xda   :  { %s5503_s8 = scalar_lea.vmem %s160_s22, 7168  ;;  %p5508_p8 = scmp.lt.s32.totalorder %s160_s22, %s160_s22 }
  0xdb   :  { %p5504_p7 = scmp.ne.s32.totalorder %s160_s22, %s5503_s8  ;;  %p5509_p9 = scmp.lt.s32.totalorder %s5503_s8, %s5503_s8 }
  0xdd   :  { %p5510_p10 = por %p5509_p9, %p5508_p8 }
  0xdf   :  { %p5511_p11 = pnand %p5510_p10, %p5504_p7 }
  0xe1   :  { %5514 = shalt.err (!%p5511_p11)
}
  0xe2   :  { %165 = dma.hbm_to_vmem [thread:$0]  %s6687_s10, 7168, %s160_s22, [#allocation18], %s5632_s24, %s5632_s24, %s5633_s18  }
  0xe3   :  { %s5515_s21 = scalar_lea.hbm %s6689_s12, 3584 }
  0xe4   :  { %p5516_p12 = scmp.ne.s32.totalorder %s6689_s12, %s5515_s21  ;;  %p5519_p13 = scmp.lt.u32.totalorder %s5515_s21, %s6689_s12 }
  0xe6   :  { %p5521_p0 = pnand %p5519_p13, %p5516_p12 }
  0xe8   :  { %5524 = shalt.err (!%p5521_p0)
}
  0xe9   :  { %s5525_s1 = scalar_lea.vmem %s184_s9, 3584  ;;  %p5530_p2 = scmp.lt.s32.totalorder %s184_s9, %s184_s9 }
  0xea   :  { %p5526_p1 = scmp.ne.s32.totalorder %s184_s9, %s5525_s1  ;;  %p5531_p3 = scmp.lt.s32.totalorder %s5525_s1, %s5525_s1 }
  0xec   :  { %p5532_p4 = por %p5531_p3, %p5530_p2 }
  0xee   :  { %p5533_p5 = pnand %p5532_p4, %p5526_p1 }
  0xf0   :  { %5536 = shalt.err (!%p5533_p5)
}
  0xf1   :  { %189 = dma.hbm_to_vmem [thread:$0]  %s6689_s12, 3584, %s184_s9, [#allocation21], %s5625_s25, %s5625_s25, %s5626_s26  }
  0xf2   :  { %s5640_s18 = smov [#allocation23]   ;;  %s5537_s0 = scalar_lea.hbm %s6691_s14, 1792 }
  0xf3   :  { %s197_s22 = sshll.u32 %s5640_s18, 4  ;;  %p5538_p6 = scmp.ne.s32.totalorder %s6691_s14, %s5537_s0  ;;  %s198_s22 = int_to_ptr.vmem [resolvable:$true] %s197_s22 }
  0xf4   :  { %p5541_p7 = scmp.lt.u32.totalorder %s5537_s0, %s6691_s14 }
  0xf6   :  { %p5543_p8 = pnand %p5541_p7, %p5538_p6 }
  0xf8   :  { %5546 = shalt.err (!%p5543_p8)
}
  0xf9   :  { %s5547_s8 = scalar_lea.vmem %s198_s22, 1792  ;;  %p5552_p10 = scmp.lt.s32.totalorder %s198_s22, %s198_s22 }
  0xfa   :  { %p5548_p9 = scmp.ne.s32.totalorder %s198_s22, %s5547_s8  ;;  %p5553_p11 = scmp.lt.s32.totalorder %s5547_s8, %s5547_s8 }
  0xfc   :  { %p5554_p12 = por %p5553_p11, %p5552_p10 }
  0xfe   :  { %p5555_p13 = pnand %p5554_p12, %p5548_p9 }
 0x100   :  { %5558 = shalt.err (!%p5555_p13)
}
 0x101   :  { %203 = dma.hbm_to_vmem [thread:$0]  %s6691_s14, 1792, %s198_s22, [#allocation24], %s5625_s25, %s5625_s25, %s5626_s26  }
 0x102   :  { %5603 = dma.done.wait [#allocation3], 896  }
 0x103   :  { %5604 = vsyncadd [#allocation3], 4294966400 }
 0x104   :  { %5605 = dma.done.wait [#allocation6], 3072  }
 0x105   :  { %5606 = vsyncadd [#allocation6], 4294964224 }
 0x106   :  { %5607 = dma.done.wait [#allocation9], 2304  }
 0x107   :  { %5608 = vsyncadd [#allocation9], 4294964992 }
 0x108   :  { %5609 = dma.done.wait [#allocation12], 2560  }
 0x109   :  { %5610 = vsyncadd [#allocation12], 4294964736 }
 0x10a   :  { %5611 = dma.done.wait [#allocation15], 12544  }
 0x10b   :  { %5612 = vsyncadd [#allocation15], 4294954752 }
 0x10c   :  { %5613 = dma.done.wait [#allocation18], 8960  }
 0x10d   :  { %5614 = vsyncadd [#allocation18], 4294958336 }
 0x10e   :  { %5615 = dma.done.wait [#allocation21], 4096  }
 0x10f   :  { %5616 = vsyncadd [#allocation21], 4294963200 }
 0x110   :  { %5617 = dma.done.wait [#allocation24], 1792  }
 0x111   :  { %5618 = vsyncadd [#allocation24], 4294965504  ;;  %v250_v0 = vld [vmem:[#allocation2] sm:$0xff]  ;;  %v251_v1 = vld [vmem:[#allocation2 + $0x8] sm:$0xff]  ;;  %vm261_vm0 = vcmask 457728   ;;  %vm483_vm1 = vcmask 1043456  }
 0x112   :  { %v252_v2 = vld [vmem:[#allocation2 + $0x10] sm:$0xff]  ;;  %v5967_v3 = vpack.c.bf16 %v251_v1, %v250_v0  ;;  %v253_v4 = vld [vmem:[#allocation2 + $0x18] sm:$0xff]  ;;  %v254_v6 = vld [vmem:[#allocation2 + $0x20] sm:$0xff]  ;;  %vm5641_vm2 = vmmov 1   ;;  %vm470_vm4 = vcmask 228352   ;;  %v6701_v60 = vmov 0.0|0.0  }
 0x113   :  { %v5969_v5 = vpack.c.bf16 %v253_v4, %v252_v2  ;;  %v255_v7 = vld [vmem:[#allocation2 + $0x28] sm:$0xff]  ;;  %v364_v8 = vld [vmem:[#allocation5 + $0x20] sm:$0xff]  ;;  %v256_v10 = vld [vmem:[#allocation2 + $0x30] sm:$0xff]  ;;  %vm5644_vm5 = vmmov 0   ;;  %vm890_vm6 = vcmask 453632   ;;  %vm1299_vm7 = vcmask 916480  }
 0x114   :  { %4507 = vmatprep.subr.bf16.mxu1 %v5967_v3  ;;  %4008 = vmatprep.mubr.msk.f32.mxu1 %vm261_vm0, %v364_v8  ;;  %v4502_v9 = vpack.c.bf16 %v255_v7, %v254_v6  ;;  %v466_v11 = vld [vmem:[#allocation7 + $0x20] sm:$0xff]  ;;  %v467_v12 = vld [vmem:[#allocation7 + $0x28] sm:$0xff]  ;;  %v468_v13 = vld [vmem:[#allocation7 + $0x30] sm:$0xff]  ;;  %vm1305_vm8 = vcmask 912384   ;;  %vm2277_vm9 = vcmask 914432   ;;  %vm2701_vm10 = vcmask 1045504  }
 0x115   :  { %4509 = vmatpush3.bf16.msra.mxu1 %v5967_v3  ;;  %4495 = vmatprep.subr.bf16.mxu0 %v5967_v3  ;;  %v469_v14 = vld [vmem:[#allocation7 + $0x38] sm:$0xf]  ;;  %v4518_v15 = vpack.c.bf16 %v467_v12, %v466_v11  ;;  %v365_v16 = vld [vmem:[#allocation5 + $0x28] sm:$0xff]  ;;  %v366_v17 = vld [vmem:[#allocation5 + $0x30] sm:$0xff]  ;;  %vm2710_vm11 = vcmask 785408   ;;  %vm2712_vm12 = vcmask 783360  }
 0x116   :  { %4511 = vmatprep.subr.bf16.mxu1 %v5969_v5  ;;  %4497 = vmatpush3.bf16.msra.mxu0 %v5967_v3  ;;  %v4522_v18 = vpack.c.bf16 %v469_v14, %v468_v13  ;;  %vm5981_vm3 = vmpackc.low %vm483_vm1, %vm5641_vm2  ;;  %v367_v20 = vld [vmem:[#allocation5 + $0x38] sm:$0xf]  ;;  %v257_v21 = vld [vmem:[#allocation5] sm:$0xff]  ;;  %vm3506_vm14 = vcmask 113664   ;;  %vm3584_vm15 = vcmask 1041408  }
 0x117   :  { %4499 = vmatprep.subr.bf16.mxu0 %v5969_v5  ;;  %v258_v22 = vld [vmem:[#allocation5 + $0x8] sm:$0xff]  ;;  %3988 = vmatprep.mubr.msk.f32.mxu0 %vm261_vm0, %v257_v21  ;;  %v259_v23 = vld [vmem:[#allocation5 + $0x10] sm:$0xff]  ;;  %v260_v24 = vld [vmem:[#allocation5 + $0x18] sm:$0xf] }
 0x118   :  { %v359_v25 = vld [vmem:[#allocation7] sm:$0xff]  ;;  %v360_v26 = vld [vmem:[#allocation7 + $0x8] sm:$0xff]  ;;  %v675_v34 = vld [vmem:[#allocation5 + $0x50] sm:$0xff] }
 0x119   :  { %4513 = vmatpush3.bf16.msra.mxu1 %v5969_v5  ;;  %v4528_v27 = vpack.c.bf16 %v360_v26, %v359_v25  ;;  %v673_v32 = vld [vmem:[#allocation5 + $0x40] sm:$0xff]  ;;  %v674_v33 = vld [vmem:[#allocation5 + $0x48] sm:$0xff]  ;;  %v676_v35 = vld [vmem:[#allocation5 + $0x58] sm:$0xf] }
 0x11a   :  { %4515 = vmatprep.subr.bf16.mxu1 %v4502_v9  ;;  %4501 = vmatpush3.bf16.msra.mxu0 %v5969_v5  ;;  %v361_v36 = vld [vmem:[#allocation7 + $0x10] sm:$0xff]  ;;  %v362_v37 = vld [vmem:[#allocation7 + $0x18] sm:$0xf]  ;;  %v775_v41 = vld [vmem:[#allocation7 + $0x40] sm:$0xff] }
 0x11b   :  { %4503 = vmatprep.subr.bf16.mxu0 %v4502_v9  ;;  %v4532_v38 = vpack.c.bf16 %v362_v37, %v361_v36  ;;  %v776_v42 = vld [vmem:[#allocation7 + $0x48] sm:$0xff]  ;;  %v777_v43 = vld [vmem:[#allocation7 + $0x50] sm:$0xff]  ;;  %v778_v45 = vld [vmem:[#allocation7 + $0x58] sm:$0xf] }
 0x11c   :  { %v4550_v44 = vpack.c.bf16 %v776_v42, %v775_v41  ;;  %v4554_v47 = vpack.c.bf16 %v778_v45, %v777_v43  ;;  %v901_v57 = vld [vmem:[#allocation10] sm:$0xff]  ;;  %v902_v58 = vld [vmem:[#allocation10 + $0x8] sm:$0xff]  ;;  %v903_v61 = vld [vmem:[#allocation10 + $0x10] sm:$0xff] }
 0x11d   :  { %4517 = vmatpush3.bf16.msra.mxu1 %v4502_v9  ;;  %v4561_v59 = vpack.c.bf16 %v902_v58, %v901_v57  ;;  %v904_v62 = vld [vmem:[#allocation10 + $0x18] sm:$0xff]  ;;  %v905_v0 = vld [vmem:[#allocation10 + $0x20] sm:$0xff]  ;;  %v906_v1 = vld [vmem:[#allocation10 + $0x28] sm:$0xff] }
 0x11e   :  { %4006 = vmatprep.subr.mxu1 %v256_v10  ;;  %4505 = vmatpush3.bf16.msra.mxu0 %v4502_v9  ;;  %v4564_v63 = vpack.c.bf16 %v904_v62, %v903_v61  ;;  %v4567_v2 = vpack.c.bf16 %v906_v1, %v905_v0  ;;  %v907_v4 = vld [vmem:[#allocation10 + $0x30] sm:$0xff]  ;;  %v1206_v6 = vld [vmem:[#allocation8 + $0x40] sm:$0xff]  ;;  %v1103_v58 = vld [vmem:[#allocation8 + $0x10] sm:$0xff] }
 0x11f   :  { %3986 = vmatprep.subr.mxu0 %v256_v10  ;;  %v1106_v62 = vld [vmem:[#allocation8 + $0x28] sm:$0xff]  ;;  %v1316_v0 = vld [vmem:[#allocation11 + $0x8] sm:$0xff]  ;;  %vm5192_vm13 = vmpackc.low %vm2701_vm10, %vm5641_vm2 }
 0x121   :  { %4007 = vmatpush3.msra.mxu1 %v256_v10 }
 0x122   :  { %4009 = vmatmul.mubr.msk.f32.vlgmr.msra.gmra.mrb[0].mxu1 %vm261_vm0, %v365_v16  ;;  %4519 = vmatprep.subr.bf16.mxu1 %v4518_v15 }
 0x123   :  { %4011 = vmatprep.mubr.msk.f32.mxu1 %vm261_vm0, %v366_v17  ;;  %4521 = vmatpush3.bf16.msra.mxu1 %v4518_v15 }
 0x124   :  { %4524 = vmatprep.subr.msk.bf16.mxu1 %vm5981_vm3, %v4522_v18  ;;  %3987 = vmatpush3.msra.mxu0 %v256_v10 }
 0x125   :  { %3989 = vmatmul.mubr.msk.f32.vlgmr.msra.gmra.mrb[0].mxu0 %vm261_vm0, %v258_v22  ;;  %4529 = vmatprep.subr.bf16.mxu0 %v4528_v27 }
 0x126   :  { %4012 = vmatmul.mubr.msk.f32.gmra.mrb[2].mxu1 %vm261_vm0, %v367_v20  ;;  %3991 = vmatprep.mubr.msk.f32.mxu0 %vm261_vm0, %v259_v23 }
 0x127   :  { %4527 = vmatpush3.bf16.msk.msra.mxu1 %vm5981_vm3, %v4522_v18  ;;  %4531 = vmatpush3.bf16.msra.mxu0 %v4528_v27 }
 0x128   :  { %4539 = vmatprep.subr.bf16.mxu1 %v5967_v3  ;;  %4534 = vmatprep.subr.msk.bf16.mxu0 %vm5981_vm3, %v4532_v38 }
 0x129   :  { %3992 = vmatmul.mubr.msk.f32.gmra.mrb[2].mxu0 %vm261_vm0, %v260_v24 }
 0x12b   :  { %4537 = vmatpush3.bf16.msk.msra.mxu0 %vm5981_vm3, %v4532_v38 }
 0x12c   :  { %4551 = vmatprep.subr.bf16.mxu0 %v4550_v44 }
 0x1f5   :  { %v5997_v28 = vpop.f32.mrb[0].mxu1 }
 0x1f6   :  { %v5999_v29 = vpop.f32.mrb[1].mxu1 }
 0x1f7   :  { %4022 = vmatprep.mubr.msk.f32.mxu1 %vm470_vm4, %v5999_v29 }
 0x1f8   :  { %4023 = vmatmul.mubr.msk.f32.vlgmr.msra.gmra.mrb[4].mxu1 %vm470_vm4, %v5997_v28  ;;  %v3990_v39 = vpop.f32.mrb[0].mxu0 }
 0x1f9   :  { %4541 = vmatpush3.bf16.msra.mxu1 %v5967_v3  ;;  %v6006_v30 = vpop.f32.mrb[2].mxu1  ;;  %v340_v40 = vpop.f32.mrb[1].mxu0  ;;  %v6700_v3 = vmov 0.0  }
 0x1fa   :  { %4543 = vmatprep.subr.bf16.mxu1 %v5969_v5  ;;  %v6009_v31 = vpop.f32.mrb[3].mxu1  ;;  %4036 = vmatprep.mubr.msk.f32.mxu0 %vm470_vm4, %v340_v40 }
 0x1fb   :  { %4025 = vmatprep.mubr.msk.f32.mxu1 %vm470_vm4, %v6009_v31  ;;  %4037 = vmatmul.mubr.msk.f32.vlgmr.msra.gmra.mrb[4].mxu0 %vm470_vm4, %v3990_v39 }
 0x1fc   :  { %4026 = vmatmul.mubr.msk.f32.gmra.mrb[6].mxu1 %vm470_vm4, %v6006_v30  ;;  %v3993_v46 = vpop.f32.mrb[2].mxu0  ;;  %4553 = vmatpush3.bf16.msra.mxu0 %v4550_v44 }
 0x1fd   :  { %4545 = vmatpush3.bf16.msra.mxu1 %v5969_v5  ;;  %4056 = vmatprep.mubr.msk.f32.mxu1 %vm261_vm0, %v673_v32  ;;  %v350_v48 = vpop.f32.mrb[3].mxu0  ;;  %v1205_v5 = vld [vmem:[#allocation8 + $0x38] sm:$0xff] }
 0x1fe   :  { %4547 = vmatprep.subr.bf16.mxu1 %v4502_v9  ;;  %4039 = vmatprep.mubr.msk.f32.mxu0 %vm470_vm4, %v350_v48  ;;  %v4590_v7 = vpack.c.bf16 %v1206_v6, %v1205_v5 }
 0x1ff   :  { %4556 = vmatprep.subr.msk.bf16.mxu0 %vm5981_vm3, %v4554_v47  ;;  %4040 = vmatmul.mubr.msk.f32.gmra.mrb[6].mxu0 %vm470_vm4, %v3993_v46 }
 0x200   :  { %4559 = vmatpush3.bf16.msk.msra.mxu0 %vm5981_vm3, %v4554_v47 }
 0x201   :  { %4549 = vmatpush3.bf16.msra.mxu1 %v4502_v9  ;;  %4569 = vmatprep.subr.bf16.mxu0 %v6701_v60 }
 0x202   :  { %4054 = vmatprep.subr.mxu1 %v256_v10 }
 0x205   :  { %4055 = vmatpush3.msra.mxu1 %v256_v10 }
 0x206   :  { %4057 = vmatmul.mubr.msk.f32.vlgmr.msra.gmra.mrb[8].mxu1 %vm261_vm0, %v674_v33  ;;  %4560 = vmatprep.subr.bf16.mxu1 %v6701_v60 }
 0x207   :  { %4059 = vmatprep.mubr.msk.f32.mxu1 %vm261_vm0, %v675_v34  ;;  %4562 = vmatpush3.bf16.msra.mxu1 %v4561_v59 }
 0x208   :  { %4563 = vmatprep.subr.bf16.mxu1 %v6701_v60 }
 0x20a   :  { %4060 = vmatmul.mubr.msk.f32.gmra.mrb[10].mxu1 %vm261_vm0, %v676_v35 }
 0x20b   :  { %4565 = vmatpush3.bf16.msra.mxu1 %v4564_v63  ;;  %4090 = vmatprep.mubr.msk.f32.mxu1 %vm5644_vm5, %v6700_v3 }
 0x20c   :  { %4566 = vmatprep.subr.bf16.mxu1 %v6701_v60 }
 0x20f   :  { %4568 = vmatpush3.bf16.msra.mxu1 %v4567_v2 }
 0x210   :  { %4088 = vmatprep.subr.mxu1 %v6700_v3 }
 0x213   :  { %4089 = vmatpush3.msra.mxu1 %v907_v4 }
 0x2cb   :  { %v4024_v49 = vpop.f32.mrb[4].mxu1 }
 0x2cc   :  { %v553_v50 = vpop.f32.mrb[5].mxu1 }
 0x2cf   :  { %v4027_v51 = vpop.f32.mrb[6].mxu1 }
 0x2d0   :  { %v563_v52 = vpop.f32.mrb[7].mxu1 }
 0x2d9   :  { %v4058_v53 = vpop.f32.mrb[8].mxu1 }
 0x2da   :  { %v755_v54 = vpop.f32.mrb[9].mxu1 }
 0x2db   :  { %4070 = vmatprep.mubr.msk.f32.mxu0 %vm470_vm4, %v755_v54 }
 0x2dc   :  { %4071 = vmatmul.mubr.msk.f32.vlgmr.msra.gmra.mrb[4].mxu0 %vm470_vm4, %v4058_v53 }
 0x2dd   :  { %v4061_v55 = vpop.f32.mrb[10].mxu1  ;;  %4571 = vmatpush3.bf16.msra.mxu0 %v4561_v59  ;;  %v1104_v59 = vld [vmem:[#allocation8 + $0x18] sm:$0xff] }
 0x2de   :  { %v765_v56 = vpop.f32.mrb[11].mxu1  ;;  %4572 = vmatprep.subr.bf16.mxu0 %v6701_v60  ;;  %v4582_v61 = vpack.c.bf16 %v1104_v59, %v1103_v58 }
 0x2df   :  { %4073 = vmatprep.mubr.msk.f32.mxu0 %vm470_vm4, %v765_v56  ;;  %v1102_v56 = vld [vmem:[#allocation8 + $0x8] sm:$0xff] }
 0x2e0   :  { %4074 = vmatmul.mubr.msk.f32.gmra.mrb[6].mxu0 %vm470_vm4, %v4061_v55 }
 0x2e1   :  { %4574 = vmatpush3.bf16.msra.mxu0 %v4564_v63  ;;  %4107 = vmatprep.mubr.msk.f32.mxu0 %vm5644_vm5, %v6700_v3 }
 0x2e2   :  { %4575 = vmatprep.subr.bf16.mxu0 %v6701_v60 }
 0x2e5   :  { %4577 = vmatpush3.bf16.msra.mxu0 %v4567_v2 }
 0x2e6   :  { %4105 = vmatprep.subr.mxu0 %v6700_v3 }
 0x2e9   :  { %4106 = vmatpush3.msra.mxu0 %v907_v4 }
 0x2ea   :  { %4591 = vmatprep.subr.bf16.mxu0 %v4590_v7 }
 0x3af   :  { %v4072_v8 = vpop.f32.mrb[4].mxu0 }
 0x3b0   :  { %v6048_v9 = vadd.f32 %v4072_v8, %v4024_v49  ;;  %v860_v10 = vpop.f32.mrb[5].mxu0 }
 0x3b1   :  { %v6050_v11 = vadd.f32 %v860_v10, %v553_v50  ;;  %v1207_v50 = vld [vmem:[#allocation8 + $0x48] sm:$0xff]  ;;  %v1077_v10 = vlaneseq }
 0x3b2   :  { %v982_v12 = vmul.f32 %v6048_v9, %v6048_v9  ;;  %v886_v13 = vsel %vm261_vm0, %v6048_v9, 0.0 }
 0x3b3   :  { %v885_v14 = vsel %vm261_vm0, %v6050_v11, 0.0  ;;  %v981_v15 = vmul.f32 %v6050_v11, %v6050_v11  ;;  %v4075_v16 = vpop.f32.mrb[6].mxu0 }
 0x3b4   :  { %v6060_v17 = vadd.f32 %v4075_v16, %v4027_v51  ;;  %v870_v18 = vpop.f32.mrb[7].mxu0  ;;  %v986_v20 = vsel %vm261_vm0, %v982_v12, 0.0  ;;  %v887_v23 = vadd.f32 %v886_v13, %v885_v14  ;;  %v1208_v51 = vld [vmem:[#allocation8 + $0x50] sm:$0xf]  ;;  %v6096_v13 = vshrl.u32 %v1077_v10, 7  ;;  %v1325_v10 = vld [vmem:[#allocation11 + $0x50] sm:$0xff] }
 0x3b5   :  { %v985_v21 = vsel %vm261_vm0, %v981_v15, 0.0  ;;  %v6064_v22 = vadd.f32 %v870_v18, %v563_v52  ;;  %v4594_v55 = vpack.c.bf16 %v1208_v51, %v1207_v50 }
 0x3b6   :  { %v984_v24 = vmul.f32 %v6060_v17, %v6060_v17  ;;  %v987_v27 = vadd.f32 %v986_v20, %v985_v21  ;;  %v891_v33 = vsel %vm890_vm6, %v6060_v17, 0.0  ;;  %6718 = vst [vmem:[#allocation38_spill] sm:$0xff] %v6096_v13 }
 0x3b7   :  { %v888_v25 = vsel %vm261_vm0, %v6064_v22, 0.0  ;;  %v983_v26 = vmul.f32 %v6064_v22, %v6064_v22 }
 0x3b8   :  { %v889_v32 = vadd.f32 %v888_v25, %v887_v23  ;;  %v990_v37 = vsel %vm890_vm6, %v984_v24, 0.0  ;;  %v6111_v23 = vsub.s32 0, %v6096_v13 }
 0x3b9   :  { %v988_v34 = vsel %vm261_vm0, %v983_v26, 0.0 }
 0x3ba   :  { %v892_v35 = vadd.f32 %v891_v33, %v889_v32  ;;  %v989_v36 = vadd.f32 %v988_v34, %v987_v27  ;;  %v883_v34 = vld [vmem:[#allocation20] ss:$0 sm:$0xff] }
 0x3bc   :  { %v893_v38 = vrot.slane %v892_v35, 4  ;;  %v991_v39 = vadd.f32 %v990_v37, %v989_v36 }
 0x3be   :  { %v894_v40 = vadd.f32 %v893_v38, %v892_v35  ;;  %v992_v41 = vrot.slane %v991_v39, 4 }
 0x3c0   :  { %v895_v42 = vrot.slane %v894_v40, 2  ;;  %v993_v43 = vadd.f32 %v992_v41, %v991_v39 }
 0x3c2   :  { %v896_v44 = vadd.f32 %v895_v42, %v894_v40  ;;  %v994_v45 = vrot.slane %v993_v43, 2 }
 0x3c4   :  { %v897_v46 = vrot.slane %v896_v44, 1  ;;  %v995_v47 = vadd.f32 %v994_v45, %v993_v43 }
 0x3c6   :  { %v898_v48 = vadd.f32 %v897_v46, %v896_v44  ;;  %v996_v49 = vrot.slane %v995_v47, 1 }
 0x3c8   :  { %v900_v52 = vmul.f32 0.035714287, %v898_v48  ;;  %v997_v53 = vadd.f32 %v996_v49, %v995_v47 }
 0x3ca   :  { %v998_v54 = vmul.f32 0.035714287, %v997_v53  ;;  %4091 = vmatmul.mubr.msk.f32.vlgmr.msra.gmra.mrb[12].mxu1 %vm261_vm0, %v900_v52  ;;  %v884_v53 = vld [vmem:[#allocation20 + $0x1] ss:$0 sm:$0xff] }
 0x3cc   :  { %4108 = vmatmul.mubr.msk.f32.vlgmr.msra.gmra.mrb[8].mxu0 %vm261_vm0, %v998_v54 }
 0x3cd   :  { %4593 = vmatpush3.bf16.msra.mxu0 %v4590_v7  ;;  %4138 = vmatprep.mubr.msk.f32.mxu0 %vm470_vm4, %v5999_v29  ;;  %v1101_v29 = vld [vmem:[#allocation8] sm:$0xff] }
 0x3ce   :  { %4596 = vmatprep.subr.msk.bf16.mxu0 %vm5981_vm3, %v4594_v55  ;;  %v4578_v57 = vpack.c.bf16 %v1102_v56, %v1101_v29 }
 0x3d0   :  { %4579 = vmatprep.subr.bf16.mxu1 %v4578_v57 }
 0x3d1   :  { %4599 = vmatpush3.bf16.msk.msra.mxu0 %vm5981_vm3, %v4594_v55  ;;  %4581 = vmatpush3.bf16.msra.mxu1 %v4578_v57 }
 0x3d2   :  { %4621 = vmatprep.subr.bf16.mxu0 %v6701_v60  ;;  %4583 = vmatprep.subr.bf16.mxu1 %v4582_v61 }
 0x3d4   :  { %4139 = vmatmul.mubr.msk.f32.vlgmr.msra.gmra.mrb[10].mxu0 %vm470_vm4, %v5997_v28  ;;  %v1105_v28 = vld [vmem:[#allocation8 + $0x20] sm:$0xff] }
 0x3d5   :  { %4141 = vmatprep.mubr.msk.f32.mxu0 %vm470_vm4, %v6009_v31  ;;  %4585 = vmatpush3.bf16.msra.mxu1 %v4582_v61  ;;  %v4586_v63 = vpack.c.bf16 %v1106_v62, %v1105_v28  ;;  %v1107_v31 = vld [vmem:[#allocation8 + $0x30] sm:$0xff]  ;;  %v1318_v62 = vld [vmem:[#allocation11 + $0x18] sm:$0xff] }
 0x3d7   :  { %4587 = vmatprep.subr.bf16.mxu1 %v4586_v63 }
 0x3d8   :  { %4142 = vmatmul.mubr.msk.f32.gmra.mrb[12].mxu0 %vm470_vm4, %v6006_v30  ;;  %v1315_v30 = vld [vmem:[#allocation11] sm:$0xff] }
 0x3d9   :  { %4203 = vmatprep.mubr.msk.f32.mxu0 %vm5644_vm5, %v6700_v3  ;;  %4589 = vmatpush3.bf16.msra.mxu1 %v4586_v63  ;;  %v6092_v1 = vpack.c.bf16 %v1316_v0, %v1315_v30  ;;  %v1320_v30 = vld [vmem:[#allocation11 + $0x28] sm:$0xff] }
 0x3da   :  { %4122 = vmatprep.subr.mxu1 %v1107_v31 }
 0x3db   :  { %4623 = vmatpush3.bf16.msra.mxu0 %v6092_v1 }
 0x3dc   :  { %4624 = vmatprep.subr.bf16.mxu0 %v6701_v60 }
 0x3dd   :  { %4123 = vmatpush3.msra.mxu1 %v1107_v31  ;;  %v1319_v31 = vld [vmem:[#allocation11 + $0x20] sm:$0xff] }
 0x3de   :  { %4600 = vmatprep.subr.bf16.mxu1 %v6701_v60  ;;  %v6153_v0 = vpack.c.bf16 %v1320_v30, %v1319_v31 }
 0x49d   :  { %v977_v2 = vpop.f32.mrb[12].mxu1 }
 0x49e   :  { %v1072_v4 = vmul.f32 %v977_v2, %v977_v2  ;;  %v4092_v5 = vpop.f32.mrb[13].mxu1  ;;  %v1080_v38 = vrot.slane %v977_v2, %v6111_v23  ;;  %v1321_v2 = vld [vmem:[#allocation11 + $0x30] sm:$0xff] }
 0x49f   :  { %v1068_v6 = vpop.f32.mrb[8].mxu0 }
 0x4a0   :  { %v4109_v7 = vpop.f32.mrb[9].mxu0  ;;  %v1073_v8 = vsub.f32 %v1068_v6, %v1072_v4  ;;  %v1081_v47 = vsub.f32 %v6050_v11, %v1080_v38  ;;  %v1082_v48 = vsub.f32 %v6048_v9, %v1080_v38  ;;  %v1083_v51 = vsub.f32 %v6064_v22, %v1080_v38  ;;  %v1317_v22 = vld [vmem:[#allocation11 + $0x10] sm:$0xff]  ;;  %v1322_v4 = vld [vmem:[#allocation11 + $0x38] sm:$0xff]  ;;  %v1323_v6 = vld [vmem:[#allocation11 + $0x40] sm:$0xff] }
 0x4a1   :  { %v1084_v52 = vsub.f32 %v6060_v17, %v1080_v38  ;;  %v6147_v63 = vpack.c.bf16 %v1318_v62, %v1317_v22  ;;  %v6159_v5 = vpack.c.bf16 %v1322_v4, %v1321_v2  ;;  %v1324_v7 = vld [vmem:[#allocation11 + $0x48] sm:$0xff] }
 0x4a2   :  { %v1074_v12 = vadd.f32 1e-05, %v1073_v8  ;;  %v6165_v8 = vpack.c.bf16 %v1324_v7, %v1323_v6 }
 0x4a3   :  { %4626 = vmatpush3.bf16.msra.mxu0 %v6147_v63 }
 0x4a4   :  { %5231 = vrsqrt.f32 %v1074_v12  ;;  %4627 = vmatprep.subr.bf16.mxu0 %v6701_v60  ;;  %v1326_v12 = vld [vmem:[#allocation11 + $0x58] sm:$0xff] }
 0x4a7   :  { %v6098_v14 = vpop.f32.mrb[10].mxu0  ;;  %4629 = vmatpush3.bf16.msra.mxu0 %v6153_v0 }
 0x4a8   :  { %v1521_v15 = vsel %vm1299_vm7, %v6098_v14, 0.0  ;;  %v1608_v16 = vmul.f32 %v6098_v14, %v6098_v14  ;;  %v6104_v18 = vpop.f32.mrb[11].mxu0  ;;  %4630 = vmatprep.subr.bf16.mxu0 %v6701_v60 }
 0x4a9   :  { %v1520_v20 = vsel %vm1299_vm7, %v6104_v18, 0.0  ;;  %v1607_v21 = vmul.f32 %v6104_v18, %v6104_v18 }
 0x4aa   :  { %v1612_v24 = vsel %vm1299_vm7, %v1608_v16, 0.0  ;;  %v1522_v25 = vadd.f32 %v1521_v15, %v1520_v20  ;;  %v6171_v15 = vpack.c.bf16 %v1326_v12, %v1325_v10  ;;  %v1327_v16 = vld [vmem:[#allocation11 + $0x60] sm:$0xff]  ;;  %v1328_v20 = vld [vmem:[#allocation11 + $0x68] sm:$0xff] }
 0x4ab   :  { %v1611_v26 = vsel %vm1299_vm7, %v1607_v21, 0.0  ;;  %v6115_v27 = vpop.f32.mrb[12].mxu0  ;;  %4632 = vmatpush3.bf16.msra.mxu0 %v6159_v5  ;;  %v6177_v21 = vpack.c.bf16 %v1328_v20, %v1327_v16  ;;  %v1832_v12 = vld [vmem:[#allocation13 + $0x10] sm:$0xff]  ;;  %v1731_v16 = vld [vmem:[#allocation13] sm:$0xff] }
 0x4ac   :  { %v1613_v32 = vadd.f32 %v1612_v24, %v1611_v26  ;;  %v6117_v33 = vpop.f32.mrb[13].mxu0  ;;  %v1610_v35 = vmul.f32 %v6115_v27, %v6115_v27  ;;  %v1525_v41 = vsel %vm1305_vm8, %v6115_v27, 0.0  ;;  %4633 = vmatprep.subr.bf16.mxu0 %v6701_v60 }
 0x4ad   :  { %v1523_v36 = vsel %vm1299_vm7, %v6117_v33, 0.0  ;;  %v1609_v37 = vmul.f32 %v6117_v33, %v6117_v33 }
 0x4ae   :  { %v1524_v39 = vadd.f32 %v1523_v36, %v1522_v25  ;;  %v5232_v40 = vpop.eup %5231  ;;  %v1616_v46 = vsel %vm1305_vm8, %v1610_v35, 0.0 }
 0x4af   :  { %v1614_v42 = vsel %vm1299_vm7, %v1609_v37, 0.0  ;;  %v1076_v43 = vmul.f32 %v5232_v40, %v883_v34  ;;  %4635 = vmatpush3.bf16.msra.mxu0 %v6165_v8 }
 0x4b0   :  { %v6129_v44 = vadd.f32 %v1525_v41, %v1524_v39  ;;  %v1615_v45 = vadd.f32 %v1614_v42, %v1613_v32  ;;  %4636 = vmatprep.subr.bf16.mxu0 %v6701_v60 }
 0x4b1   :  { %v1088_v49 = vrot.slane %v1076_v43, %v6111_v23 }
 0x4b2   :  { %v6135_v50 = vadd.f32 %v1616_v46, %v1615_v45  ;;  %v1527_v31 = vrot.slane %v6129_v44, 4 }
 0x4b3   :  { %v1089_v54 = vmul.f32 %v1088_v49, %v1081_v47  ;;  %v1090_v55 = vmul.f32 %v1088_v49, %v1082_v48  ;;  %v1091_v29 = vmul.f32 %v1088_v49, %v1083_v51  ;;  %v1092_v56 = vmul.f32 %v1088_v49, %v1084_v52  ;;  %4638 = vmatpush3.bf16.msra.mxu0 %v6171_v15 }
 0x4b4   :  { %4639 = vmatprep.subr.bf16.mxu0 %v6701_v60  ;;  %v1618_v30 = vrot.slane %v6135_v50, 4  ;;  %v1528_v2 = vadd.f32 %v1527_v31, %v6129_v44 }
 0x4b5   :  { %v1093_v57 = vadd.f32 %v1089_v54, %v884_v53  ;;  %v1094_v58 = vadd.f32 %v1090_v55, %v884_v53  ;;  %v1095_v59 = vadd.f32 %v1091_v29, %v884_v53  ;;  %v1096_v28 = vadd.f32 %v1092_v56, %v884_v53 }
 0x4b6   :  { %v1619_v4 = vadd.f32 %v1618_v30, %v6135_v50 }
 0x4b7   :  { %v1097_v61 = vmax.f32 %v1093_v57, 0.0  ;;  %v1098_v11 = vmax.f32 %v1094_v58, 0.0  ;;  %v1099_v9 = vmax.f32 %v1095_v59, 0.0  ;;  %v1100_v17 = vmax.f32 %v1096_v28, 0.0  ;;  %4641 = vmatpush3.bf16.msra.mxu0 %v6177_v21 }
 0x4b8   :  { %4663 = vmatprep.subr.bf16.mxu0 %v6701_v60  ;;  %v1620_v6 = vrot.slane %v1619_v4, 2 }
 0x4b9   :  { %4124 = vmatprep.mubr.msk.f32.mxu1 %vm261_vm0, %v1097_v61 }
 0x4ba   :  { %4125 = vmatmul.mubr.msk.f32.vlgmr.msra.gmra.mrb[14].mxu1 %vm261_vm0, %v1098_v11  ;;  %v1621_v50 = vadd.f32 %v1620_v6, %v1619_v4 }
 0x4bb   :  { %4127 = vmatprep.mubr.msk.f32.mxu1 %vm261_vm0, %v1099_v9  ;;  %4602 = vmatpush3.bf16.msra.mxu1 %v6092_v1 }
 0x4bc   :  { %4603 = vmatprep.subr.bf16.mxu1 %v6701_v60 }
 0x4be   :  { %4128 = vmatmul.mubr.msk.f32.gmra.mrb[16].mxu1 %vm261_vm0, %v1100_v17 }
 0x4bf   :  { %4172 = vmatprep.mubr.msk.f32.mxu1 %vm5644_vm5, %v6700_v3  ;;  %4605 = vmatpush3.bf16.msra.mxu1 %v6147_v63 }
 0x4c0   :  { %4606 = vmatprep.subr.bf16.mxu1 %v6701_v60 }
 0x4c3   :  { %4608 = vmatpush3.bf16.msra.mxu1 %v6153_v0 }
 0x4c4   :  { %4609 = vmatprep.subr.bf16.mxu1 %v6701_v60 }
 0x4c7   :  { %4611 = vmatpush3.bf16.msra.mxu1 %v6159_v5 }
 0x4c8   :  { %4612 = vmatprep.subr.bf16.mxu1 %v6701_v60 }
 0x4cb   :  { %4614 = vmatpush3.bf16.msra.mxu1 %v6165_v8 }
 0x4cc   :  { %4615 = vmatprep.subr.bf16.mxu1 %v6701_v60 }
 0x4cf   :  { %4617 = vmatpush3.bf16.msra.mxu1 %v6171_v15 }
 0x4d0   :  { %4618 = vmatprep.subr.bf16.mxu1 %v6701_v60 }
 0x4d3   :  { %4620 = vmatpush3.bf16.msra.mxu1 %v6177_v21 }
 0x4d4   :  { %4642 = vmatprep.subr.bf16.mxu1 %v6701_v60 }
 0x58d   :  { %v6183_v24 = vpop.f32.mrb[14].mxu1 }
 0x58e   :  { %v1301_v25 = vsel %vm1299_vm7, %v6183_v24, 0.0  ;;  %v1403_v26 = vmul.f32 %v6183_v24, %v6183_v24  ;;  %v6189_v32 = vpop.f32.mrb[15].mxu1 }
 0x58f   :  { %v1300_v34 = vsel %vm1299_vm7, %v6189_v32, 0.0  ;;  %v1402_v35 = vmul.f32 %v6189_v32, %v6189_v32 }
 0x590   :  { %v1407_v36 = vsel %vm1299_vm7, %v1403_v26, 0.0  ;;  %v1302_v37 = vadd.f32 %v1301_v25, %v1300_v34 }
 0x591   :  { %v1406_v38 = vsel %vm1299_vm7, %v1402_v35, 0.0  ;;  %v6197_v39 = vpop.f32.mrb[16].mxu1 }
 0x592   :  { %v1408_v40 = vadd.f32 %v1407_v36, %v1406_v38  ;;  %v6199_v41 = vpop.f32.mrb[17].mxu1  ;;  %v1405_v42 = vmul.f32 %v6197_v39, %v6197_v39  ;;  %v1306_v47 = vsel %vm1305_vm8, %v6197_v39, 0.0 }
 0x593   :  { %v1303_v43 = vsel %vm1299_vm7, %v6199_v41, 0.0  ;;  %v1404_v45 = vmul.f32 %v6199_v41, %v6199_v41 }
 0x594   :  { %v1304_v46 = vadd.f32 %v1303_v43, %v1302_v37  ;;  %v1411_v52 = vsel %vm1305_vm8, %v1405_v42, 0.0  ;;  %v1297_v43 = vld [vmem:[#allocation20 + $0x2] ss:$0 sm:$0xff] }
 0x595   :  { %v1409_v48 = vsel %vm1299_vm7, %v1404_v45, 0.0 }
 0x596   :  { %v1307_v49 = vadd.f32 %v1306_v47, %v1304_v46  ;;  %v1410_v51 = vadd.f32 %v1409_v48, %v1408_v40 }
 0x598   :  { %v1308_v53 = vrot.slane %v1307_v49, 4  ;;  %v1412_v54 = vadd.f32 %v1411_v52, %v1410_v51 }
 0x59a   :  { %v1309_v55 = vadd.f32 %v1308_v53, %v1307_v49  ;;  %v1413_v29 = vrot.slane %v1412_v54, 4 }
 0x59c   :  { %v1310_v56 = vrot.slane %v1309_v55, 2  ;;  %v1414_v57 = vadd.f32 %v1413_v29, %v1412_v54 }
 0x59e   :  { %v1311_v58 = vadd.f32 %v1310_v56, %v1309_v55  ;;  %v1415_v59 = vrot.slane %v1414_v57, 2 }
 0x5a0   :  { %v1312_v61 = vrot.slane %v1311_v58, 1  ;;  %v1416_v11 = vadd.f32 %v1415_v59, %v1414_v57 }
 0x5a2   :  { %v1313_v28 = vadd.f32 %v1312_v61, %v1311_v58  ;;  %v1417_v9 = vrot.slane %v1416_v11, 1  ;;  %v1518_v61 = vld [vmem:[#allocation20 + $0x4] ss:$0 sm:$0xff] }
 0x5a4   :  { %v1314_v17 = vmul.f32 0.035714287, %v1313_v28  ;;  %v1418_v22 = vadd.f32 %v1417_v9, %v1416_v11 }
 0x5a6   :  { %v1419_v62 = vmul.f32 0.035714287, %v1418_v22  ;;  %4173 = vmatmul.mubr.msk.f32.vlgmr.msra.gmra.mrb[18].mxu1 %vm1299_vm7, %v1314_v17  ;;  %v1298_v17 = vld [vmem:[#allocation20 + $0x3] ss:$0 sm:$0xff]  ;;  %v1519_v22 = vld [vmem:[#allocation20 + $0x5] ss:$0 sm:$0xff] }
 0x5a7   :  { %4644 = vmatpush3.bf16.msra.mxu1 %v6092_v1  ;;  %4234 = vmatprep.mubr.msk.f32.mxu1 %vm5644_vm5, %v6700_v3 }
 0x5a8   :  { %4204 = vmatmul.mubr.msk.f32.vlgmr.msra.gmra.mrb[14].mxu0 %vm1299_vm7, %v1419_v62  ;;  %4645 = vmatprep.subr.bf16.mxu1 %v6701_v60 }
 0x5a9   :  { %4665 = vmatpush3.bf16.msra.mxu0 %v6092_v1  ;;  %4265 = vmatprep.mubr.msk.f32.mxu0 %vm5644_vm5, %v6700_v3  ;;  %v1529_v1 = vrot.slane %v1528_v2, 2 }
 0x5aa   :  { %4666 = vmatprep.subr.bf16.mxu0 %v6701_v60 }
 0x5ab   :  { %4647 = vmatpush3.bf16.msra.mxu1 %v6147_v63  ;;  %v1530_v44 = vadd.f32 %v1529_v1, %v1528_v2 }
 0x5ac   :  { %4648 = vmatprep.subr.bf16.mxu1 %v6701_v60 }
 0x5ad   :  { %4668 = vmatpush3.bf16.msra.mxu0 %v6147_v63  ;;  %v1531_v63 = vrot.slane %v1530_v44, 1 }
 0x5ae   :  { %4669 = vmatprep.subr.bf16.mxu0 %v6701_v60 }
 0x5af   :  { %4650 = vmatpush3.bf16.msra.mxu1 %v6153_v0  ;;  %v1532_v7 = vadd.f32 %v1531_v63, %v1530_v44 }
 0x5b0   :  { %4651 = vmatprep.subr.bf16.mxu1 %v6701_v60 }
 0x5b1   :  { %4671 = vmatpush3.bf16.msra.mxu0 %v6153_v0  ;;  %v1622_v0 = vrot.slane %v1621_v50, 1  ;;  %v1533_v10 = vmul.f32 0.035714287, %v1532_v7 }
 0x5b2   :  { %4672 = vmatprep.subr.bf16.mxu0 %v6701_v60 }
 0x5b3   :  { %4653 = vmatpush3.bf16.msra.mxu1 %v6159_v5 }
 0x5b4   :  { %4654 = vmatprep.subr.bf16.mxu1 %v6701_v60 }
 0x5b5   :  { %4674 = vmatpush3.bf16.msra.mxu0 %v6159_v5  ;;  %v1623_v5 = vadd.f32 %v1622_v0, %v1621_v50 }
 0x5b6   :  { %4675 = vmatprep.subr.bf16.mxu0 %v6701_v60 }
 0x5b7   :  { %4656 = vmatpush3.bf16.msra.mxu1 %v6165_v8 }
 0x5b8   :  { %4657 = vmatprep.subr.bf16.mxu1 %v6701_v60 }
 0x5b9   :  { %4677 = vmatpush3.bf16.msra.mxu0 %v6165_v8  ;;  %v1624_v8 = vmul.f32 0.035714287, %v1623_v5 }
 0x5ba   :  { %4678 = vmatprep.subr.bf16.mxu0 %v6701_v60 }
 0x5bb   :  { %4659 = vmatpush3.bf16.msra.mxu1 %v6171_v15 }
 0x5bc   :  { %4660 = vmatprep.subr.bf16.mxu1 %v6701_v60 }
 0x5bd   :  { %4680 = vmatpush3.bf16.msra.mxu0 %v6171_v15 }
 0x5be   :  { %4681 = vmatprep.subr.bf16.mxu0 %v6701_v60 }
 0x5bf   :  { %4662 = vmatpush3.bf16.msra.mxu1 %v6177_v21 }
 0x5c1   :  { %4683 = vmatpush3.bf16.msra.mxu0 %v6177_v21 }
 0x5c2   :  { %4235 = vmatmul.mubr.msk.f32.vlgmr.msra.gmra.mrb[20].mxu1 %vm1299_vm7, %v1533_v10 }
 0x5c3   :  { %4276 = vmatprep.mubr.msk.f32.mxu1 %vm470_vm4, %v1731_v16 }
 0x5c4   :  { %4266 = vmatmul.mubr.msk.f32.vlgmr.msra.gmra.mrb[16].mxu0 %vm1299_vm7, %v1624_v8 }
 0x5c5   :  { %4287 = vmatprep.mubr.msk.f32.mxu0 %vm470_vm4, %v1832_v12 }
 0x679   :  { %v1398_v15 = vpop.f32.mrb[18].mxu1 }
 0x67a   :  { %v1493_v20 = vmul.f32 %v1398_v15, %v1398_v15  ;;  %v1501_v25 = vrot.slane %v1398_v15, %v6111_v23  ;;  %v4174_v26 = vpop.f32.mrb[19].mxu1 }
 0x67b   :  { %v1489_v34 = vpop.f32.mrb[14].mxu0 }
 0x67c   :  { %v1502_v35 = vsub.f32 %v6189_v32, %v1501_v25  ;;  %v1503_v21 = vsub.f32 %v6183_v24, %v1501_v25  ;;  %v1504_v36 = vsub.f32 %v6199_v41, %v1501_v25  ;;  %v1505_v37 = vsub.f32 %v6197_v39, %v1501_v25  ;;  %v4205_v38 = vpop.f32.mrb[15].mxu0  ;;  %v1917_v25 = vld [vmem:[#allocation14 + $0x78] sm:$0xff] }
 0x67d   :  { %v1494_v40 = vsub.f32 %v1489_v34, %v1493_v20  ;;  %v1916_v20 = vld [vmem:[#allocation14 + $0x70] sm:$0xff]  ;;  %v1918_v34 = vld [vmem:[#allocation14 + $0x80] sm:$0xff] }
 0x67e   :  { %v4704_v26 = vpack.c.bf16 %v1917_v25, %v1916_v20  ;;  %v2177_v25 = vld [vmem:[#allocation14 + $0xe0] sm:$0xff] }
 0x67f   :  { %v1495_v42 = vadd.f32 1e-05, %v1494_v40  ;;  %v1920_v40 = vld [vmem:[#allocation14 + $0x90] sm:$0xff] }
 0x681   :  { %5233 = vrsqrt.f32 %v1495_v42  ;;  %v1921_v42 = vld [vmem:[#allocation14 + $0x98] sm:$0xff] }
 0x68b   :  { %v5234_v45 = vpop.eup %5233 }
 0x68c   :  { %v1497_v46 = vmul.f32 %v5234_v45, %v1297_v43  ;;  %v4712_v43 = vpack.c.bf16 %v1921_v42, %v1920_v40  ;;  %v1922_v45 = vld [vmem:[#allocation14 + $0xa0] sm:$0xff]  ;;  %v2183_v42 = vld [vmem:[#allocation14 + $0x110] sm:$0xff] }
 0x68e   :  { %v1509_v47 = vrot.slane %v1497_v46, %v6111_v23  ;;  %v1923_v46 = vld [vmem:[#allocation14 + $0xa8] sm:$0xff] }
 0x690   :  { %v1510_v48 = vmul.f32 %v1509_v47, %v1502_v35  ;;  %v1511_v49 = vmul.f32 %v1509_v47, %v1503_v21  ;;  %v1512_v51 = vmul.f32 %v1509_v47, %v1504_v36  ;;  %v1513_v52 = vmul.f32 %v1509_v47, %v1505_v37  ;;  %v1919_v35 = vld [vmem:[#allocation14 + $0x88] sm:$0xff]  ;;  %v1732_v36 = vld [vmem:[#allocation13 + $0x8] sm:$0x3f]  ;;  %v2093_v37 = vld [vmem:[#allocation13 + $0x20] sm:$0xff] }
 0x691   :  { %v1833_v21 = vld [vmem:[#allocation13 + $0x18] sm:$0x3f]  ;;  %v4708_v38 = vpack.c.bf16 %v1919_v35, %v1918_v34  ;;  %v2094_v47 = vld [vmem:[#allocation13 + $0x28] sm:$0x3f]  ;;  %v2179_v35 = vld [vmem:[#allocation14 + $0xf0] sm:$0xff] }
 0x692   :  { %v1515_v2 = vadd.f32 %v1511_v49, %v1298_v17  ;;  %v1517_v4 = vadd.f32 %v1513_v52, %v1298_v17  ;;  %v1924_v49 = vld [vmem:[#allocation14 + $0xb0] sm:$0xff] }
 0x695   :  { %v1603_v32 = vpop.f32.mrb[20].mxu1 }
 0x696   :  { %v1698_v53 = vmul.f32 %v1603_v32, %v1603_v32  ;;  %v1706_v24 = vrot.slane %v1603_v32, %v6111_v23  ;;  %v4236_v41 = vpop.f32.mrb[21].mxu1  ;;  %v1926_v32 = vld [vmem:[#allocation14 + $0xc0] sm:$0xff] }
 0x697   :  { %v1694_v54 = vpop.f32.mrb[16].mxu0  ;;  %v1929_v41 = vld [vmem:[#allocation14 + $0xd8] sm:$0xff] }
 0x698   :  { %v1707_v39 = vsub.f32 %v6104_v18, %v1706_v24  ;;  %v1708_v55 = vsub.f32 %v6098_v14, %v1706_v24  ;;  %v1709_v29 = vsub.f32 %v6117_v33, %v1706_v24  ;;  %v1710_v56 = vsub.f32 %v6115_v27, %v1706_v24  ;;  %v4267_v57 = vpop.f32.mrb[17].mxu0  ;;  %v1928_v24 = vld [vmem:[#allocation14 + $0xd0] sm:$0xff] }
 0x699   :  { %v1699_v58 = vsub.f32 %v1694_v54, %v1698_v53  ;;  %v1514_v14 = vadd.f32 %v1510_v48, %v1298_v17  ;;  %v1516_v33 = vadd.f32 %v1512_v51, %v1298_v17  ;;  %v4716_v48 = vpack.c.bf16 %v1923_v46, %v1922_v45  ;;  %v1925_v51 = vld [vmem:[#allocation14 + $0xb8] sm:$0xff]  ;;  %v1927_v53 = vld [vmem:[#allocation14 + $0xc8] sm:$0xff]  ;;  %v2185_v46 = vld [vmem:[#allocation14 + $0x120] sm:$0xff] }
 0x69a   :  { %v4720_v52 = vpack.c.bf16 %v1925_v51, %v1924_v49  ;;  %v4724_v19 = vpack.c.bf16 %v1927_v53, %v1926_v32  ;;  %v4728_v54 = vpack.c.bf16 %v1929_v41, %v1928_v24  ;;  %v2289_v57 = vld [vmem:[#allocation17 + $0x8] sm:$0xff]  ;;  %v2187_v49 = vld [vmem:[#allocation14 + $0x130] sm:$0xff]  ;;  %v2189_v32 = vld [vmem:[#allocation14 + $0x140] sm:$0xff] }
 0x69b   :  { %v1700_v59 = vadd.f32 1e-05, %v1699_v58  ;;  %v2290_v58 = vld [vmem:[#allocation17 + $0x10] sm:$0xff]  ;;  %v2188_v51 = vld [vmem:[#allocation14 + $0x138] sm:$0xff]  ;;  %v2190_v53 = vld [vmem:[#allocation14 + $0x148] sm:$0xff] }
 0x69c   :  { %v2593_v24 = vld [vmem:[#allocation16 + $0xe8] sm:$0xff]  ;;  %v2595_v41 = vld [vmem:[#allocation16 + $0xf8] sm:$0xff] }
 0x69d   :  { %5235 = vrsqrt.f32 %v1700_v59 }
 0x6a7   :  { %v5236_v11 = vpop.eup %5235 }
 0x6a8   :  { %v1702_v28 = vmul.f32 %v5236_v11, %v1518_v61  ;;  %v2291_v61 = vld [vmem:[#allocation17 + $0x18] sm:$0xff] }
 0x6a9   :  { %v6285_v11 = vpack.c.bf16 %v2291_v61, %v2290_v58  ;;  %v2596_v61 = vld [vmem:[#allocation16 + $0x100] sm:$0xff] }
 0x6aa   :  { %v1714_v9 = vrot.slane %v1702_v28, %v6111_v23  ;;  %v2292_v28 = vld [vmem:[#allocation17 + $0x20] sm:$0xff] }
 0x6ac   :  { %v1715_v62 = vmul.f32 %v1714_v9, %v1707_v39  ;;  %v1716_v31 = vmul.f32 %v1714_v9, %v1708_v55  ;;  %v1717_v18 = vmul.f32 %v1714_v9, %v1709_v29  ;;  %v1718_v30 = vmul.f32 %v1714_v9, %v1710_v56  ;;  %v1817_v39 = vld [vmem:[#allocation14] sm:$0xff]  ;;  %v1818_v55 = vld [vmem:[#allocation14 + $0x8] sm:$0xff]  ;;  %v2288_v56 = vld [vmem:[#allocation17] sm:$0xff] }
 0x6ad   :  { %v4732_v29 = vpack.c.bf16 %v1818_v55, %v1817_v39  ;;  %v6282_v59 = vpack.c.bf16 %v2289_v57, %v2288_v56  ;;  %v2293_v9 = vld [vmem:[#allocation17 + $0x28] sm:$0xff]  ;;  %v2592_v39 = vld [vmem:[#allocation16 + $0xe0] sm:$0xff]  ;;  %v2594_v55 = vld [vmem:[#allocation16 + $0xf0] sm:$0xff] }
 0x6ae   :  { %v1719_v27 = vadd.f32 %v1715_v62, %v1519_v22  ;;  %v1720_v1 = vadd.f32 %v1716_v31, %v1519_v22  ;;  %v1721_v6 = vadd.f32 %v1717_v18, %v1519_v22  ;;  %v1722_v44 = vadd.f32 %v1718_v30, %v1519_v22  ;;  %v1819_v22 = vld [vmem:[#allocation14 + $0x10] sm:$0xff]  ;;  %v1820_v62 = vld [vmem:[#allocation14 + $0x18] sm:$0xff]  ;;  %v2599_v56 = vld [vmem:[#allocation16 + $0x118] sm:$0xff] }
 0x6af   :  { %v6289_v17 = vpack.c.bf16 %v2293_v9, %v2292_v28  ;;  %v4870_v57 = vpack.c.bf16 %v2594_v55, %v2592_v39  ;;  %v2598_v28 = vld [vmem:[#allocation16 + $0x110] sm:$0xff]  ;;  %v2601_v9 = vld [vmem:[#allocation16 + $0x128] sm:$0xff] }
 0x6b0   :  { %v1723_v50 = vadd.f32 %v1719_v27, %v1514_v14  ;;  %v1724_v63 = vadd.f32 %v1720_v1, %v1515_v2  ;;  %v1725_v0 = vadd.f32 %v1721_v6, %v1516_v33  ;;  %v1726_v7 = vadd.f32 %v1722_v44, %v1517_v4  ;;  %v1821_v33 = vld [vmem:[#allocation14 + $0x20] sm:$0xff]  ;;  %v1822_v4 = vld [vmem:[#allocation14 + $0x28] sm:$0xff]  ;;  %v1823_v1 = vld [vmem:[#allocation14 + $0x30] sm:$0xff] }
 0x6b1   :  { %v4736_v14 = vpack.c.bf16 %v1820_v62, %v1819_v22  ;;  %v4740_v27 = vpack.c.bf16 %v1822_v4, %v1821_v33  ;;  %v1824_v6 = vld [vmem:[#allocation14 + $0x38] sm:$0xff]  ;;  %v2603_v22 = vld [vmem:[#allocation16 + $0x138] sm:$0xff]  ;;  %v4874_v62 = vpack.c.bf16 %v2598_v28, %v2596_v61 }
 0x6b2   :  { %v1727_v5 = vmax.f32 %v1723_v50, 0.0  ;;  %v1728_v10 = vmax.f32 %v1724_v63, 0.0  ;;  %v1729_v8 = vmax.f32 %v1725_v0, 0.0  ;;  %v1730_v12 = vmax.f32 %v1726_v7, 0.0  ;;  %v1825_v0 = vld [vmem:[#allocation14 + $0x40] sm:$0xff]  ;;  %v1826_v7 = vld [vmem:[#allocation14 + $0x48] sm:$0xff] }
 0x6b3   :  { %v4744_v50 = vpack.c.bf16 %v1824_v6, %v1823_v1  ;;  %v2605_v33 = vld [vmem:[#allocation16 + $0x148] sm:$0xff]  ;;  %v2607_v4 = vld [vmem:[#allocation16 + $0x158] sm:$0xff]  ;;  %v2604_v6 = vld [vmem:[#allocation16 + $0x140] sm:$0xff] }
 0x6b4   :  { %v4684_v16 = vpack.c.bf16 %v1728_v10, %v1727_v5  ;;  %v4688_v15 = vpack.c.bf16 %v1730_v12, %v1729_v8  ;;  %v4748_v5 = vpack.c.bf16 %v1826_v7, %v1825_v0  ;;  %v1827_v10 = vld [vmem:[#allocation14 + $0x50] sm:$0xff]  ;;  %v1828_v8 = vld [vmem:[#allocation14 + $0x58] sm:$0xff]  ;;  %v4880_v1 = vpack.c.bf16 %v2607_v4, %v2605_v33  ;;  %v2611_v0 = vld [vmem:[#allocation16 + $0x178] sm:$0xff] }
 0x6b5   :  { %v4752_v12 = vpack.c.bf16 %v1828_v8, %v1827_v10  ;;  %v2610_v10 = vld [vmem:[#allocation16 + $0x170] sm:$0xff]  ;;  %v2613_v8 = vld [vmem:[#allocation16 + $0x188] sm:$0xff] }
 0x6b6   :  { %4685 = vmatprep.subr.bf16.mxu1 %v4684_v16  ;;  %4695 = vmatprep.subr.bf16.mxu0 %v4684_v16 }
 0x6b7   :  { %4687 = vmatpush3.bf16.msra.mxu1 %v4684_v16  ;;  %4697 = vmatpush3.bf16.msra.mxu0 %v4684_v16 }
 0x6b8   :  { %4690 = vmatprep.subr.msk.bf16.mxu1 %vm5981_vm3, %v4688_v15  ;;  %4700 = vmatprep.subr.msk.bf16.mxu0 %vm5981_vm3, %v4688_v15 }
 0x6bb   :  { %4693 = vmatpush3.bf16.msk.msra.mxu1 %vm5981_vm3, %v4688_v15  ;;  %4703 = vmatpush3.bf16.msk.msra.mxu0 %vm5981_vm3, %v4688_v15 }
 0x6bc   :  { %4761 = vmatprep.subr.bf16.mxu0 %v4684_v16  ;;  %4705 = vmatprep.subr.bf16.mxu1 %v4704_v26 }
 0x6be   :  { %4288 = vmatmul.mubr.msk.f32.vlgmr.msra.gmra.mrb[18].mxu0 %vm470_vm4, %v1833_v21  ;;  %4277 = vmatmul.mubr.msk.f32.vlgmr.msra.gmra.mrb[22].mxu1 %vm470_vm4, %v1732_v36  ;;  %v2180_v21 = vld [vmem:[#allocation14 + $0xf8] sm:$0xff] }
 0x6bf   :  { %4763 = vmatpush3.bf16.msra.mxu0 %v4684_v16  ;;  %4360 = vmatprep.mubr.msk.f32.mxu0 %vm470_vm4, %v2093_v37  ;;  %v1829_v16 = vld [vmem:[#allocation14 + $0x60] sm:$0xff]  ;;  %v4774_v36 = vpack.c.bf16 %v2180_v21, %v2179_v35 }
 0x6c0   :  { %4766 = vmatprep.subr.msk.bf16.mxu0 %vm5981_vm3, %v4688_v15  ;;  %4707 = vmatpush3.bf16.msra.mxu1 %v4704_v26  ;;  %v2178_v26 = vld [vmem:[#allocation14 + $0xe8] sm:$0xff]  ;;  %v2181_v37 = vld [vmem:[#allocation14 + $0x100] sm:$0xff] }
 0x6c1   :  { %4709 = vmatprep.subr.bf16.mxu1 %v4708_v38  ;;  %v4770_v34 = vpack.c.bf16 %v2178_v26, %v2177_v25  ;;  %v2614_v25 = vld [vmem:[#allocation16 + $0x190] sm:$0xff]  ;;  %v2617_v26 = vld [vmem:[#allocation16 + $0x1a8] sm:$0xff] }
 0x6c3   :  { %4769 = vmatpush3.bf16.msk.msra.mxu0 %vm5981_vm3, %v4688_v15  ;;  %v1830_v15 = vld [vmem:[#allocation14 + $0x68] sm:$0xff] }
 0x6c4   :  { %4711 = vmatpush3.bf16.msra.mxu1 %v4708_v38  ;;  %4798 = vmatprep.subr.bf16.mxu0 %v6701_v60  ;;  %v4756_v20 = vpack.c.bf16 %v1830_v15, %v1829_v16  ;;  %v2182_v38 = vld [vmem:[#allocation14 + $0x108] sm:$0xff] }
 0x6c5   :  { %4713 = vmatprep.subr.bf16.mxu1 %v4712_v43  ;;  %v4778_v40 = vpack.c.bf16 %v2182_v38, %v2181_v37  ;;  %v2618_v37 = vld [vmem:[#allocation16 + $0x1b0] sm:$0xff] }
 0x6c6   :  { %4361 = vmatmul.mubr.msk.f32.vlgmr.msra.gmra.mrb[20].mxu0 %vm470_vm4, %v2094_v47  ;;  %v2186_v47 = vld [vmem:[#allocation14 + $0x128] sm:$0xff] }
 0x6c7   :  { %4422 = vmatprep.mubr.msk.f32.mxu0 %vm5644_vm5, %v6700_v3  ;;  %4800 = vmatpush3.bf16.msra.mxu0 %v6282_v59 }
 0x6c8   :  { %4715 = vmatpush3.bf16.msra.mxu1 %v4712_v43  ;;  %4801 = vmatprep.subr.bf16.mxu0 %v6701_v60  ;;  %v2184_v43 = vld [vmem:[#allocation14 + $0x118] sm:$0xff] }
 0x6c9   :  { %4717 = vmatprep.subr.bf16.mxu1 %v4716_v48  ;;  %v4782_v45 = vpack.c.bf16 %v2184_v43, %v2183_v42  ;;  %v2295_v42 = vld [vmem:[#allocation17 + $0x38] sm:$0xff] }
 0x6cb   :  { %4803 = vmatpush3.bf16.msra.mxu0 %v6285_v11 }
 0x6cc   :  { %4719 = vmatpush3.bf16.msra.mxu1 %v4716_v48  ;;  %4804 = vmatprep.subr.bf16.mxu0 %v6701_v60  ;;  %v4786_v48 = vpack.c.bf16 %v2186_v47, %v2185_v46  ;;  %v2297_v46 = vld [vmem:[#allocation17 + $0x48] sm:$0xff] }
 0x6cd   :  { %4721 = vmatprep.subr.bf16.mxu1 %v4720_v52 }
 0x6cf   :  { %4806 = vmatpush3.bf16.msra.mxu0 %v6289_v17 }
 0x6d0   :  { %4723 = vmatpush3.bf16.msra.mxu1 %v4720_v52  ;;  %4807 = vmatprep.subr.bf16.mxu0 %v6701_v60  ;;  %v4790_v52 = vpack.c.bf16 %v2188_v51, %v2187_v49  ;;  %v2301_v51 = vld [vmem:[#allocation17 + $0x68] sm:$0xff] }
 0x6d1   :  { %4725 = vmatprep.subr.bf16.mxu1 %v4724_v19 }
 0x6d4   :  { %4727 = vmatpush3.bf16.msra.mxu1 %v4724_v19  ;;  %v4794_v19 = vpack.c.bf16 %v2190_v53, %v2189_v32 }
 0x6d5   :  { %4729 = vmatprep.subr.bf16.mxu1 %v4728_v54 }
 0x6d8   :  { %4731 = vmatpush3.bf16.msra.mxu1 %v4728_v54  ;;  %v4868_v54 = vpack.c.bf16 %v2595_v41, %v2593_v24 }
 0x6d9   :  { %4733 = vmatprep.subr.bf16.mxu1 %v4732_v29 }
 0x791   :  { %v6294_v31 = vpop.f32.mrb[18].mxu0  ;;  %v4278_v18 = vpop.f32.mrb[22].mxu1 }
 0x792   :  { %v6296_v30 = vpop.f32.mrb[19].mxu0  ;;  %v1808_v2 = vpop.f32.mrb[23].mxu1 }
 0x793   :  { %4318 = vmatprep.mubr.msk.f32.mxu1 %vm1299_vm7, %v6296_v30 }
 0x794   :  { %4319 = vmatmul.mubr.msk.f32.vlgmr.msra.gmra.mrb[24].mxu1 %vm1299_vm7, %v6294_v31 }
 0x795   :  { %4735 = vmatpush3.bf16.msra.mxu1 %v4732_v29  ;;  %4349 = vmatprep.mubr.msk.f32.mxu1 %vm1299_vm7, %v1808_v2  ;;  %v2597_v29 = vld [vmem:[#allocation16 + $0x108] sm:$0xff]  ;;  %v2602_v2 = vld [vmem:[#allocation16 + $0x130] sm:$0xff] }
 0x796   :  { %4737 = vmatprep.subr.bf16.mxu1 %v4736_v14  ;;  %v4872_v58 = vpack.c.bf16 %v2599_v56, %v2597_v29 }
 0x799   :  { %4739 = vmatpush3.bf16.msra.mxu1 %v4736_v14  ;;  %v6303_v44 = vpop.f32.mrb[20].mxu0  ;;  %v2600_v14 = vld [vmem:[#allocation16 + $0x120] sm:$0xff] }
 0x79a   :  { %4741 = vmatprep.subr.bf16.mxu1 %v4740_v27  ;;  %v2167_v63 = vpop.f32.mrb[21].mxu0 }
 0x79d   :  { %4743 = vmatpush3.bf16.msra.mxu1 %v4740_v27  ;;  %v4878_v27 = vpack.c.bf16 %v2602_v2, %v2600_v14 }
 0x79e   :  { %4745 = vmatprep.subr.bf16.mxu1 %v4744_v50 }
 0x7a1   :  { %4747 = vmatpush3.bf16.msra.mxu1 %v4744_v50  ;;  %v2606_v50 = vld [vmem:[#allocation16 + $0x150] sm:$0xff] }
 0x7a2   :  { %4749 = vmatprep.subr.bf16.mxu1 %v4748_v5 }
 0x7a5   :  { %4751 = vmatpush3.bf16.msra.mxu1 %v4748_v5  ;;  %v2608_v5 = vld [vmem:[#allocation16 + $0x160] sm:$0xff] }
 0x7a6   :  { %4753 = vmatprep.subr.bf16.mxu1 %v4752_v12  ;;  %v4886_v16 = vpack.c.bf16 %v2610_v10, %v2608_v5 }
 0x7a9   :  { %4755 = vmatpush3.bf16.msra.mxu1 %v4752_v12  ;;  %v2615_v12 = vld [vmem:[#allocation16 + $0x198] sm:$0xff] }
 0x7aa   :  { %4757 = vmatprep.subr.bf16.mxu1 %v4756_v20  ;;  %v4888_v15 = vpack.c.bf16 %v2615_v12, %v2613_v8 }
 0x7ad   :  { %4759 = vmatpush3.bf16.msra.mxu1 %v4756_v20  ;;  %v2612_v20 = vld [vmem:[#allocation16 + $0x180] sm:$0xff] }
 0x7ae   :  { %4771 = vmatprep.subr.bf16.mxu1 %v4770_v34  ;;  %v4890_v35 = vpack.c.bf16 %v2614_v25, %v2612_v20 }
 0x7b0   :  { %4350 = vmatmul.mubr.msk.f32.vlgmr.msra.gmra.mrb[24].mxu1 %vm1299_vm7, %v4278_v18  ;;  %v4876_v18 = vpack.c.bf16 %v2603_v22, %v2601_v9 }
 0x7b1   :  { %4773 = vmatpush3.bf16.msra.mxu1 %v4770_v34  ;;  %4391 = vmatprep.mubr.msk.f32.mxu1 %vm1299_vm7, %v2167_v63  ;;  %v2609_v63 = vld [vmem:[#allocation16 + $0x168] sm:$0xff]  ;;  %v2619_v34 = vld [vmem:[#allocation16 + $0x1b8] sm:$0xff] }
 0x7b2   :  { %4775 = vmatprep.subr.bf16.mxu1 %v4774_v36  ;;  %v4884_v7 = vpack.c.bf16 %v2611_v0, %v2609_v63  ;;  %v4892_v21 = vpack.c.bf16 %v2619_v34, %v2617_v26  ;;  %v2482_v34 = vld [vmem:[#allocation16 + $0x8] sm:$0xff] }
 0x7b5   :  { %4777 = vmatpush3.bf16.msra.mxu1 %v4774_v36  ;;  %v2616_v36 = vld [vmem:[#allocation16 + $0x1a0] sm:$0xff] }
 0x7b6   :  { %4779 = vmatprep.subr.bf16.mxu1 %v4778_v40  ;;  %v4894_v38 = vpack.c.bf16 %v2618_v37, %v2616_v36  ;;  %v2483_v37 = vld [vmem:[#allocation16 + $0x10] sm:$0xff] }
 0x7b9   :  { %4781 = vmatpush3.bf16.msra.mxu1 %v4778_v40  ;;  %v2294_v40 = vld [vmem:[#allocation17 + $0x30] sm:$0xff] }
 0x7ba   :  { %4783 = vmatprep.subr.bf16.mxu1 %v4782_v45  ;;  %v4808_v43 = vpack.c.bf16 %v2295_v42, %v2294_v40  ;;  %v2486_v40 = vld [vmem:[#allocation16 + $0x28] sm:$0xff]  ;;  %v2488_v42 = vld [vmem:[#allocation16 + $0x38] sm:$0xff] }
 0x7bc   :  { %4809 = vmatpush3.bf16.msra.mxu0 %v4808_v43 }
 0x7bd   :  { %4785 = vmatpush3.bf16.msra.mxu1 %v4782_v45  ;;  %4810 = vmatprep.subr.bf16.mxu0 %v6701_v60  ;;  %v2296_v45 = vld [vmem:[#allocation17 + $0x40] sm:$0xff] }
 0x7be   :  { %4787 = vmatprep.subr.bf16.mxu1 %v4786_v48  ;;  %v6316_v47 = vpack.c.bf16 %v2297_v46, %v2296_v45  ;;  %v2485_v45 = vld [vmem:[#allocation16 + $0x20] sm:$0xff]  ;;  %v2487_v46 = vld [vmem:[#allocation16 + $0x30] sm:$0xff] }
 0x7c0   :  { %4812 = vmatpush3.bf16.msra.mxu0 %v6316_v47 }
 0x7c1   :  { %4789 = vmatpush3.bf16.msra.mxu1 %v4786_v48  ;;  %4813 = vmatprep.subr.bf16.mxu0 %v6701_v60  ;;  %v2299_v48 = vld [vmem:[#allocation17 + $0x58] sm:$0xff] }
 0x7c2   :  { %4791 = vmatprep.subr.bf16.mxu1 %v4790_v52 }
 0x7c5   :  { %4793 = vmatpush3.bf16.msra.mxu1 %v4790_v52 }
 0x7c6   :  { %4795 = vmatprep.subr.bf16.mxu1 %v4794_v19 }
 0x7c9   :  { %4797 = vmatpush3.bf16.msra.mxu1 %v4794_v19 }
 0x7ca   :  { %4869 = vmatprep.subr.bf16.mxu1 %v4868_v54 }
 0x7cc   :  { %4392 = vmatmul.mubr.msk.f32.vlgmr.msra.gmra.mrb[24].mxu1 %vm1299_vm7, %v6303_v44  ;;  %v4882_v44 = vpack.c.bf16 %v2606_v50, %v2604_v6 }
 0x7cd   :  { %4871 = vmatpush1.bf16.msra.mxu1 %v4870_v57  ;;  %2684 = vmatprep.mubr.f32.mxu1 %v6700_v3 }
 0x7ce   :  { %4873 = vmatprep.subr.bf16.mxu1 %v4872_v58 }
 0x7d1   :  { %4875 = vmatpush1.bf16.msra.mxu1 %v4874_v62 }
 0x7d2   :  { %4877 = vmatprep.subr.bf16.mxu1 %v4876_v18 }
 0x7d5   :  { %4879 = vmatpush1.bf16.msra.mxu1 %v4878_v27 }
 0x7d6   :  { %4881 = vmatprep.subr.bf16.mxu1 %v4880_v1 }
 0x7d9   :  { %4883 = vmatpush1.bf16.msra.mxu1 %v4882_v44 }
 0x7da   :  { %4885 = vmatprep.subr.bf16.mxu1 %v4884_v7 }
 0x7dd   :  { %4887 = vmatpush1.bf16.msra.mxu1 %v4886_v16 }
 0x7de   :  { %4889 = vmatprep.subr.bf16.mxu1 %v4888_v15 }
 0x7e1   :  { %4891 = vmatpush1.bf16.msra.mxu1 %v4890_v35  ;;  %v2484_v35 = vld [vmem:[#allocation16 + $0x18] sm:$0xff] }
 0x7e2   :  { %4893 = vmatprep.subr.bf16.mxu1 %v4892_v21  ;;  %v2481_v21 = vld [vmem:[#allocation16] sm:$0xff]  ;;  %v4840_v36 = vpack.c.bf16 %v2484_v35, %v2482_v34  ;;  %v2727_v35 = vld [vmem:[#allocation19 + $0x20] sm:$0xff] }
 0x7e5   :  { %4895 = vmatpush1.bf16.msra.mxu1 %v4894_v38  ;;  %v4842_v38 = vpack.c.bf16 %v2483_v37, %v2481_v21  ;;  %v2729_v21 = vld [vmem:[#allocation19 + $0x30] sm:$0xff]  ;;  %v2734_v37 = vld [vmem:[#allocation19 + $0x58] sm:$0xff] }
 0x7e8   :  { %3694 = vmatmul.mubr.msk.f32.vlgmr.msra.gmra.mrb[26].mxu1 %vm1299_vm7, %v6296_v30  ;;  %v2298_v30 = vld [vmem:[#allocation17 + $0x50] sm:$0xff] }
 0x7e9   :  { %2690 = vmatprep.mubr.f32.mxu1 %v6700_v3  ;;  %v6320_v49 = vpack.c.bf16 %v2299_v48, %v2298_v30  ;;  %v2490_v30 = vld [vmem:[#allocation16 + $0x48] sm:$0xff]  ;;  %v2492_v48 = vld [vmem:[#allocation16 + $0x58] sm:$0xff] }
 0x7eb   :  { %4815 = vmatpush3.bf16.msra.mxu0 %v6320_v49 }
 0x7ec   :  { %3695 = vmatmul.mubr.msk.f32.gmra.mrb[28].mxu1 %vm1299_vm7, %v6294_v31  ;;  %4816 = vmatprep.subr.bf16.mxu0 %v6701_v60  ;;  %v2300_v31 = vld [vmem:[#allocation17 + $0x60] sm:$0xff] }
 0x7ed   :  { %v4817_v52 = vpack.c.bf16 %v2301_v51, %v2300_v31  ;;  %v2489_v31 = vld [vmem:[#allocation16 + $0x40] sm:$0xff]  ;;  %v2491_v51 = vld [vmem:[#allocation16 + $0x50] sm:$0xff] }
 0x7ef   :  { %4818 = vmatpush3.bf16.msra.mxu0 %v4817_v52 }
 0x7f0   :  { %4819 = vmatprep.subr.bf16.mxu0 %v6701_v60 }
 0x89f   :  { %v6325_v32 = vpop.f32.mrb[24].mxu1 }
 0x8a0   :  { %v2278_v53 = vsel %vm2277_vm9, %v6325_v32, 0.0  ;;  %v2376_v19 = vmul.f32 %v6325_v32, %v6325_v32  ;;  %v6330_v24 = vpop.f32.mrb[25].mxu1 }
 0x8a1   :  { %v2276_v41 = vsel %vm1299_vm7, %v6330_v24, 0.0  ;;  %v2375_v54 = vmul.f32 %v6330_v24, %v6330_v24 }
 0x8a2   :  { %v2378_v39 = vsel %vm2277_vm9, %v2376_v19, 0.0  ;;  %v2279_v55 = vadd.f32 %v2278_v53, %v2276_v41  ;;  %v2494_v53 = vld [vmem:[#allocation16 + $0x68] sm:$0xff]  ;;  %v2496_v19 = vld [vmem:[#allocation16 + $0x78] sm:$0xff] }
 0x8a3   :  { %v2377_v29 = vsel %vm1299_vm7, %v2375_v54, 0.0  ;;  %v4852_v41 = vpack.c.bf16 %v2496_v19, %v2494_v53  ;;  %v2493_v54 = vld [vmem:[#allocation16 + $0x60] sm:$0xff]  ;;  %v2739_v19 = vld [vmem:[#allocation19 + $0x80] sm:$0xff] }
 0x8a4   :  { %v2280_v56 = vrot.slane %v2279_v55, 4  ;;  %v2379_v57 = vadd.f32 %v2378_v39, %v2377_v29  ;;  %v2495_v39 = vld [vmem:[#allocation16 + $0x70] sm:$0xff]  ;;  %v2498_v29 = vld [vmem:[#allocation16 + $0x88] sm:$0xff] }
 0x8a6   :  { %v2281_v58 = vadd.f32 %v2280_v56, %v2279_v55  ;;  %v2380_v18 = vrot.slane %v2379_v57, 4  ;;  %v4854_v55 = vpack.c.bf16 %v2495_v39, %v2493_v54  ;;  %v2500_v56 = vld [vmem:[#allocation16 + $0x98] sm:$0xff]  ;;  %v2746_v39 = vld [vmem:[#allocation19 + $0xb8] sm:$0xff] }
 0x8a7   :  { %v2744_v54 = vld [vmem:[#allocation19 + $0xa8] sm:$0xff] }
 0x8a8   :  { %v2282_v61 = vrot.slane %v2281_v58, 2  ;;  %v2381_v14 = vadd.f32 %v2380_v18, %v2379_v57  ;;  %v4856_v57 = vpack.c.bf16 %v2500_v56, %v2498_v29  ;;  %v2501_v18 = vld [vmem:[#allocation16 + $0xa0] sm:$0xff]  ;;  %v6417_v29 = vpack.c.bf16 %v2746_v39, %v2744_v54  ;;  %v2743_v56 = vld [vmem:[#allocation19 + $0xa0] sm:$0xff] }
 0x8a9   :  { %v2757_v39 = vld [vmem:[#allocation19 + $0x110] sm:$0xff] }
 0x8aa   :  { %v2283_v28 = vadd.f32 %v2282_v61, %v2281_v58  ;;  %v2382_v33 = vrot.slane %v2381_v14, 2  ;;  %v2497_v58 = vld [vmem:[#allocation16 + $0x80] sm:$0xff]  ;;  %v2499_v61 = vld [vmem:[#allocation16 + $0x90] sm:$0xff] }
 0x8ac   :  { %v2284_v9 = vrot.slane %v2283_v28, 1  ;;  %v2383_v27 = vadd.f32 %v2382_v33, %v2381_v14  ;;  %v2503_v14 = vld [vmem:[#allocation16 + $0xb0] sm:$0xff] }
 0x8ad   :  { %v4862_v33 = vpack.c.bf16 %v2503_v14, %v2501_v18  ;;  %v2752_v18 = vld [vmem:[#allocation19 + $0xe8] sm:$0xff]  ;;  %v2754_v14 = vld [vmem:[#allocation19 + $0xf8] sm:$0xff] }
 0x8ae   :  { %v2285_v22 = vadd.f32 %v2284_v9, %v2283_v28  ;;  %v2384_v15 = vrot.slane %v2383_v27, 1  ;;  %v4858_v28 = vpack.c.bf16 %v2499_v61, %v2497_v58  ;;  %v2502_v9 = vld [vmem:[#allocation16 + $0xa8] sm:$0xff]  ;;  %v2748_v58 = vld [vmem:[#allocation19 + $0xc8] sm:$0xff] }
 0x8af   :  { %v2750_v61 = vld [vmem:[#allocation19 + $0xd8] sm:$0xff] }
 0x8b0   :  { %v2287_v62 = vmul.f32 0.071428575, %v2285_v22  ;;  %v2385_v25 = vadd.f32 %v2384_v15, %v2383_v27  ;;  %v2504_v22 = vld [vmem:[#allocation16 + $0xb8] sm:$0xff] }
 0x8b1   :  { %v2508_v27 = vld [vmem:[#allocation16 + $0xd8] sm:$0xff] }
 0x8b2   :  { %4423 = vmatmul.mubr.msk.f32.vlgmr.msra.gmra.mrb[22].mxu0 %vm1299_vm7, %v2287_v62  ;;  %v2386_v26 = vmul.f32 0.071428575, %v2385_v25  ;;  %v4860_v62 = vpack.c.bf16 %v2504_v22, %v2502_v9  ;;  %v2728_v15 = vld [vmem:[#allocation19 + $0x28] sm:$0xff]  ;;  %v2730_v25 = vld [vmem:[#allocation19 + $0x38] sm:$0xff]  ;;  %v6423_v9 = vpack.c.bf16 %v2750_v61, %v2748_v58  ;;  %v2747_v22 = vld [vmem:[#allocation19 + $0xc0] sm:$0xff] }
 0x8b3   :  { %4821 = vmatpush3.bf16.msra.mxu0 %v6282_v59  ;;  %4453 = vmatprep.mubr.msk.f32.mxu0 %vm5644_vm5, %v6700_v3  ;;  %v6393_v34 = vpack.c.bf16 %v2730_v25, %v2728_v15  ;;  %v2762_v58 = vld [vmem:[#allocation19 + $0x138] sm:$0xff] }
 0x8b4   :  { %4822 = vmatprep.subr.bf16.mxu0 %v6701_v60 }
 0x8b7   :  { %4824 = vmatpush3.bf16.msra.mxu0 %v6285_v11 }
 0x8b8   :  { %4825 = vmatprep.subr.bf16.mxu0 %v6701_v60 }
 0x8bb   :  { %4827 = vmatpush3.bf16.msra.mxu0 %v6289_v17  ;;  %v6345_v2 = vpop.f32.mrb[26].mxu1 }
 0x8bc   :  { %6719 = vst [vmem:[#allocation39_spill] sm:$0xff] %v6345_v2  ;;  %v6347_v4 = vpop.f32.mrb[27].mxu1  ;;  %4828 = vmatprep.subr.bf16.mxu0 %v6701_v60  ;;  %v3116_v17 = vmul.f32 %v6345_v2, %v6345_v2 }
 0x8bd   :  { %6720 = vst [vmem:[#allocation40_spill] sm:$0xff] %v6347_v4  ;;  %v3117_v59 = vmul.f32 %v6347_v4, %v6347_v4  ;;  %v3031_v63 = vsel %vm2710_vm11, %v6347_v4, 0.0 }
 0x8bf   :  { %4830 = vmatpush3.bf16.msra.mxu0 %v4808_v43  ;;  %v6352_v11 = vpop.f32.mrb[28].mxu1  ;;  %v3128_v8 = vsel %vm2710_vm11, %v3117_v59, 0.0  ;;  %v4844_v43 = vpack.c.bf16 %v2488_v42, %v2486_v40  ;;  %v2506_v59 = vld [vmem:[#allocation16 + $0xc8] sm:$0xff]  ;;  %v2731_v42 = vld [vmem:[#allocation19 + $0x40] sm:$0xff] }
 0x8c0   :  { %6721 = vst [vmem:[#allocation41_spill] sm:$0xff] %v6352_v11  ;;  %v3023_v1 = vsel %vm2701_vm10, %v6352_v11, 0.0  ;;  %v3118_v6 = vmul.f32 %v6352_v11, %v6352_v11  ;;  %v6360_v50 = vpop.f32.mrb[29].mxu1  ;;  %4831 = vmatprep.subr.bf16.mxu0 %v6701_v60 }
 0x8c1   :  { %6722 = vst [vmem:[#allocation42_spill] sm:$0xff] %v6360_v50  ;;  %v6366_v0 = vadd.f32 %v3023_v1, %v6345_v2  ;;  %v3032_v44 = vsel %vm2712_vm12, %v6360_v50, 0.0  ;;  %v3119_v7 = vmul.f32 %v6360_v50, %v6360_v50  ;;  %v4864_v1 = vpack.c.bf16 %v2508_v27, %v2506_v59  ;;  %v2751_v27 = vld [vmem:[#allocation19 + $0xe0] sm:$0xff] }
 0x8c2   :  { %v3120_v5 = vsel %vm2701_vm10, %v3118_v6, 0.0  ;;  %v6373_v10 = vadd.f32 %v3032_v44, %v3031_v63  ;;  %v2507_v6 = vld [vmem:[#allocation16 + $0xd0] sm:$0xff]  ;;  %v2724_v44 = vld [vmem:[#allocation19 + $0x8] sm:$0xff]  ;;  %v6429_v59 = vpack.c.bf16 %v2754_v14, %v2752_v18 }
 0x8c3   :  { %v6376_v12 = vadd.f32 %v3120_v5, %v3116_v17  ;;  %v3129_v16 = vsel %vm2712_vm12, %v3119_v7, 0.0  ;;  %4833 = vmatpush3.bf16.msra.mxu0 %v6316_v47  ;;  %v4846_v47 = vpack.c.bf16 %v2487_v46, %v2485_v45  ;;  %v2505_v17 = vld [vmem:[#allocation16 + $0xc0] sm:$0xff]  ;;  %v2726_v7 = vld [vmem:[#allocation19 + $0x18] sm:$0xff]  ;;  %v2723_v5 = vld [vmem:[#allocation19] sm:$0xff] }
 0x8c4   :  { %v6380_v20 = vadd.f32 %v3129_v16, %v3128_v8  ;;  %4834 = vmatprep.subr.bf16.mxu0 %v6701_v60  ;;  %v4866_v63 = vpack.c.bf16 %v2507_v6, %v2505_v17  ;;  %v6387_v8 = vpack.c.bf16 %v2726_v7, %v2724_v44  ;;  %v2725_v16 = vld [vmem:[#allocation19 + $0x10] sm:$0xff]  ;;  %v2736_v45 = vld [vmem:[#allocation19 + $0x68] sm:$0xff]  ;;  %v2738_v46 = vld [vmem:[#allocation19 + $0x78] sm:$0xff] }
 0x8c5   :  { %v2753_v17 = vld [vmem:[#allocation19 + $0xf0] sm:$0xff]  ;;  %v2758_v6 = vld [vmem:[#allocation19 + $0x118] sm:$0xff]  ;;  %v2764_v14 = vld [vmem:[#allocation19 + $0x148] sm:$0xff] }
 0x8c6   :  { %4953 = vmatprep.subr.bf16.mxu1 %v6387_v8 }
 0x8c7   :  { %4836 = vmatpush3.bf16.msra.mxu0 %v6320_v49  ;;  %v4848_v49 = vpack.c.bf16 %v2492_v48, %v2490_v30  ;;  %v6405_v30 = vpack.c.bf16 %v2738_v46, %v2736_v45  ;;  %v2735_v48 = vld [vmem:[#allocation19 + $0x60] sm:$0xff] }
 0x8c8   :  { %4837 = vmatprep.subr.bf16.mxu0 %v6701_v60 }
 0x8cb   :  { %4839 = vmatpush3.bf16.msra.mxu0 %v4817_v52  ;;  %v4850_v52 = vpack.c.bf16 %v2491_v51, %v2489_v31  ;;  %v2740_v31 = vld [vmem:[#allocation19 + $0x88] sm:$0xff]  ;;  %v2742_v51 = vld [vmem:[#allocation19 + $0x98] sm:$0xff] }
 0x8cc   :  { %4841 = vmatprep.subr.bf16.mxu0 %v4840_v36  ;;  %v2732_v36 = vld [vmem:[#allocation19 + $0x48] sm:$0xff]  ;;  %v6411_v53 = vpack.c.bf16 %v2742_v51, %v2740_v31 }
 0x8cd   :  { %v6399_v40 = vpack.c.bf16 %v2734_v37, %v2732_v36 }
 0x8ce   :  { %4454 = vmatmul.mubr.msk.f32.vlgmr.msra.gmra.mrb[24].mxu0 %vm1299_vm7, %v2386_v26  ;;  %v6389_v26 = vpack.c.bf16 %v2725_v16, %v2723_v5 }
 0x8cf   :  { %2579 = vmatprep.mubr.f32.mxu0 %v6700_v3  ;;  %4843 = vmatpush1.bf16.msra.mxu0 %v4842_v38  ;;  %v6397_v38 = vpack.c.bf16 %v2729_v21, %v2727_v35 }
 0x8d0   :  { %4845 = vmatprep.subr.bf16.mxu0 %v4844_v43  ;;  %4955 = vmatpush1.bf16.msra.mxu1 %v6389_v26  ;;  %v2733_v43 = vld [vmem:[#allocation19 + $0x50] sm:$0xff] }
 0x8d1   :  { %4957 = vmatprep.subr.bf16.mxu1 %v6393_v34 }
 0x8d3   :  { %4847 = vmatpush1.bf16.msra.mxu0 %v4846_v47  ;;  %v6403_v47 = vpack.c.bf16 %v2733_v43, %v2731_v42  ;;  %v2274_v43 = vld [vmem:[#allocation20 + $0x6] ss:$0 sm:$0xff] }
 0x8d4   :  { %4849 = vmatprep.subr.bf16.mxu0 %v4848_v49  ;;  %4959 = vmatpush1.bf16.msra.mxu1 %v6397_v38  ;;  %v2737_v49 = vld [vmem:[#allocation19 + $0x70] sm:$0xff] }
 0x8d5   :  { %4961 = vmatprep.subr.bf16.mxu1 %v6399_v40 }
 0x8d7   :  { %4851 = vmatpush1.bf16.msra.mxu0 %v4850_v52  ;;  %v6409_v52 = vpack.c.bf16 %v2737_v49, %v2735_v48  ;;  %v2275_v49 = vld [vmem:[#allocation20 + $0x7] ss:$0 sm:$0xff] }
 0x8d8   :  { %4853 = vmatprep.subr.bf16.mxu0 %v4852_v41  ;;  %4963 = vmatpush1.bf16.msra.mxu1 %v6403_v47  ;;  %v2741_v41 = vld [vmem:[#allocation19 + $0x90] sm:$0xff] }
 0x8d9   :  { %4965 = vmatprep.subr.bf16.mxu1 %v6405_v30 }
 0x8db   :  { %4855 = vmatpush1.bf16.msra.mxu0 %v4854_v55  ;;  %v6415_v55 = vpack.c.bf16 %v2741_v41, %v2739_v19 }
 0x8dc   :  { %4857 = vmatprep.subr.bf16.mxu0 %v4856_v57  ;;  %4967 = vmatpush1.bf16.msra.mxu1 %v6409_v52  ;;  %v2745_v57 = vld [vmem:[#allocation19 + $0xb0] sm:$0xff] }
 0x8dd   :  { %4969 = vmatprep.subr.bf16.mxu1 %v6411_v53 }
 0x8df   :  { %4859 = vmatpush1.bf16.msra.mxu0 %v4858_v28  ;;  %v6421_v28 = vpack.c.bf16 %v2745_v57, %v2743_v56  ;;  %v2760_v57 = vld [vmem:[#allocation19 + $0x128] sm:$0xff] }
 0x8e0   :  { %4861 = vmatprep.subr.bf16.mxu0 %v4860_v62  ;;  %4971 = vmatpush1.bf16.msra.mxu1 %v6415_v55  ;;  %v2749_v62 = vld [vmem:[#allocation19 + $0xd0] sm:$0xff]  ;;  %v6466_v61 = vpack.c.bf16 %v2762_v58, %v2760_v57 }
 0x8e1   :  { %4973 = vmatprep.subr.bf16.mxu1 %v6417_v29 }
 0x8e3   :  { %4863 = vmatpush1.bf16.msra.mxu0 %v4862_v33  ;;  %v6427_v33 = vpack.c.bf16 %v2749_v62, %v2747_v22  ;;  %v2759_v22 = vld [vmem:[#allocation19 + $0x120] sm:$0xff]  ;;  %v2761_v62 = vld [vmem:[#allocation19 + $0x130] sm:$0xff] }
 0x8e4   :  { %4865 = vmatprep.subr.bf16.mxu0 %v4864_v1  ;;  %4975 = vmatpush1.bf16.msra.mxu1 %v6421_v28  ;;  %v2756_v1 = vld [vmem:[#allocation19 + $0x108] sm:$0xff]  ;;  %v6468_v18 = vpack.c.bf16 %v2761_v62, %v2759_v22 }
 0x8e5   :  { %4977 = vmatprep.subr.bf16.mxu1 %v6423_v9  ;;  %v6435_v44 = vpack.c.bf16 %v2758_v6, %v2756_v1  ;;  %v2763_v1 = vld [vmem:[#allocation19 + $0x140] sm:$0xff]  ;;  %v2765_v6 = vld [vmem:[#allocation19 + $0x150] sm:$0xff] }
 0x8e7   :  { %4867 = vmatpush1.bf16.msra.mxu0 %v4866_v63  ;;  %v6433_v63 = vpack.c.bf16 %v2753_v17, %v2751_v27  ;;  %v2766_v27 = vld [vmem:[#allocation19 + $0x158] sm:$0xff] }
 0x8e8   :  { %4897 = vmatprep.subr.bf16.mxu0 %v6387_v8  ;;  %4979 = vmatpush1.bf16.msra.mxu1 %v6427_v33  ;;  %v6474_v17 = vpack.c.bf16 %v2766_v27, %v2764_v14 }
 0x8e9   :  { %4981 = vmatprep.subr.bf16.mxu1 %v6429_v59 }
 0x8ec   :  { %4983 = vmatpush1.bf16.msra.mxu1 %v6433_v63 }
 0x8ed   :  { %4985 = vmatprep.subr.bf16.mxu1 %v6435_v44 }
 0x985   :  { %v2371_v7 = vpop.f32.mrb[22].mxu0 }
 0x986   :  { %v2468_v5 = vrot.slane %v2371_v7, %v6111_v23  ;;  %v4424_v16 = vpop.f32.mrb[23].mxu0  ;;  %v2460_v35 = vmul.f32 %v2371_v7, %v2371_v7  ;;  %v6476_v7 = vpack.c.bf16 %v2765_v6, %v2763_v1 }
 0x987   :  { %v2770_v16 = vld [vmem:[#allocation19 + $0x178] sm:$0xff] }
 0x988   :  { %v2469_v15 = vsub.f32 %v6330_v24, %v2468_v5  ;;  %v2470_v25 = vsub.f32 %v6325_v32, %v2468_v5  ;;  %v2755_v24 = vld [vmem:[#allocation19 + $0x100] sm:$0xff]  ;;  %v2768_v5 = vld [vmem:[#allocation19 + $0x168] sm:$0xff] }
 0x989   :  { %v6462_v56 = vpack.c.bf16 %v2757_v39, %v2755_v24  ;;  %v3131_v24 = vrot.slane %v6380_v20, 4 }
 0x98b   :  { %4987 = vmatpush1.bf16.msra.mxu1 %v6462_v56  ;;  %v3132_v62 = vadd.f32 %v3131_v24, %v6380_v20 }
 0x98c   :  { %4989 = vmatprep.subr.bf16.mxu1 %v6466_v61 }
 0x98f   :  { %4991 = vmatpush1.bf16.msra.mxu1 %v6468_v18 }
 0x990   :  { %4993 = vmatprep.subr.bf16.mxu1 %v6474_v17 }
 0x993   :  { %4995 = vmatpush1.bf16.msra.mxu1 %v6476_v7 }
 0x9a1   :  { %v2456_v21 = vpop.f32.mrb[24].mxu0 }
 0x9a2   :  { %v2461_v36 = vsub.f32 %v2456_v21, %v2460_v35  ;;  %v4455_v37 = vpop.f32.mrb[25].mxu0  ;;  %v2769_v35 = vld [vmem:[#allocation19 + $0x170] sm:$0xff] }
 0x9a3   :  { %v2774_v37 = vld [vmem:[#allocation19 + $0x198] sm:$0xff] }
 0x9a4   :  { %v2462_v42 = vadd.f32 1e-05, %v2461_v36  ;;  %v2772_v36 = vld [vmem:[#allocation19 + $0x188] sm:$0xff] }
 0x9a6   :  { %5237 = vrsqrt.f32 %v2462_v42  ;;  %v6490_v42 = vpack.c.bf16 %v2774_v37, %v2772_v36 }
 0x9b0   :  { %v5238_v45 = vpop.eup %5237 }
 0x9b1   :  { %v2464_v46 = vmul.f32 %v5238_v45, %v2274_v43  ;;  %v2771_v43 = vld [vmem:[#allocation19 + $0x180] sm:$0xff]  ;;  %v2773_v45 = vld [vmem:[#allocation19 + $0x190] sm:$0xff] }
 0x9b3   :  { %v2474_v48 = vrot.slane %v2464_v46, %v6111_v23  ;;  %v6492_v46 = vpack.c.bf16 %v2773_v45, %v2771_v43 }
 0x9b5   :  { %v2475_v31 = vmul.f32 %v2474_v48, %v2469_v15  ;;  %v2476_v51 = vmul.f32 %v2474_v48, %v2470_v25  ;;  %v6482_v15 = vpack.c.bf16 %v2770_v16, %v2768_v5  ;;  %v2767_v25 = vld [vmem:[#allocation19 + $0x160] sm:$0xff]  ;;  %v2776_v48 = vld [vmem:[#allocation19 + $0x1a8] sm:$0xff] }
 0x9b6   :  { %v6484_v21 = vpack.c.bf16 %v2769_v35, %v2767_v25 }
 0x9b7   :  { %v2477_v19 = vadd.f32 %v2475_v31, %v2275_v49  ;;  %v2478_v54 = vadd.f32 %v2476_v51, %v2275_v49  ;;  %4997 = vmatprep.subr.bf16.mxu1 %v6482_v15  ;;  %v2778_v49 = vld [vmem:[#allocation19 + $0x1b8] sm:$0xff]  ;;  %v2775_v51 = vld [vmem:[#allocation19 + $0x1a0] sm:$0xff] }
 0x9b8   :  { %4999 = vmatpush1.bf16.msra.mxu1 %v6484_v21  ;;  %v6498_v31 = vpack.c.bf16 %v2778_v49, %v2776_v48 }
 0x9b9   :  { %v2479_v41 = vmax.f32 %v2477_v19, 0.0  ;;  %v2480_v32 = vmax.f32 %v2478_v54, 0.0  ;;  %5001 = vmatprep.subr.bf16.mxu1 %v6490_v42  ;;  %v2777_v19 = vld [vmem:[#allocation19 + $0x1b0] sm:$0xff]  ;;  %v3034_v54 = vrot.slane %v6373_v10, 4 }
 0x9bb   :  { %3692 = vmatmul.mubr.msk.f32.vlgmr.msra.gmra.mrb[26].mxu0 %vm1299_vm7, %v2479_v41  ;;  %v6500_v41 = vpack.c.bf16 %v2777_v19, %v2775_v51  ;;  %v3035_v57 = vadd.f32 %v3034_v54, %v6373_v10  ;;  %v3133_v51 = vrot.slane %v3132_v62, 2 }
 0x9bc   :  { %2585 = vmatprep.mubr.f32.mxu0 %v6700_v3  ;;  %4899 = vmatpush1.bf16.msra.mxu0 %v6389_v26 }
 0x9bd   :  { %4901 = vmatprep.subr.bf16.mxu0 %v6393_v34  ;;  %5003 = vmatpush1.bf16.msra.mxu1 %v6492_v46  ;;  %v3036_v16 = vrot.slane %v3035_v57, 2 }
 0x9be   :  { %5005 = vmatprep.subr.bf16.mxu1 %v6498_v31 }
 0x9bf   :  { %3693 = vmatmul.mubr.msk.f32.gmra.mrb[28].mxu0 %vm1299_vm7, %v2480_v32  ;;  %v3037_v3 = vadd.f32 %v3036_v16, %v3035_v57 }
 0x9c0   :  { %4903 = vmatpush1.bf16.msra.mxu0 %v6397_v38 }
 0x9c1   :  { %4905 = vmatprep.subr.bf16.mxu0 %v6399_v40  ;;  %5007 = vmatpush1.bf16.msra.mxu1 %v6500_v41 }
 0x9c2   :  { %5065 = vmatprep.subr.bf16.mxu1 %v6387_v8 }
 0x9c4   :  { %4907 = vmatpush1.bf16.msra.mxu0 %v6403_v47 }
 0x9c5   :  { %4909 = vmatprep.subr.bf16.mxu0 %v6405_v30 }
 0x9c8   :  { %4911 = vmatpush1.bf16.msra.mxu0 %v6409_v52 }
 0x9c9   :  { %4913 = vmatprep.subr.bf16.mxu0 %v6411_v53 }
 0x9cc   :  { %4915 = vmatpush1.bf16.msra.mxu0 %v6415_v55 }
 0x9cd   :  { %4917 = vmatprep.subr.bf16.mxu0 %v6417_v29 }
 0x9d0   :  { %4919 = vmatpush1.bf16.msra.mxu0 %v6421_v28 }
 0x9d1   :  { %4921 = vmatprep.subr.bf16.mxu0 %v6423_v9 }
 0x9d4   :  { %4923 = vmatpush1.bf16.msra.mxu0 %v6427_v33 }
 0x9d5   :  { %4925 = vmatprep.subr.bf16.mxu0 %v6429_v59 }
 0x9d8   :  { %4927 = vmatpush1.bf16.msra.mxu0 %v6433_v63 }
 0x9d9   :  { %4929 = vmatprep.subr.bf16.mxu0 %v6435_v44 }
 0x9dc   :  { %4931 = vmatpush1.bf16.msra.mxu0 %v6462_v56 }
 0x9dd   :  { %4933 = vmatprep.subr.bf16.mxu0 %v6466_v61 }
 0x9e0   :  { %4935 = vmatpush1.bf16.msra.mxu0 %v6468_v18 }
 0x9e1   :  { %4937 = vmatprep.subr.bf16.mxu0 %v6474_v17 }
 0x9e4   :  { %4939 = vmatpush1.bf16.msra.mxu0 %v6476_v7 }
 0x9e5   :  { %4941 = vmatprep.subr.bf16.mxu0 %v6482_v15 }
 0x9e8   :  { %4943 = vmatpush1.bf16.msra.mxu0 %v6484_v21 }
 0x9e9   :  { %4945 = vmatprep.subr.bf16.mxu0 %v6490_v42 }
 0x9ec   :  { %4947 = vmatpush1.bf16.msra.mxu0 %v6492_v46 }
 0x9ed   :  { %4949 = vmatprep.subr.bf16.mxu0 %v6498_v31 }
 0x9f0   :  { %4951 = vmatpush1.bf16.msra.mxu0 %v6500_v41 }
 0x9f1   :  { %5009 = vmatprep.subr.bf16.mxu0 %v6387_v8 }
 0xa8e   :  { %v6509_v32 = vpop.f32.mrb[26].mxu0 }
 0xa8f   :  { %v6512_v39 = vpop.f32.mrb[27].mxu0  ;;  %v2853_v8 = vmul.f32 %v6509_v32, %v6509_v32 }
 0xa90   :  { %v2854_v58 = vmul.f32 %v6512_v39, %v6512_v39  ;;  %v2711_v10 = vsel %vm2710_vm11, %v6512_v39, 0.0 }
 0xa92   :  { %v6517_v22 = vpop.f32.mrb[28].mxu0  ;;  %v2865_v36 = vsel %vm2710_vm11, %v2854_v58, 0.0 }
 0xa93   :  { %v2702_v14 = vsel %vm2701_vm10, %v6517_v22, 0.0  ;;  %v2855_v27 = vmul.f32 %v6517_v22, %v6517_v22  ;;  %v6526_v1 = vpop.f32.mrb[29].mxu0 }
 0xa94   :  { %v2703_v6 = vadd.f32 %v2702_v14, %v6509_v32  ;;  %v2713_v5 = vsel %vm2712_vm12, %v6526_v1, 0.0  ;;  %v2856_v20 = vmul.f32 %v6526_v1, %v6526_v1 }
 0xa95   :  { %v2857_v25 = vsel %vm2701_vm10, %v2855_v27, 0.0  ;;  %v2714_v35 = vadd.f32 %v2713_v5, %v2711_v10  ;;  %v3134_v5 = vadd.f32 %v3133_v51, %v3132_v62 }
 0xa96   :  { %v2704_v37 = vrot.slane %v2703_v6, 4  ;;  %v2858_v43 = vadd.f32 %v2857_v25, %v2853_v8  ;;  %v2866_v45 = vsel %vm2712_vm12, %v2856_v20, 0.0  ;;  %v3038_v20 = vrot.slane %v3037_v3, 1 }
 0xa97   :  { %v2715_v48 = vrot.slane %v2714_v35, 4  ;;  %v2867_v49 = vadd.f32 %v2866_v45, %v2865_v36 }
 0xa98   :  { %v2705_v19 = vadd.f32 %v2704_v37, %v2703_v6  ;;  %v2859_v54 = vrot.slane %v2858_v43, 4  ;;  %v3135_v37 = vrot.slane %v3134_v5, 1  ;;  %v3039_v57 = vadd.f32 %v3038_v20, %v3037_v3  ;;  %v3308_v20 = vld [vmem:[#allocation22 + $0x90] sm:$0xff] }
 0xa99   :  { %v2716_v24 = vadd.f32 %v2715_v48, %v2714_v35  ;;  %v2868_v14 = vrot.slane %v2867_v49, 4  ;;  %v3025_v3 = vrot.slane %v6366_v0, 4 }
 0xa9a   :  { %v2706_v60 = vrot.slane %v2705_v19, 2  ;;  %v2860_v50 = vadd.f32 %v2859_v54, %v2858_v43  ;;  %v3041_v62 = vmul.f32 0.071428575, %v3039_v57  ;;  %v3313_v57 = vld [vmem:[#allocation22 + $0xb8] sm:$0xff] }
 0xa9b   :  { %v2717_v4 = vrot.slane %v2716_v24, 2  ;;  %v2869_v11 = vadd.f32 %v2868_v14, %v2867_v49 }
 0xa9c   :  { %v2707_v27 = vadd.f32 %v2706_v60, %v2705_v19  ;;  %v2861_v10 = vrot.slane %v2860_v50, 2  ;;  %v3136_v60 = vadd.f32 %v3135_v37, %v3134_v5  ;;  %v3302_v19 = vld [vmem:[#allocation22 + $0x60] sm:$0xff]  ;;  %v3311_v37 = vld [vmem:[#allocation22 + $0xa8] sm:$0xff] }
 0xa9d   :  { %v2718_v58 = vadd.f32 %v2717_v4, %v2716_v24  ;;  %v2870_v2 = vrot.slane %v2869_v11, 2  ;;  %v3303_v24 = vld [vmem:[#allocation22 + $0x68] sm:$0xff] }
 0xa9e   :  { %v2708_v8 = vrot.slane %v2707_v27, 1  ;;  %v2862_v25 = vadd.f32 %v2861_v10, %v2860_v50  ;;  %v5139_v14 = vpack.c.bf16 %v3303_v24, %v3302_v19  ;;  %v3305_v10 = vld [vmem:[#allocation22 + $0x78] sm:$0xff]  ;;  %v5645_v19 = vmov 1966171168  }
 0xa9f   :  { %v2719_v13 = vrot.slane %v2718_v58, 1  ;;  %v2871_v36 = vadd.f32 %v2870_v2, %v2869_v11  ;;  %v3122_v2 = vrot.slane %v6376_v12, 4  ;;  %v3026_v11 = vadd.f32 %v3025_v3, %v6366_v0  ;;  %v3405_v3 = vld [vmem:[#allocation23 + $0x10] sm:$0xff] }
 0xaa0   :  { %v2709_v45 = vadd.f32 %v2708_v8, %v2707_v27  ;;  %v2863_v6 = vrot.slane %v2862_v25, 1  ;;  %v3304_v27 = vld [vmem:[#allocation22 + $0x70] sm:$0xff]  ;;  %v3307_v8 = vld [vmem:[#allocation22 + $0x88] sm:$0xff]  ;;  %v2962_v24 = vunpack.c.l.s4 %v5645_v19 }
 0xaa1   :  { %v2720_v35 = vadd.f32 %v2719_v13, %v2718_v58  ;;  %v2872_v48 = vrot.slane %v2871_v36, 1  ;;  %v3138_v13 = vmul.f32 0.071428575, %v3136_v60  ;;  %v5142_v5 = vpack.c.bf16 %v3305_v10, %v3304_v27  ;;  %v3306_v58 = vld [vmem:[#allocation22 + $0x80] sm:$0xff]  ;;  %v3316_v60 = vld [vmem:[#allocation22 + $0xd0] sm:$0xff] }
 0xaa2   :  { %v2864_v16 = vadd.f32 %v2863_v6, %v2862_v25  ;;  %v2721_v49 = vmul.f32 0.071428575, %v2709_v45  ;;  %v5145_v25 = vpack.c.bf16 %v3307_v8, %v3306_v58  ;;  %v3310_v6 = vld [vmem:[#allocation22 + $0xa0] sm:$0xff]  ;;  %v6724_v10 = vld [vmem:[#allocation38_spill] sm:$0xff] }
 0xaa3   :  { %v2722_v43 = vmul.f32 0.071428575, %v2720_v35  ;;  %v2873_v54 = vadd.f32 %v2872_v48, %v2871_v36  ;;  %v3309_v36 = vld [vmem:[#allocation22 + $0x98] sm:$0xff]  ;;  %v5151_v35 = vpack.c.bf16 %v3311_v37, %v3310_v6  ;;  %v3312_v48 = vld [vmem:[#allocation22 + $0xb0] sm:$0xff] }
 0xaa4   :  { %v2874_v50 = vmul.f32 0.071428575, %v2864_v16  ;;  %v5148_v45 = vpack.c.bf16 %v3309_v36, %v3308_v20  ;;  %v5154_v16 = vpack.c.bf16 %v3313_v57, %v3312_v48  ;;  %v2698_v8 = vld [vmem:[#allocation20 + $0x10] ss:$8 sm:$0x3] }
 0xaa5   :  { %3696 = vmatprep.mubr.msk.f32.mxu0 %vm2710_vm11, %v2722_v43  ;;  %v2875_v4 = vmul.f32 0.071428575, %v2873_v54  ;;  %v3314_v43 = vld [vmem:[#allocation22 + $0xc0] sm:$0xff]  ;;  %v3315_v54 = vld [vmem:[#allocation22 + $0xc8] sm:$0xff] }
 0xaa6   :  { %2847 = vmatmul.mubr.f32.vlgmr.msra.gmra.mrb[30].mxu0 %v2721_v49  ;;  %v5157_v49 = vpack.c.bf16 %v3315_v54, %v3314_v43 }
 0xaa7   :  { %5011 = vmatpush1.bf16.msra.mxu0 %v6389_v26  ;;  %3697 = vmatprep.mubr.msk.f32.mxu1 %vm2710_vm11, %v2875_v4  ;;  %v3317_v4 = vld [vmem:[#allocation22 + $0xd8] sm:$0xff] }
 0xaa8   :  { %3698 = vmatprep.mubr.msk.f32.mxu0 %vm2710_vm11, %v3041_v62  ;;  %2944 = vmatmul.mubr.f32.vlgmr.msra.gmra.mrb[30].mxu1 %v2874_v50  ;;  %v5160_v62 = vpack.c.bf16 %v3317_v4, %v3316_v60  ;;  %v3403_v50 = vld [vmem:[#allocation23] sm:$0xff] }
 0xaa9   :  { %5067 = vmatpush1.bf16.msra.mxu1 %v6389_v26  ;;  %5013 = vmatprep.subr.bf16.mxu0 %v6393_v34  ;;  %v3123_v26 = vadd.f32 %v3122_v2, %v6376_v12  ;;  %v6725_v4 = vld [vmem:[#allocation39_spill] sm:$0xff] }
 0xaaa   :  { %3699 = vmatprep.mubr.msk.f32.mxu1 %vm2710_vm11, %v3138_v13  ;;  %5069 = vmatprep.subr.bf16.mxu1 %v6393_v34  ;;  %v3027_v34 = vrot.slane %v3026_v11, 2  ;;  %v3404_v13 = vld [vmem:[#allocation23 + $0x8] sm:$0xff] }
 0xaab   :  { %5015 = vmatpush1.bf16.msra.mxu0 %v6397_v38  ;;  %v5162_v2 = vpack.c.bf16 %v3404_v13, %v3403_v50  ;;  %v6726_v50 = vld [vmem:[#allocation41_spill] sm:$0xff] }
 0xaac   :  { %5017 = vmatprep.subr.bf16.mxu0 %v6399_v40  ;;  %v3028_v0 = vadd.f32 %v3027_v34, %v3026_v11  ;;  %v3406_v11 = vld [vmem:[#allocation23 + $0x18] sm:$0xff]  ;;  %v3407_v34 = vld [vmem:[#allocation23 + $0x20] sm:$0xff] }
 0xaad   :  { %5071 = vmatpush1.bf16.msra.mxu1 %v6397_v38  ;;  %v3124_v38 = vrot.slane %v3123_v26, 2 }
 0xaae   :  { %5073 = vmatprep.subr.bf16.mxu1 %v6399_v40  ;;  %v3029_v40 = vrot.slane %v3028_v0, 1 }
 0xaaf   :  { %5019 = vmatpush1.bf16.msra.mxu0 %v6403_v47  ;;  %v3125_v12 = vadd.f32 %v3124_v38, %v3123_v26  ;;  %v5166_v26 = vpack.c.bf16 %v3406_v11, %v3405_v3  ;;  %v3408_v38 = vld [vmem:[#allocation23 + $0x28] sm:$0xff] }
 0xab0   :  { %5021 = vmatprep.subr.bf16.mxu0 %v6405_v30  ;;  %v6727_v11 = vld [vmem:[#allocation40_spill] sm:$0xff] }
 0xab1   :  { %5075 = vmatpush1.bf16.msra.mxu1 %v6403_v47  ;;  %v3126_v47 = vrot.slane %v3125_v12, 1 }
 0xab2   :  { %5077 = vmatprep.subr.bf16.mxu1 %v6405_v30  ;;  %v3030_v30 = vadd.f32 %v3029_v40, %v3028_v0  ;;  %v5170_v0 = vpack.c.bf16 %v3408_v38, %v3407_v34  ;;  %v3410_v40 = vld [vmem:[#allocation23 + $0x38] sm:$0xff] }
 0xab3   :  { %5023 = vmatpush1.bf16.msra.mxu0 %v6409_v52  ;;  %v6728_v34 = vld [vmem:[#allocation42_spill] sm:$0xff] }
 0xab4   :  { %5025 = vmatprep.subr.bf16.mxu0 %v6411_v53 }
 0xab5   :  { %5079 = vmatpush1.bf16.msra.mxu1 %v6409_v52  ;;  %v3127_v52 = vadd.f32 %v3126_v47, %v3125_v12  ;;  %v3409_v12 = vld [vmem:[#allocation23 + $0x30] sm:$0xff] }
 0xab6   :  { %5081 = vmatprep.subr.bf16.mxu1 %v6411_v53  ;;  %v3040_v53 = vmul.f32 0.071428575, %v3030_v30  ;;  %v5174_v47 = vpack.c.bf16 %v3410_v40, %v3409_v12  ;;  %v3411_v30 = vld [vmem:[#allocation23 + $0x40] sm:$0xff] }
 0xab7   :  { %5027 = vmatpush1.bf16.msra.mxu0 %v6415_v55 }
 0xab8   :  { %5029 = vmatprep.subr.bf16.mxu0 %v6417_v29 }
 0xab9   :  { %5083 = vmatpush1.bf16.msra.mxu1 %v6415_v55  ;;  %v6723_v55 = vmov 0.0|0.0  }
 0xaba   :  { %5085 = vmatprep.subr.bf16.mxu1 %v6417_v29  ;;  %v3137_v29 = vmul.f32 0.071428575, %v3127_v52  ;;  %v3412_v52 = vld [vmem:[#allocation23 + $0x48] sm:$0xff] }
 0xabb   :  { %5031 = vmatpush1.bf16.msra.mxu0 %v6421_v28 }
 0xabc   :  { %5033 = vmatprep.subr.bf16.mxu0 %v6423_v9 }
 0xabd   :  { %5087 = vmatpush1.bf16.msra.mxu1 %v6421_v28  ;;  %v3290_v28 = vld [vmem:[#allocation22] sm:$0xff] }
 0xabe   :  { %5089 = vmatprep.subr.bf16.mxu1 %v6423_v9  ;;  %v3291_v9 = vld [vmem:[#allocation22 + $0x8] sm:$0xff] }
 0xabf   :  { %5035 = vmatpush1.bf16.msra.mxu0 %v6427_v33 }
 0xac0   :  { %5037 = vmatprep.subr.bf16.mxu0 %v6429_v59 }
 0xac1   :  { %5091 = vmatpush1.bf16.msra.mxu1 %v6427_v33  ;;  %v3292_v33 = vld [vmem:[#allocation22 + $0x10] sm:$0xff] }
 0xac2   :  { %5093 = vmatprep.subr.bf16.mxu1 %v6429_v59  ;;  %v5121_v59 = vpack.c.bf16 %v3291_v9, %v3290_v28  ;;  %v3414_v28 = vld [vmem:[#allocation23 + $0x58] sm:$0xff] }
 0xac3   :  { %5039 = vmatpush1.bf16.msra.mxu0 %v6433_v63 }
 0xac4   :  { %5041 = vmatprep.subr.bf16.mxu0 %v6435_v44 }
 0xac5   :  { %5095 = vmatpush1.bf16.msra.mxu1 %v6433_v63  ;;  %v3293_v63 = vld [vmem:[#allocation22 + $0x18] sm:$0xff] }
 0xac6   :  { %5097 = vmatprep.subr.bf16.mxu1 %v6435_v44  ;;  %v5124_v44 = vpack.c.bf16 %v3293_v63, %v3292_v33 }
 0xac7   :  { %5043 = vmatpush1.bf16.msra.mxu0 %v6462_v56 }
 0xac8   :  { %5045 = vmatprep.subr.bf16.mxu0 %v6466_v61 }
 0xac9   :  { %5099 = vmatpush1.bf16.msra.mxu1 %v6462_v56  ;;  %v3294_v56 = vld [vmem:[#allocation22 + $0x20] sm:$0xff] }
 0xaca   :  { %5101 = vmatprep.subr.bf16.mxu1 %v6466_v61  ;;  %v3295_v61 = vld [vmem:[#allocation22 + $0x28] sm:$0xff] }
 0xacb   :  { %5047 = vmatpush1.bf16.msra.mxu0 %v6468_v18 }
 0xacc   :  { %5049 = vmatprep.subr.bf16.mxu0 %v6474_v17 }
 0xacd   :  { %5103 = vmatpush1.bf16.msra.mxu1 %v6468_v18  ;;  %v5127_v18 = vpack.c.bf16 %v3295_v61, %v3294_v56 }
 0xace   :  { %5105 = vmatprep.subr.bf16.mxu1 %v6474_v17  ;;  %v3296_v17 = vld [vmem:[#allocation22 + $0x30] sm:$0xff] }
 0xacf   :  { %5051 = vmatpush1.bf16.msra.mxu0 %v6476_v7 }
 0xad0   :  { %5053 = vmatprep.subr.bf16.mxu0 %v6482_v15 }
 0xad1   :  { %5107 = vmatpush1.bf16.msra.mxu1 %v6476_v7  ;;  %v3297_v7 = vld [vmem:[#allocation22 + $0x38] sm:$0xff] }
 0xad2   :  { %5109 = vmatprep.subr.bf16.mxu1 %v6482_v15  ;;  %v5130_v15 = vpack.c.bf16 %v3297_v7, %v3296_v17 }
 0xad3   :  { %5055 = vmatpush1.bf16.msra.mxu0 %v6484_v21 }
 0xad4   :  { %5057 = vmatprep.subr.bf16.mxu0 %v6490_v42 }
 0xad5   :  { %5111 = vmatpush1.bf16.msra.mxu1 %v6484_v21  ;;  %v3298_v21 = vld [vmem:[#allocation22 + $0x40] sm:$0xff] }
 0xad6   :  { %5113 = vmatprep.subr.bf16.mxu1 %v6490_v42  ;;  %v3299_v42 = vld [vmem:[#allocation22 + $0x48] sm:$0xff] }
 0xad7   :  { %5059 = vmatpush1.bf16.msra.mxu0 %v6492_v46 }
 0xad8   :  { %5061 = vmatprep.subr.bf16.mxu0 %v6498_v31 }
 0xad9   :  { %5115 = vmatpush1.bf16.msra.mxu1 %v6492_v46  ;;  %v5133_v46 = vpack.c.bf16 %v3299_v42, %v3298_v21 }
 0xada   :  { %5117 = vmatprep.subr.bf16.mxu1 %v6498_v31  ;;  %v3300_v31 = vld [vmem:[#allocation22 + $0x50] sm:$0xff] }
 0xadb   :  { %5063 = vmatpush1.bf16.msra.mxu0 %v6500_v41 }
 0xadc   :  { %5120 = vmatprep.subr.bf16.mxu0 %v6723_v55 }
 0xadd   :  { %5119 = vmatpush1.bf16.msra.mxu1 %v6500_v41  ;;  %v3301_v41 = vld [vmem:[#allocation22 + $0x58] sm:$0xff] }
 0xade   :  { %3110 = vmatmul.mubr.f32.vlgmr.msra.gmra.mrb[32].mxu0 %v3040_v53  ;;  %v5136_v51 = vpack.c.bf16 %v3301_v41, %v3300_v31  ;;  %5163 = vmatprep.subr.bf16.mxu1 %v5162_v2  ;;  %v5178_v53 = vpack.c.bf16 %v3412_v52, %v3411_v30 }
 0xadf   :  { %5122 = vmatpush1.bf16.msra.mxu0 %v5121_v59 }
 0xae0   :  { %3207 = vmatmul.mubr.f32.vlgmr.msra.gmra.mrb[32].mxu1 %v3137_v29  ;;  %5123 = vmatprep.subr.bf16.mxu0 %v6723_v55  ;;  %v3413_v29 = vld [vmem:[#allocation23 + $0x50] sm:$0xff] }
 0xae1   :  { %5165 = vmatpush3.bf16.msra.mxu1 %v5162_v2  ;;  %v5182_v9 = vpack.c.bf16 %v3414_v28, %v3413_v29  ;;  %v3020_v29 = vld [vmem:[#allocation20 + $0x12] ss:$8 sm:$0x3] }
 0xae2   :  { %5167 = vmatprep.subr.bf16.mxu1 %v5166_v26 }
 0xae3   :  { %5125 = vmatpush1.bf16.msra.mxu0 %v5124_v44 }
 0xae4   :  { %5126 = vmatprep.subr.bf16.mxu0 %v6723_v55 }
 0xae5   :  { %5169 = vmatpush3.bf16.msra.mxu1 %v5166_v26 }
 0xae6   :  { %5171 = vmatprep.subr.bf16.mxu1 %v5170_v0 }
 0xae7   :  { %5128 = vmatpush1.bf16.msra.mxu0 %v5127_v18 }
 0xae8   :  { %5129 = vmatprep.subr.bf16.mxu0 %v6723_v55 }
 0xae9   :  { %5173 = vmatpush3.bf16.msra.mxu1 %v5170_v0 }
 0xaea   :  { %5175 = vmatprep.subr.bf16.mxu1 %v5174_v47 }
 0xaeb   :  { %5131 = vmatpush1.bf16.msra.mxu0 %v5130_v15 }
 0xaec   :  { %5132 = vmatprep.subr.bf16.mxu0 %v6723_v55 }
 0xaed   :  { %5177 = vmatpush3.bf16.msra.mxu1 %v5174_v47 }
 0xaee   :  { %5179 = vmatprep.subr.bf16.mxu1 %v5178_v53 }
 0xaef   :  { %5134 = vmatpush1.bf16.msra.mxu0 %v5133_v46 }
 0xaf0   :  { %5135 = vmatprep.subr.bf16.mxu0 %v6723_v55 }
 0xaf1   :  { %5181 = vmatpush3.bf16.msra.mxu1 %v5178_v53 }
 0xaf2   :  { %5183 = vmatprep.subr.bf16.mxu1 %v5182_v9 }
 0xaf3   :  { %5137 = vmatpush1.bf16.msra.mxu0 %v5136_v51 }
 0xaf4   :  { %5138 = vmatprep.subr.bf16.mxu0 %v6723_v55 }
 0xaf5   :  { %5185 = vmatpush3.bf16.msra.mxu1 %v5182_v9  ;;  %v2700_v9 = vld [vmem:[#allocation20 + $0x11] ss:$8 sm:$0x3] }
 0xaf7   :  { %5140 = vmatpush1.bf16.msra.mxu0 %v5139_v14  ;;  %v2963_v14 = vunpack.c.0.s8 %v2962_v24 }
 0xaf8   :  { %5141 = vmatprep.subr.bf16.mxu0 %v6723_v55 }
 0xafb   :  { %5143 = vmatpush1.bf16.msra.mxu0 %v5142_v5  ;;  %v2966_v5 = vsub.s32 %v2963_v14, %v6724_v10 }
 0xafc   :  { %5144 = vmatprep.subr.bf16.mxu0 %v6723_v55 }
 0xaff   :  { %5146 = vmatpush1.bf16.msra.mxu0 %v5145_v25 }
 0xb00   :  { %5147 = vmatprep.subr.bf16.mxu0 %v6723_v55 }
 0xb03   :  { %5149 = vmatpush1.bf16.msra.mxu0 %v5148_v45 }
 0xb04   :  { %5150 = vmatprep.subr.bf16.mxu0 %v6723_v55 }
 0xb07   :  { %5152 = vmatpush1.bf16.msra.mxu0 %v5151_v35 }
 0xb08   :  { %5153 = vmatprep.subr.bf16.mxu0 %v6723_v55 }
 0xb0b   :  { %5155 = vmatpush1.bf16.msra.mxu0 %v5154_v16 }
 0xb0c   :  { %5156 = vmatprep.subr.bf16.mxu0 %v6723_v55 }
 0xb0f   :  { %5158 = vmatpush1.bf16.msra.mxu0 %v5157_v49 }
 0xb10   :  { %5159 = vmatprep.subr.bf16.mxu0 %v6723_v55 }
 0xb13   :  { %5161 = vmatpush1.bf16.msra.mxu0 %v5160_v62 }
 0xb79   :  { %v2848_v33 = vpop.f32.mrb[30].mxu0 }
 0xb7a   :  { %v2950_v59 = vmul.f32 %v2848_v33, %v2848_v33  ;;  %v2980_v63 = vrot.slane %v2848_v33, %v6111_v23  ;;  %v2850_v44 = vpop.f32.mrb[31].mxu0  ;;  %v3022_v33 = vld [vmem:[#allocation20 + $0x13] ss:$8 sm:$0x3] }
 0xb7b   :  { %v2951_v56 = vmul.f32 %v2850_v44, %v2850_v44  ;;  %v2984_v61 = vrot.slane %v2850_v44, %v6111_v23  ;;  %v2945_v18 = vpop.f32.mrb[30].mxu1  ;;  %v3008_v44 = vrot.slane %v2700_v9, %v6111_v23 }
 0xb7c   :  { %v2985_v17 = vsub.f32 %v6509_v32, %v2980_v63  ;;  %v2987_v7 = vsub.f32 %v6517_v22, %v2980_v63  ;;  %v2952_v15 = vsub.f32 %v2945_v18, %v2950_v59  ;;  %v2947_v21 = vpop.f32.mrb[31].mxu1 }
 0xb7d   :  { %v2986_v42 = vsub.f32 %v6512_v39, %v2984_v61  ;;  %v2988_v46 = vsub.f32 %v6526_v1, %v2984_v61  ;;  %v2953_v31 = vsub.f32 %v2947_v21, %v2951_v56  ;;  %v2996_v39 = vsub.s32 1, %v6724_v10 }
 0xb7e   :  { %v2954_v41 = vadd.f32 1e-05, %v2952_v15 }
 0xb7f   :  { %v2955_v51 = vadd.f32 1e-05, %v2953_v31  ;;  %v3012_v63 = vrot.slane %v2700_v9, %v2996_v39  ;;  %v3275_v61 = vrot.slane %v3022_v33, %v2996_v39 }
 0xb80   :  { %5239 = vrsqrt.f32 %v2954_v41 }
 0xb81   :  { %5241 = vrsqrt.f32 %v2955_v51 }
 0xb8a   :  { %v5240_v27 = vpop.eup %5239 }
 0xb8b   :  { %v5242_v32 = vpop.eup %5241 }
 0xb8c   :  { %v2960_v58 = vcombine.low %v5240_v27, %v5242_v32 }
 0xb8e   :  { %v2967_v22 = vrot.slane %v2960_v58, %v2966_v5 }
 0xb90   :  { %v2974_v25 = vrot.slane %v2967_v22, %v2966_v5 }
 0xb92   :  { %v2976_v20 = vmul.f32 %v2974_v25, %v2698_v8 }
 0xb94   :  { %v2997_v1 = vrot.slane %v2976_v20, %v2996_v39  ;;  %v2993_v36 = vrot.slane %v2976_v20, %v6111_v23  ;;  %v3416_v20 = vld [vmem:[#allocation23 + $0x68] sm:$0xff] }
 0xb96   :  { %v3001_v45 = vmul.f32 %v2997_v1, %v2986_v42  ;;  %v3000_v6 = vmul.f32 %v2993_v36, %v2985_v17  ;;  %v3003_v37 = vmul.f32 %v2997_v1, %v2988_v46  ;;  %v3002_v35 = vmul.f32 %v2993_v36, %v2987_v7  ;;  %v3399_v36 = vld [vmem:[%s6690_s13] sm:$0xff] }
 0xb97   :  { %v3271_v17 = vrot.slane %v3022_v33, %v6111_v23 }
 0xb98   :  { %v3016_v46 = vadd.f32 %v3012_v63, %v3001_v45  ;;  %v3015_v31 = vadd.f32 %v3008_v44, %v3000_v6  ;;  %v3018_v41 = vadd.f32 %v3012_v63, %v3003_v37  ;;  %v3017_v51 = vadd.f32 %v3008_v44, %v3002_v35  ;;  %v3400_v35 = vld [vmem:[%s6690_s13 + $0x8] sm:$0x3f] }
 0xbb1   :  { %v3111_v48 = vpop.f32.mrb[32].mxu0 }
 0xbb2   :  { %v3213_v57 = vmul.f32 %v3111_v48, %v3111_v48  ;;  %v3243_v16 = vrot.slane %v3111_v48, %v6111_v23  ;;  %v3113_v43 = vpop.f32.mrb[33].mxu0 }
 0xbb3   :  { %v3214_v54 = vmul.f32 %v3113_v43, %v3113_v43  ;;  %v3247_v49 = vrot.slane %v3113_v43, %v6111_v23  ;;  %v3208_v60 = vpop.f32.mrb[32].mxu1  ;;  %v6729_v43 = vmov 0.0  }
 0xbb4   :  { %v3248_v62 = vsub.f32 %v6725_v4, %v3243_v16  ;;  %v3250_v13 = vsub.f32 %v6726_v50, %v3243_v16  ;;  %v3215_v3 = vsub.f32 %v3208_v60, %v3213_v57  ;;  %v3210_v2 = vpop.f32.mrb[33].mxu1  ;;  %v3498_v60 = vld [vmem:[%s6692_s15] sm:$0x3]  ;;  %s5646_s15 = smov [#allocation25]  }
 0xbb5   :  { %v3249_v26 = vsub.f32 %v6727_v11, %v3247_v49  ;;  %v3251_v38 = vsub.f32 %v6728_v34, %v3247_v49  ;;  %v3216_v0 = vsub.f32 %v3210_v2, %v3214_v54  ;;  %v3704_v4 = vld [vmem:[%s6693_s16] ss:$0 sm:$0xff]  ;;  %s3603_s21 = sshll.u32 %s5646_s15, 4  ;;  %s3604_s21 = int_to_ptr.vmem [resolvable:$true] %s3603_s21 }
 0xbb6   :  { %v3217_v12 = vadd.f32 1e-05, %v3215_v3  ;;  %s5559_s28 = scalar_lea.vmem %s3604_s21, 32  ;;  %p5564_p1 = scmp.lt.s32.totalorder %s3604_s21, %s3604_s21 }
 0xbb7   :  { %v3218_v40 = vadd.f32 1e-05, %v3216_v0  ;;  %p5560_p0 = scmp.ne.s32.totalorder %s3604_s21, %s5559_s28  ;;  %p5565_p2 = scmp.lt.s32.totalorder %s5559_s28, %s5559_s28 }
 0xbb8   :  { %5243 = vrsqrt.f32 %v3217_v12 }
 0xbb9   :  { %5245 = vrsqrt.f32 %v3218_v40  ;;  %p5566_p3 = por %p5565_p2, %p5564_p1 }
 0xbbb   :  { %p5567_p4 = pnand %p5566_p3, %p5560_p0 }
 0xbc2   :  { %v5244_v47 = vpop.eup %5243 }
 0xbc3   :  { %v5246_v30 = vpop.eup %5245 }
 0xbc4   :  { %v3223_v52 = vcombine.low %v5244_v47, %v5246_v30 }
 0xbc6   :  { %v3230_v53 = vrot.slane %v3223_v52, %v2966_v5 }
 0xbc8   :  { %v3237_v28 = vrot.slane %v3230_v53, %v2966_v5 }
 0xbca   :  { %v3239_v59 = vmul.f32 %v3237_v28, %v3020_v29 }
 0xbcc   :  { %v3260_v56 = vrot.slane %v3239_v59, %v2996_v39  ;;  %v3256_v18 = vrot.slane %v3239_v59, %v6111_v23  ;;  %v3415_v39 = vld [vmem:[#allocation23 + $0x60] sm:$0xff] }
 0xbcd   :  { %v5186_v1 = vpack.c.bf16 %v3416_v20, %v3415_v39 }
 0xbce   :  { %v3264_v7 = vmul.f32 %v3260_v56, %v3249_v26  ;;  %v3263_v15 = vmul.f32 %v3256_v18, %v3248_v62  ;;  %v3266_v21 = vmul.f32 %v3260_v56, %v3251_v38  ;;  %v3265_v42 = vmul.f32 %v3256_v18, %v3250_v13 }
 0xbcf   :  { %5187 = vmatprep.subr.bf16.mxu1 %v5186_v1 }
 0xbd0   :  { %v3279_v19 = vadd.f32 %v3275_v61, %v3264_v7  ;;  %v3278_v24 = vadd.f32 %v3271_v17, %v3263_v15  ;;  %v3281_v14 = vadd.f32 %v3275_v61, %v3266_v21  ;;  %v3280_v27 = vadd.f32 %v3271_v17, %v3265_v42  ;;  %5189 = vmatpush3.bf16.msra.mxu1 %v5186_v1 }
 0xbd1   :  { %5190 = vmatprep.subr.bf16.mxu1 %v6723_v55 }
 0xbd2   :  { %v3283_v10 = vadd.f32 %v3279_v19, %v3016_v46  ;;  %v3282_v5 = vadd.f32 %v3278_v24, %v3015_v31  ;;  %v3285_v32 = vadd.f32 %v3281_v14, %v3018_v41  ;;  %v3284_v58 = vadd.f32 %v3280_v27, %v3017_v51 }
 0xbd4   :  { %v3287_v22 = vmax.f32 %v3283_v10, 0.0  ;;  %v3286_v8 = vmax.f32 %v3282_v5, 0.0  ;;  %v3289_v23 = vmax.f32 %v3285_v32, 0.0  ;;  %v3288_v25 = vmax.f32 %v3284_v58, 0.0 }
 0xbd6   :  { %3700 = vmatprep.mubr.msk.f32.mxu0 %vm2710_vm11, %v3287_v22 }
 0xbd7   :  { %3389 = vmatmul.mubr.f32.vlgmr.msra.gmra.mrb[34].mxu0 %v3286_v8 }
 0xbd8   :  { %3701 = vmatprep.mubr.msk.f32.mxu0 %vm2710_vm11, %v3289_v23 }
 0xbdb   :  { %3394 = vmatmul.mubr.f32.gmra.mrb[36].mxu0 %v3288_v25 }
 0xcaa   :  { %v3390_v45 = vpop.f32.mrb[34].mxu0 }
 0xcab   :  { %v3401_v6 = vmul.f32 %v3399_v36, %v3390_v45  ;;  %v3392_v37 = vpop.f32.mrb[35].mxu0 }
 0xcad   :  { %4484 = vmatprep.mubr.msk.f32.mxu1 %vm1299_vm7, %v3401_v6 }
 0xcae   :  { %v3395_v48 = vpop.f32.mrb[36].mxu0 }
 0xcaf   :  { %v3402_v57 = vmul.f32 %v3400_v35, %v3395_v48  ;;  %v3397_v16 = vpop.f32.mrb[37].mxu0 }
 0xcb1   :  { %4485 = vmatmul.mubr.msk.f32.vlgmr.msra.gmra.mrb[34].mxu1 %vm1299_vm7, %v3402_v57 }
 0xcb2   :  { %4491 = vmatprep.mubr.msk.f32.mxu1 %vm5644_vm5, %v6729_v43 }
 0xd84   :  { %v4486_v55 = vpop.f32.mrb[34].mxu1 }
 0xd85   :  { %v3489_v54 = vpop.f32.mrb[35].mxu1 }
 0xd86   :  { %v5191_v49 = vpack.c.bf16 %v4486_v55, %v3489_v54 }
 0xd88   :  { %5193 = vmatpush3.bf16.msk.msra.mxu1 %vm5192_vm13, %v5191_v49 }
 0xd8b   :  { %4492 = vmatmul.mubr.msk.f32.vlgmr.msra.gmra.mrb[36].mxu1 %vm3506_vm14, %v3498_v60 }
 0xe5e   :  { %v3579_v62 = vpop.f32.mrb[36].mxu1 }
 0xe5f   :  { %v3580_v50 = vadd.f32 %v3704_v4, %v3579_v62  ;;  %v4493_v13 = vpop.f32.mrb[37].mxu1 }
 0xe61   :  { %3583 = vst [vmem:[#allocation25] sm:$0x3] %v3580_v50  ;;  %v3585_v3 = vsel %vm3584_vm15, %v3580_v50, -inf }
 0xe62   :  { %3586 = vmax.xlane.f32.xlu0 %v3585_v3 }
 0xeef   :  { %v3587_v2 = vpop.xlane.xlu0 %3586 }
 0xef0   :  { %v3588_v11 = vsub.f32 %v3580_v50, %v3587_v2 }
 0xef2   :  { %v3589_v26 = vmul.f32 1.442695, %v3588_v11 }
 0xef4   :  { %5247 = vpow2.f32 %v3589_v26 }
 0xefe   :  { %v5248_v34 = vpop.eup %5247 }
 0xeff   :  { %v3591_v38 = vsel %vm3584_vm15, %v5248_v34, 0.0 }
 0xf00   :  { %3592 = vadd.xlane.f32.xlu0 %v3591_v38 }
 0xf01   :  { %5570 = shalt.err (!%p5567_p4)
}
 0xf02   :  { %s5571_s3 = scalar_lea.hbm %s6694_s17, 32 }
 0xf03   :  { %p5572_p5 = scmp.ne.s32.totalorder %s6694_s17, %s5571_s3  ;;  %p5575_p6 = scmp.lt.u32.totalorder %s5571_s3, %s6694_s17 }
 0xf05   :  { %p5577_p7 = pnand %p5575_p6, %p5572_p5 }
 0xf07   :  { %5580 = shalt.err (!%p5577_p7)
}
 0xf08   :  { %3606 = dma.vmem_to_hbm [thread:$0]  %s3604_s21, 32, %s6694_s17, [#allocation4]  }
 0xf09   :  { %s5647_s20 = smov [#allocation26]  }
 0xf0a   :  { %s3613_s4 = sshll.u32 %s5647_s20, 4  ;;  %s3614_s4 = int_to_ptr.vmem [resolvable:$true] %s3613_s4 }
 0xf0b   :  { %s5581_s0 = scalar_lea.vmem %s3614_s4, 32  ;;  %p5586_p9 = scmp.lt.s32.totalorder %s3614_s4, %s3614_s4 }
 0xf0c   :  { %p5582_p8 = scmp.ne.s32.totalorder %s3614_s4, %s5581_s0  ;;  %p5587_p10 = scmp.lt.s32.totalorder %s5581_s0, %s5581_s0 }
 0xf0e   :  { %p5588_p11 = por %p5587_p10, %p5586_p9 }
 0xf10   :  { %p5589_p12 = pnand %p5588_p11, %p5582_p8 }
 0xf8d   :  { %v3593_v0 = vpop.xlane.xlu0 %3592 }
 0xf8e   :  { %5249 = vrcp.f32 %v3593_v0 }
 0xf98   :  { %v5250_v12 = vpop.eup %5249 }
 0xf99   :  { %v3595_v40 = vmul.f32 %v5250_v12, %v5248_v34 }
 0xf9b   :  { %3596 = vst [vmem:[#allocation26] sm:$0x3] %v3595_v40 }
 0xf9c   :  { %5592 = shalt.err (!%p5589_p12)
}
 0xf9d   :  { %s6730_s29 = sld [smem:[#allocation46_spill]] }
 0xfa3   :  { %s5593_s27 = scalar_lea.hbm %s6730_s29, 32 }
 0xfa4   :  { %p5594_p13 = scmp.ne.s32.totalorder %s6730_s29, %s5593_s27  ;;  %p5597_p0 = scmp.lt.u32.totalorder %s5593_s27, %s6730_s29 }
 0xfa6   :  { %p5599_p1 = pnand %p5597_p0, %p5594_p13 }
 0xfa8   :  { %5602 = shalt.err (!%p5599_p1)
}
 0xfa9   :  { %3616 = dma.vmem_to_hbm [thread:$0]  %s3614_s4, 32, %s6730_s29, [#allocation27]  }
 0xfaa   :  { %5619 = dma.done.wait [#allocation4], 32  }
 0xfab   :  { %5620 = vsyncadd [#allocation4], 4294967264 }
 0xfac   :  { %5621 = dma.done.wait [#allocation27], 32  }
 0xfad   :  { %5622 = vsyncadd [#allocation27], 4294967264 }
 0xfae   :  { %3623 = vsyncpa [#allocation3], 1 }
 0xfaf   :  { %3624 = vsyncpa [#allocation6], 1 }
 0xfb0   :  { %3625 = vsyncpa [#allocation9], 1 }
 0xfb1   :  { %3626 = vsyncpa [#allocation12], 1 }
 0xfb2   :  { %3627 = vsyncpa [#allocation15], 1 }
 0xfb3   :  { %3628 = vsyncpa [#allocation18], 1 }
 0xfb4   :  { %3629 = vsyncpa [#allocation21], 1 }
 0xfb5   :  { %3630 = vsyncpa [#allocation24], 1 }
 0xfb6   :  { %3631 = vsyncpa [#allocation4], 1 }
 0xfb7   :  { %3632 = vsyncpa [#allocation27], 1 }

</bundles_post_ra>
